<compile_context>
chip_gen: v7x
topology: tpu7x:2x2x1
jax: 0.10.0
libtpu: 0.0.40
codegen_flags: <defaults>
</compile_context>

<pallas_src>
import jax
import jax.numpy as jnp
import numpy as np
from jax.experimental import pallas as pl
from jax.experimental.pallas import tpu as pltpu

HIDDEN = 256
N_HIDDEN_LAYERS = 4          # the four 256x256 Linear layers
NEG_SLOPE = 0.01             # PyTorch nn.LeakyReLU default
DEFAULT_TILE_B = 1024        # batch tile (lanes); sweep 512-2048
LANES = 128


def _leaky_relu(h):
    # max(h, 0.01*h) == LeakyReLU for 0 < slope < 1
    return jnp.maximum(h, NEG_SLOPE * h)


def _round_up(n, m):
    return ((n + m - 1) // m) * m


def mlp_kernel(x_ref,      # (1, 1, TILE_B)   batch on lanes
               vecs_ref,   # (256, 8)  cols: [w1, b1, b2..b5, w6, b6]
               wh_ref,     # (256, 4*256)     hidden weights, (out, in) per layer
               o_ref):     # (1, 1, TILE_B)
    x_row = x_ref[0]                              # (1, T)

    # Layer 1 (K=1): outer product on the VPU, transposed layout (256, T).
    w1 = vecs_ref[:, 0:1]                         # (256, 1)
    b1 = vecs_ref[:, 1:2]                         # (256, 1)
    h = w1 * x_row + b1                           # (256, T)
    h = _leaky_relu(h)

    # Layers 2-5: W (out,in) @ h (in,T) on the MXU; static slices are free.
    for i in range(N_HIDDEN_LAYERS):
        w = wh_ref[:, i * HIDDEN:(i + 1) * HIDDEN]    # (256, 256) = (out, in)
        b = vecs_ref[:, 2 + i:3 + i]                  # (256, 1)
        h = jnp.dot(w, h, preferred_element_type=jnp.float32) + b
        h = _leaky_relu(h)

    # Layer 6 (N=1): VPU multiply + sublane reduction -> lane-dense (1, T) row.
    w6 = vecs_ref[:, 6:7]                         # (256, 1)
    b6 = vecs_ref[0:1, 7:8]                       # (1, 1)
    out = jnp.sum(h * w6, axis=0, keepdims=True) + b6   # (1, T)
    o_ref[0] = out.astype(o_ref.dtype)


def init_params(key):
    """Deterministic init mimicking PyTorch Linear default: U(-1/sqrt(fan_in), 1/sqrt(fan_in)).

    Weights stored as (in_features, out_features) so the reference computes x @ W + b.
    """
    dims = [(1, HIDDEN), (HIDDEN, HIDDEN), (HIDDEN, HIDDEN),
            (HIDDEN, HIDDEN), (HIDDEN, HIDDEN), (HIDDEN, 1)]
    params = []
    for (fan_in, fan_out) in dims:
        key, kw, kb = jax.random.split(key, 3)
        bound = 1.0 / np.sqrt(fan_in)
        w = jax.random.uniform(kw, (fan_in, fan_out), jnp.float32, -bound, bound)
        b = jax.random.uniform(kb, (1, fan_out), jnp.float32, -bound, bound)
        params.append((w, b))
    return params


def pack_params(params):
    """Pack params ONCE into kernel-friendly arrays (call outside the forward)."""
    (w1, b1) = params[0]                          # (1,256), (1,256)
    hidden = params[1:1 + N_HIDDEN_LAYERS]        # four ((256,256),(1,256))
    (w6, b6) = params[-1]                         # (256,1), (1,1)

    cols = [w1.reshape(HIDDEN, 1), b1.reshape(HIDDEN, 1)]
    cols += [b.reshape(HIDDEN, 1) for (_, b) in hidden]
    cols += [w6.reshape(HIDDEN, 1),
             jnp.full((HIDDEN, 1), b6[0, 0], jnp.float32)]
    vecs = jnp.concatenate(cols, axis=1)          # (256, 8)

    # Hidden weights transposed to (out, in) and packed along lanes.
    wh = jnp.concatenate([w.T for (w, _) in hidden], axis=1)   # (256, 1024)
    return vecs, wh


def approximator_forward(x, packed, tile_b=DEFAULT_TILE_B):
    vecs, wh = packed
    B = x.shape[0]

    # Lane-multiple batch tile; don't over-pad tiny batches.
    tile_b = min(tile_b, _round_up(B, LANES))
    # v7x: guarantee >= 2 grid steps when the batch spans more than one tile so
    # dimension_semantics=("parallel",) shards across both TensorCores.
    if B > tile_b:
        tile_b = min(tile_b, _round_up(pl.cdiv(B, 2), LANES))

    b_pad = _round_up(B, tile_b)
    num_tiles = b_pad // tile_b

    x_flat = x.reshape(B)
    if b_pad != B:
        x_flat = jnp.pad(x_flat, (0, b_pad - B))
    xr = x_flat.reshape(num_tiles, 1, tile_b)     # lane-dense input blocks

    grid = (num_tiles,)
    x_spec = pl.BlockSpec((1, 1, tile_b), lambda i: (i, 0, 0))
    o_spec = pl.BlockSpec((1, 1, tile_b), lambda i: (i, 0, 0))
    # Constant index_map -> weights fetched once, VMEM-resident across the grid.
    vecs_spec = pl.BlockSpec((HIDDEN, 8), lambda i: (0, 0))
    wh_spec = pl.BlockSpec((HIDDEN, N_HIDDEN_LAYERS * HIDDEN), lambda i: (0, 0))

    out = pl.pallas_call(
        mlp_kernel,
        out_shape=jax.ShapeDtypeStruct((num_tiles, 1, tile_b), jnp.float32),
        grid=grid,
        in_specs=[x_spec, vecs_spec, wh_spec],
        out_specs=o_spec,
        compiler_params=pltpu.CompilerParams(
            dimension_semantics=("parallel",)),   # batch across TCs on v7x
    )(xr, vecs, wh)

    return out.reshape(b_pad, 1)[:B]


def approximator_ref(x, params):
    h = x
    for i, (w, b) in enumerate(params):
        h = h @ w + b
        if i < len(params) - 1:
            h = jnp.where(h > 0, h, NEG_SLOPE * h)
    return h


if __name__ == "__main__":
    key = jax.random.PRNGKey(0)
    k_params, k_x1, k_x2, k_x3 = jax.random.split(key, 4)

    params = init_params(k_params)
    packed = pack_params(params)   # pack once, reuse across calls

    fwd = jax.jit(approximator_forward, static_argnames=("tile_b",))

    # Small batch (latency path, single 128-lane grid step).
    B1 = 8
    x1 = jax.random.normal(k_x1, (B1, 1), jnp.float32)
    out1 = jax.block_until_ready(fwd(x1, packed))
    ref1 = approximator_ref(x1, params)
    np.testing.assert_allclose(np.asarray(out1), np.asarray(ref1), rtol=1e-5, atol=1e-5)
    assert out1.shape == (B1, 1)

    # Medium batch, non-multiple of 128 (exercises padding, single grid step).
    B2 = 500
    x2 = jax.random.normal(k_x2, (B2, 1), jnp.float32)
    out2 = jax.block_until_ready(fwd(x2, packed))
    ref2 = approximator_ref(x2, params)
    np.testing.assert_allclose(np.asarray(out2), np.asarray(ref2), rtol=1e-5, atol=1e-5)
    assert out2.shape == (B2, 1)

    # Larger batch (exercises the >= 2-step grid / two-TC path + padding).
    B3 = 1200
    x3 = jax.random.normal(k_x3, (B3, 1), jnp.float32)
    out3 = jax.block_until_ready(fwd(x3, packed))
    ref3 = approximator_ref(x3, params)
    np.testing.assert_allclose(np.asarray(out3), np.asarray(ref3), rtol=1e-5, atol=1e-5)
    assert out3.shape == (B3, 1)

    print("KERNEL_OK")
</pallas_src>

<mosaic_0001>
module attributes {stable_mosaic.version = 11 : i64} {
  func.func @mlp_kernel(%arg0: i32, %arg1: memref<1x1x128xf32, #tpu.memory_space<vmem>>, %arg2: memref<256x8xf32, #tpu.memory_space<vmem>>, %arg3: memref<256x1024xf32, #tpu.memory_space<vmem>>, %arg4: memref<1x1x128xf32, #tpu.memory_space<vmem>>) attributes {dimension_semantics = [#tpu.dimension_semantics<parallel>], iteration_bounds = array<i64: 1>, scalar_prefetch = 0 : i64, scratch_operands = 0 : i64, tpu.core_type = #tpu.core_type<tc>, window_params = [{transform_indices = @transform_0, window_bounds = array<i64: 1, 1, 128>}, {pipeline_mode = #tpu.pipeline_mode<synchronous>, transform_indices = @transform_1, window_bounds = array<i64: 256, 8>}, {pipeline_mode = #tpu.pipeline_mode<synchronous>, transform_indices = @transform_2, window_bounds = array<i64: 256, 1024>}, {transform_indices = @transform_3, window_bounds = array<i64: 1, 1, 128>}]} {
    %c0 = arith.constant 0 : index
    %c0_0 = arith.constant 0 : index
    %c0_1 = arith.constant 0 : index
    %0 = vector.load %arg1[%c0, %c0_0, %c0_1] : memref<1x1x128xf32, #tpu.memory_space<vmem>>, vector<1x1x128xf32>
    %1 = vector.shape_cast %0 : vector<1x1x128xf32> to vector<1x128xf32>
    %c0_2 = arith.constant 0 : index
    %c0_3 = arith.constant 0 : index
    %2 = vector.load %arg2[%c0_2, %c0_3] : memref<256x8xf32, #tpu.memory_space<vmem>>, vector<256x1xf32>
    %c0_4 = arith.constant 0 : index
    %c1 = arith.constant 1 : index
    %3 = vector.load %arg2[%c0_4, %c1] : memref<256x8xf32, #tpu.memory_space<vmem>>, vector<256x1xf32>
    %4 = vector.broadcast %2 : vector<256x1xf32> to vector<256x128xf32>
    %5 = vector.broadcast %1 : vector<1x128xf32> to vector<256x128xf32>
    %6 = arith.mulf %4, %5 : vector<256x128xf32>
    %7 = vector.broadcast %3 : vector<256x1xf32> to vector<256x128xf32>
    %8 = arith.addf %6, %7 : vector<256x128xf32>
    %cst = arith.constant 0.00999999977 : f32
    %9 = vector.broadcast %cst : f32 to vector<256x128xf32>
    %10 = arith.mulf %9, %8 : vector<256x128xf32>
    %11 = arith.maximumf %8, %10 : vector<256x128xf32>
    %c0_5 = arith.constant 0 : index
    %c0_6 = arith.constant 0 : index
    %12 = vector.load %arg3[%c0_5, %c0_6] : memref<256x1024xf32, #tpu.memory_space<vmem>>, vector<256x256xf32>
    %c0_7 = arith.constant 0 : index
    %c2 = arith.constant 2 : index
    %13 = vector.load %arg2[%c0_7, %c2] : memref<256x8xf32, #tpu.memory_space<vmem>>, vector<256x1xf32>
    %cst_8 = arith.constant dense<0.000000e+00> : vector<256x128xf32>
    %14 = tpu.matmul %12, %11, %cst_8 {dimension_numbers = #tpu.dot_dimension_numbers<[1], [0], [0], [1], [0, 0, 1, 1], [], []>} : vector<256x256xf32>, vector<256x128xf32>, vector<256x128xf32> -> vector<256x128xf32>
    %15 = vector.broadcast %13 : vector<256x1xf32> to vector<256x128xf32>
    %16 = arith.addf %14, %15 : vector<256x128xf32>
    %cst_9 = arith.constant 0.00999999977 : f32
    %17 = vector.broadcast %cst_9 : f32 to vector<256x128xf32>
    %18 = arith.mulf %17, %16 : vector<256x128xf32>
    %19 = arith.maximumf %16, %18 : vector<256x128xf32>
    %c0_10 = arith.constant 0 : index
    %c256 = arith.constant 256 : index
    %20 = vector.load %arg3[%c0_10, %c256] : memref<256x1024xf32, #tpu.memory_space<vmem>>, vector<256x256xf32>
    %c0_11 = arith.constant 0 : index
    %c3 = arith.constant 3 : index
    %21 = vector.load %arg2[%c0_11, %c3] : memref<256x8xf32, #tpu.memory_space<vmem>>, vector<256x1xf32>
    %cst_12 = arith.constant dense<0.000000e+00> : vector<256x128xf32>
    %22 = tpu.matmul %20, %19, %cst_12 {dimension_numbers = #tpu.dot_dimension_numbers<[1], [0], [0], [1], [0, 0, 1, 1], [], []>} : vector<256x256xf32>, vector<256x128xf32>, vector<256x128xf32> -> vector<256x128xf32>
    %23 = vector.broadcast %21 : vector<256x1xf32> to vector<256x128xf32>
    %24 = arith.addf %22, %23 : vector<256x128xf32>
    %cst_13 = arith.constant 0.00999999977 : f32
    %25 = vector.broadcast %cst_13 : f32 to vector<256x128xf32>
    %26 = arith.mulf %25, %24 : vector<256x128xf32>
    %27 = arith.maximumf %24, %26 : vector<256x128xf32>
    %c0_14 = arith.constant 0 : index
    %c512 = arith.constant 512 : index
    %28 = vector.load %arg3[%c0_14, %c512] : memref<256x1024xf32, #tpu.memory_space<vmem>>, vector<256x256xf32>
    %c0_15 = arith.constant 0 : index
    %c4 = arith.constant 4 : index
    %29 = vector.load %arg2[%c0_15, %c4] : memref<256x8xf32, #tpu.memory_space<vmem>>, vector<256x1xf32>
    %cst_16 = arith.constant dense<0.000000e+00> : vector<256x128xf32>
    %30 = tpu.matmul %28, %27, %cst_16 {dimension_numbers = #tpu.dot_dimension_numbers<[1], [0], [0], [1], [0, 0, 1, 1], [], []>} : vector<256x256xf32>, vector<256x128xf32>, vector<256x128xf32> -> vector<256x128xf32>
    %31 = vector.broadcast %29 : vector<256x1xf32> to vector<256x128xf32>
    %32 = arith.addf %30, %31 : vector<256x128xf32>
    %cst_17 = arith.constant 0.00999999977 : f32
    %33 = vector.broadcast %cst_17 : f32 to vector<256x128xf32>
    %34 = arith.mulf %33, %32 : vector<256x128xf32>
    %35 = arith.maximumf %32, %34 : vector<256x128xf32>
    %c0_18 = arith.constant 0 : index
    %c768 = arith.constant 768 : index
    %36 = vector.load %arg3[%c0_18, %c768] : memref<256x1024xf32, #tpu.memory_space<vmem>>, vector<256x256xf32>
    %c0_19 = arith.constant 0 : index
    %c5 = arith.constant 5 : index
    %37 = vector.load %arg2[%c0_19, %c5] : memref<256x8xf32, #tpu.memory_space<vmem>>, vector<256x1xf32>
    %cst_20 = arith.constant dense<0.000000e+00> : vector<256x128xf32>
    %38 = tpu.matmul %36, %35, %cst_20 {dimension_numbers = #tpu.dot_dimension_numbers<[1], [0], [0], [1], [0, 0, 1, 1], [], []>} : vector<256x256xf32>, vector<256x128xf32>, vector<256x128xf32> -> vector<256x128xf32>
    %39 = vector.broadcast %37 : vector<256x1xf32> to vector<256x128xf32>
    %40 = arith.addf %38, %39 : vector<256x128xf32>
    %cst_21 = arith.constant 0.00999999977 : f32
    %41 = vector.broadcast %cst_21 : f32 to vector<256x128xf32>
    %42 = arith.mulf %41, %40 : vector<256x128xf32>
    %43 = arith.maximumf %40, %42 : vector<256x128xf32>
    %c0_22 = arith.constant 0 : index
    %c6 = arith.constant 6 : index
    %44 = vector.load %arg2[%c0_22, %c6] : memref<256x8xf32, #tpu.memory_space<vmem>>, vector<256x1xf32>
    %c0_23 = arith.constant 0 : index
    %c7 = arith.constant 7 : index
    %45 = vector.load %arg2[%c0_23, %c7] : memref<256x8xf32, #tpu.memory_space<vmem>>, vector<1x1xf32>
    %46 = vector.broadcast %44 : vector<256x1xf32> to vector<256x128xf32>
    %47 = arith.mulf %43, %46 : vector<256x128xf32>
    %cst_24 = arith.constant dense<0.000000e+00> : vector<128xf32>
    %48 = vector.multi_reduction <add>, %47, %cst_24 [0] : vector<256x128xf32> to vector<128xf32>
    %49 = vector.shape_cast %48 : vector<128xf32> to vector<1x128xf32>
    %50 = vector.broadcast %45 : vector<1x1xf32> to vector<1x128xf32>
    %51 = arith.addf %49, %50 : vector<1x128xf32>
    %c0_25 = arith.constant 0 : index
    %c0_26 = arith.constant 0 : index
    %c0_27 = arith.constant 0 : index
    %52 = vector.load %arg4[%c0_25, %c0_26, %c0_27] : memref<1x1x128xf32, #tpu.memory_space<vmem>>, vector<1x1x128xf32>
    %53 = vector.shape_cast %52 : vector<1x1x128xf32> to vector<1x128xf32>
    %54 = vector.shape_cast %51 : vector<1x128xf32> to vector<1x1x128xf32>
    tpu.vector_store %arg4[%c0_25, %c0_26, %c0_27], %54 {strides = array<i32>} : memref<1x1x128xf32, #tpu.memory_space<vmem>>, vector<1x1x128xf32>,
    return
  }
  func.func @transform_0(%arg0: i32) -> (i32, i32, i32) {
    %c0_i32 = arith.constant 0 : i32
    %c0_i32_0 = arith.constant 0 : i32
    %c0_i32_1 = arith.constant 0 : i32
    return %arg0, %c0_i32, %c0_i32_0 : i32, i32, i32
  }
  func.func @transform_1(%arg0: i32) -> (i32, i32) {
    %c0_i32 = arith.constant 0 : i32
    %c0_i32_0 = arith.constant 0 : i32
    %c0_i32_1 = arith.constant 0 : i32
    return %c0_i32, %c0_i32_0 : i32, i32
  }
  func.func @transform_2(%arg0: i32) -> (i32, i32) {
    %c0_i32 = arith.constant 0 : i32
    %c0_i32_0 = arith.constant 0 : i32
    %c0_i32_1 = arith.constant 0 : i32
    return %c0_i32, %c0_i32_0 : i32, i32
  }
  func.func @transform_3(%arg0: i32) -> (i32, i32, i32) {
    %c0_i32 = arith.constant 0 : i32
    %c0_i32_0 = arith.constant 0 : i32
    %c0_i32_1 = arith.constant 0 : i32
    return %arg0, %c0_i32, %c0_i32_0 : i32, i32, i32
  }
}

</mosaic_0001>

<bundles_post_ra>
// kernel: approximator_forward.1
= control target key start
LH: loop header
LB: loop body
LE: loop exit
PB: predicated region body
PF: predicated region fallthrough
CT: control target
= control target key end

     0   :  { %8 = vsyncpa [#allocation3], 0  ;;  %s2957_s12 = smov [#allocation2]   ;;  %s3934_s0 = inlined_call_operand.vmem [shape: f32[1,1,128], index: 0, kind: input, shape index: {}]   ;;  %s3935_s1 = inlined_call_operand.vmem [shape: f32[256,8], index: 1, kind: input, shape index: {}]   ;;  %s3936_s2 = inlined_call_operand.hbm [shape: f32[256,1024], index: 2, kind: input, shape index: {}]   ;;  %s3937_s3 = inlined_call_operand.vmem [shape: f32[1,1,128], index: 3, kind: output, shape index: {}]  }
   0x1   :  { %s18_s13 = sshll.u32 %s2957_s12, 4  ;;  %s2933_s16 = scalar_lea.hbm %s3936_s2, 32768  ;;  %s19_s13 = int_to_ptr.vmem [resolvable:$true] %s18_s13 }
   0x2   :  { %p2934_p0 = scmp.ne.s32.totalorder %s3936_s2, %s2933_s16  ;;  %p2937_p1 = scmp.lt.u32.totalorder %s2933_s16, %s3936_s2 }
   0x4   :  { %p2939_p2 = pnand %p2937_p1, %p2934_p0 }
   0x6   :  { %2942 = shalt.err (!%p2939_p2)
}
   0x7   :  { %s2943_s21 = scalar_lea.vmem %s19_s13, 32768  ;;  %p2948_p4 = scmp.lt.s32.totalorder %s19_s13, %s19_s13 }
   0x8   :  { %p2944_p3 = scmp.ne.s32.totalorder %s19_s13, %s2943_s21  ;;  %p2949_p5 = scmp.lt.s32.totalorder %s2943_s21, %s2943_s21 }
   0xa   :  { %p2950_p6 = por %p2949_p5, %p2948_p4 }
   0xc   :  { %p2951_p7 = pnand %p2950_p6, %p2944_p3 }
   0xe   :  { %2954 = shalt.err (!%p2951_p7)
}
   0xf   :  { %s2958_s22 = smov 1024   ;;  %s2959_s23 = smov 64  }
  0x10   :  { %24 = dma.hbm_to_vmem [thread:$0]  %s3936_s2, 32768, %s19_s13, [#allocation3], %s2958_s22, %s2958_s22, %s2959_s23  }
  0x11   :  { %2955 = dma.done.wait [#allocation3], 32768  }
  0x12   :  { %2956 = vsyncadd [#allocation3], 4294934528  ;;  %v2960_v0 = vmov 1   ;;  %v3006_v1 = vld [vmem:[%s3935_s1 + $0x10] sm:$0xff]  ;;  %v3011_v2 = vld [vmem:[%s3935_s1] sm:$0xff]  ;;  %v3938_v7 = vmov 0  }
  0x13   :  { %2824 = vset.pattern.permute.xlu0 %v2960_v0  ;;  %2822 = vset.pattern.permute.xlu1 %v2960_v0  ;;  %v3018_v3 = vld [vmem:[%s3935_s1 + $0x30] sm:$0xff]  ;;  %v3023_v4 = vld [vmem:[%s3935_s1 + $0x8] sm:$0xff]  ;;  %v3035_v6 = vld [vmem:[%s3935_s1 + $0x18] sm:$0xff]  ;;  %v3939_v16 = vmov 0.0|0.0  }
  0x14   :  { %268 = vperm.xlu0 %2824, %v3006_v1   ;;  %260 = vperm.xlu1 %2822, %v3011_v2   ;;  %v3030_v5 = vld [vmem:[%s3935_s1 + $0x50] sm:$0xff]  ;;  %v3057_v10 = vld [vmem:[%s3935_s1 + $0x20] sm:$0xff]  ;;  %v3078_v13 = vld [vmem:[%s3935_s1 + $0x28] sm:$0xff] }
  0x15   :  { %v3043_v8 = vld [vmem:[%s3935_s1 + $0x70] sm:$0xff]  ;;  %v3086_v14 = vld [vmem:[%s3935_s1 + $0x38] sm:$0xff]  ;;  %v3097_v15 = vld [vmem:[%s3935_s1 + $0x40] sm:$0xff]  ;;  %2618 = vmatprep.subr.bf16.mxu0 %v3939_v16  ;;  %2666 = vmatprep.subr.bf16.mxu1 %v3939_v16 }
  0x16   :  { %v3050_v9 = vld [vmem:[%s3935_s1 + $0x90] sm:$0xff]  ;;  %v3108_v17 = vld [vmem:[%s3935_s1 + $0x48] sm:$0xff]  ;;  %v3123_v19 = vld [vmem:[%s3935_s1 + $0x58] sm:$0xff] }
  0x17   :  { %v3062_v11 = vld [vmem:[%s3935_s1 + $0xb0] sm:$0xff]  ;;  %v3118_v18 = vld [vmem:[%s3935_s1 + $0x68] sm:$0xff]  ;;  %v3139_v21 = vld [vmem:[%s3935_s1 + $0x60] sm:$0xff] }
  0x18   :  { %284 = vperm.xlu0 %2824, %v3018_v3   ;;  %264 = vperm.xlu1 %2822, %v3023_v4   ;;  %v3070_v12 = vld [vmem:[%s3935_s1 + $0xd0] sm:$0xff]  ;;  %v3134_v20 = vld [vmem:[%s3935_s1 + $0x88] sm:$0xff]  ;;  %v3163_v24 = vld [vmem:[%s3935_s1 + $0x78] sm:$0xff] }
  0x19   :  { %v3148_v22 = vld [vmem:[%s3935_s1 + $0xa8] sm:$0xff]  ;;  %v3179_v26 = vld [vmem:[%s3935_s1 + $0x80] sm:$0xff]  ;;  %v3186_v27 = vld [vmem:[%s3935_s1 + $0xf0] sm:$0xff] }
  0x1a   :  { %v3158_v23 = vld [vmem:[%s3935_s1 + $0xc8] sm:$0xff]  ;;  %3943 = vst [vmem:[#allocation5_spill] sm:$0xff] %v3186_v27  ;;  %v3198_v28 = vld [vmem:[%s3935_s1 + $0x98] sm:$0xff]  ;;  %v3207_v29 = vld [vmem:[%s3935_s1 + $0xa0] sm:$0xff] }
  0x1b   :  { %v3174_v25 = vld [vmem:[%s3935_s1 + $0xe8] sm:$0xff]  ;;  %v3217_v30 = vld [vmem:[%s3935_s1 + $0xb8] sm:$0xff]  ;;  %v3230_v37 = vld [vmem:[%s3935_s1 + $0xc0] sm:$0xff] }
  0x1c   :  { %300 = vperm.xlu0 %2824, %v3030_v5   ;;  %2823 = vset.pattern.permute.xlu1 %v3938_v7  ;;  %v3246_v43 = vld [vmem:[%s3935_s1 + $0xd8] sm:$0xff]  ;;  %v3255_v47 = vld [vmem:[%s3934_s0] ss:$0 sm:$0xff] }
  0x1d   :  { %78 = vperm.xlu1 %2823, %v3035_v6   ;;  %3944 = vst [vmem:[#allocation6_spill] sm:$0xff] %v3246_v43  ;;  %v3264_v54 = vld [vmem:[%s3935_s1 + $0xe0] sm:$0xff] }
  0x20   :  { %316 = vperm.xlu0 %2824, %v3043_v8  }
  0x21   :  { %2825 = vset.pattern.permute.xlu1 %v2960_v0 }
  0x22   :  { %272 = vperm.xlu1 %2825, %v3035_v6  }
  0x24   :  { %332 = vperm.xlu0 %2824, %v3050_v9  }
  0x26   :  { %2826 = vset.pattern.permute.xlu1 %v3938_v7 }
  0x27   :  { %83 = vperm.xlu1 %2826, %v3057_v10  }
  0x28   :  { %348 = vperm.xlu0 %2824, %v3062_v11  }
  0x2b   :  { %2827 = vset.pattern.permute.xlu1 %v2960_v0 }
  0x2c   :  { %364 = vperm.xlu0 %2824, %v3070_v12   ;;  %276 = vperm.xlu1 %2827, %v3057_v10  }
  0x30   :  { %2849 = vset.pattern.permute.xlu0 %v3938_v7  ;;  %280 = vperm.xlu1 %2827, %v3078_v13  }
  0x31   :  { %63 = vperm.xlu0 %2849, %v3011_v2  }
  0x34   :  { %2828 = vset.pattern.permute.xlu1 %v3938_v7 }
  0x35   :  { %68 = vperm.xlu0 %2849, %v3023_v4   ;;  %98 = vperm.xlu1 %2828, %v3086_v14  }
  0x39   :  { %73 = vperm.xlu0 %2849, %v3006_v1   ;;  %2829 = vset.pattern.permute.xlu1 %v2960_v0 }
  0x3a   :  { %288 = vperm.xlu1 %2829, %v3086_v14  }
  0x3d   :  { %88 = vperm.xlu0 %2849, %v3078_v13  }
  0x3e   :  { %2830 = vset.pattern.permute.xlu1 %v3938_v7 }
  0x3f   :  { %103 = vperm.xlu1 %2830, %v3097_v15  }
  0x41   :  { %93 = vperm.xlu0 %2849, %v3018_v3  }
  0x43   :  { %2831 = vset.pattern.permute.xlu1 %v2960_v0 }
  0x44   :  { %292 = vperm.xlu1 %2831, %v3097_v15  }
  0x45   :  { %108 = vperm.xlu0 %2849, %v3108_v17  }
  0x48   :  { %296 = vperm.xlu1 %2831, %v3108_v17  }
  0x49   :  { %113 = vperm.xlu0 %2849, %v3030_v5  }
  0x4c   :  { %2832 = vset.pattern.permute.xlu1 %v3938_v7 }
  0x4d   :  { %128 = vperm.xlu0 %2849, %v3118_v18   ;;  %118 = vperm.xlu1 %2832, %v3123_v19  }
  0x51   :  { %133 = vperm.xlu0 %2849, %v3043_v8   ;;  %2833 = vset.pattern.permute.xlu1 %v2960_v0 }
  0x52   :  { %304 = vperm.xlu1 %2833, %v3123_v19  }
  0x55   :  { %148 = vperm.xlu0 %2849, %v3134_v20  }
  0x56   :  { %2834 = vset.pattern.permute.xlu1 %v3938_v7 }
  0x57   :  { %123 = vperm.xlu1 %2834, %v3139_v21  }
  0x59   :  { %153 = vperm.xlu0 %2849, %v3050_v9  }
  0x5b   :  { %2835 = vset.pattern.permute.xlu1 %v2960_v0 }
  0x5c   :  { %308 = vperm.xlu1 %2835, %v3139_v21  }
  0x5d   :  { %168 = vperm.xlu0 %2849, %v3148_v22  }
  0x60   :  { %312 = vperm.xlu1 %2835, %v3118_v18  }
  0x61   :  { %173 = vperm.xlu0 %2849, %v3062_v11  }
  0x64   :  { %2836 = vset.pattern.permute.xlu1 %v3938_v7 }
  0x65   :  { %188 = vperm.xlu0 %2849, %v3158_v23   ;;  %138 = vperm.xlu1 %2836, %v3163_v24  }
  0x69   :  { %193 = vperm.xlu0 %2849, %v3070_v12   ;;  %2837 = vset.pattern.permute.xlu1 %v2960_v0 }
  0x6a   :  { %320 = vperm.xlu1 %2837, %v3163_v24  }
  0x6d   :  { %208 = vperm.xlu0 %2849, %v3174_v25  }
  0x6e   :  { %2838 = vset.pattern.permute.xlu1 %v3938_v7 }
  0x6f   :  { %143 = vperm.xlu1 %2838, %v3179_v26  }
  0x71   :  { %213 = vperm.xlu0 %2849, %v3186_v27  }
  0x73   :  { %2839 = vset.pattern.permute.xlu1 %v2960_v0 }
  0x74   :  { %324 = vperm.xlu1 %2839, %v3179_v26  }
  0x75   :  { %2854 = vset.pattern.permute.xlu0 %v2960_v0 }
  0x76   :  { %380 = vperm.xlu0 %2854, %v3186_v27  }
  0x78   :  { %328 = vperm.xlu1 %2839, %v3134_v20  }
  0x7c   :  { %2840 = vset.pattern.permute.xlu1 %v3938_v7 }
  0x7d   :  { %158 = vperm.xlu1 %2840, %v3198_v28  }
  0x81   :  { %2841 = vset.pattern.permute.xlu1 %v2960_v0 }
  0x82   :  { %336 = vperm.xlu1 %2841, %v3198_v28  }
  0x86   :  { %2842 = vset.pattern.permute.xlu1 %v3938_v7 }
  0x87   :  { %163 = vperm.xlu1 %2842, %v3207_v29  }
  0x8b   :  { %2843 = vset.pattern.permute.xlu1 %v2960_v0 }
  0x8c   :  { %340 = vperm.xlu1 %2843, %v3207_v29  }
  0x90   :  { %344 = vperm.xlu1 %2843, %v3148_v22  }
  0x93   :  { %v261_v31 = vpop.permute.xlu1 %260  ;;  %v269_v32 = vpop.permute.xlu0 %268 }
  0x94   :  { %2844 = vset.pattern.permute.xlu1 %v3938_v7 }
  0x95   :  { %178 = vperm.xlu1 %2844, %v3217_v30  }
  0x97   :  { %v265_v33 = vpop.permute.xlu1 %264  ;;  %v3221_v34 = vpop.permute.xlu0 %284 }
  0x99   :  { %2845 = vset.pattern.permute.xlu1 %v2960_v0 }
  0x9a   :  { %352 = vperm.xlu1 %2845, %v3217_v30  }
  0x9b   :  { %v3225_v35 = vpop.permute.xlu0 %300 }
  0x9c   :  { %v79_v36 = vpop.permute.xlu1 %78 }
  0x9d   :  { %v230_v51 = vmul.f32 %v3255_v47, %v79_v36 }
  0x9e   :  { %2846 = vset.pattern.permute.xlu1 %v3938_v7 }
  0x9f   :  { %183 = vperm.xlu1 %2846, %v3230_v37   ;;  %v3234_v38 = vpop.permute.xlu0 %316 }
  0xa1   :  { %v273_v39 = vpop.permute.xlu1 %272 }
  0xa2   :  { %v390_v56 = vadd.f32 %v273_v39, %v230_v51 }
  0xa3   :  { %2847 = vset.pattern.permute.xlu1 %v2960_v0  ;;  %v3237_v40 = vpop.permute.xlu0 %332 }
  0xa4   :  { %356 = vperm.xlu1 %2847, %v3230_v37  }
  0xa6   :  { %v84_v41 = vpop.permute.xlu1 %83 }
  0xa7   :  { %v3240_v42 = vpop.permute.xlu0 %348  ;;  %v231_v60 = vmul.f32 %v3255_v47, %v84_v41 }
  0xa8   :  { %360 = vperm.xlu1 %2847, %v3158_v23  }
  0xab   :  { %v277_v44 = vpop.permute.xlu1 %276  ;;  %v3248_v45 = vpop.permute.xlu0 %364 }
  0xac   :  { %2848 = vset.pattern.permute.xlu1 %v3938_v7  ;;  %v391_v36 = vadd.f32 %v277_v44, %v231_v60 }
  0xad   :  { %198 = vperm.xlu1 %2848, %v3246_v43  }
  0xae   :  { %v423_v16 = vmul.f32 0.01, %v391_v36 }
  0xaf   :  { %v281_v46 = vpop.permute.xlu1 %280 }
  0xb0   :  { %v64_v48 = vpop.permute.xlu0 %63 }
  0xb1   :  { %v227_v49 = vmul.f32 %v3255_v47, %v64_v48  ;;  %2850 = vset.pattern.permute.xlu1 %v2960_v0 }
  0xb2   :  { %368 = vperm.xlu1 %2850, %v3246_v43  }
  0xb3   :  { %v387_v50 = vadd.f32 %v261_v31, %v227_v49  ;;  %v422_v31 = vmul.f32 0.01, %v390_v56 }
  0xb4   :  { %v69_v52 = vpop.permute.xlu0 %68  ;;  %v99_v53 = vpop.permute.xlu1 %98 }
  0xb5   :  { %v228_v55 = vmul.f32 %v3255_v47, %v69_v52  ;;  %v419_v58 = vmul.f32 0.01, %v387_v50 }
  0xb6   :  { %2851 = vset.pattern.permute.xlu1 %v3938_v7  ;;  %v454_v7 = vmax.f32 %v390_v56, %v422_v31  ;;  %v3282_v56 = vld [vmem:[%s3935_s1 + $0xf8] sm:$0xff] }
  0xb7   :  { %v388_v57 = vadd.f32 %v265_v33, %v228_v55  ;;  %203 = vperm.xlu1 %2851, %v3264_v54   ;;  %v451_v49 = vmax.f32 %v387_v50, %v419_v58  ;;  %v234_v33 = vmul.f32 %v3255_v47, %v99_v53  ;;  %v3945_v50 = vmov 0.0|0.0  }
  0xb8   :  { %v74_v59 = vpop.permute.xlu0 %73 }
  0xb9   :  { %v229_v61 = vmul.f32 %v3255_v47, %v74_v59  ;;  %v289_v62 = vpop.permute.xlu1 %288  ;;  %v420_v63 = vmul.f32 0.01, %v388_v57 }
  0xba   :  { %v394_v43 = vadd.f32 %v289_v62, %v234_v33 }
  0xbb   :  { %v389_v48 = vadd.f32 %v269_v32, %v229_v61  ;;  %2852 = vset.pattern.permute.xlu1 %v2960_v0  ;;  %v452_v39 = vmax.f32 %v388_v57, %v420_v63  ;;  %v455_v61 = vmax.f32 %v391_v36, %v423_v16 }
  0xbc   :  { %v89_v51 = vpop.permute.xlu0 %88  ;;  %372 = vperm.xlu1 %2852, %v3264_v54   ;;  %v426_v62 = vmul.f32 0.01, %v394_v43 }
  0xbd   :  { %v421_v52 = vmul.f32 0.01, %v389_v48  ;;  %v232_v55 = vmul.f32 %v3255_v47, %v89_v51  ;;  %v2619_v41 = vpack.c.bf16 %v452_v39, %v451_v49  ;;  %v3946_v39 = vmov 0  }
  0xbe   :  { %v104_v59 = vpop.permute.xlu1 %103  ;;  %v458_v33 = vmax.f32 %v394_v43, %v426_v62 }
  0xbf   :  { %v453_v27 = vmax.f32 %v389_v48, %v421_v52  ;;  %v392_v44 = vadd.f32 %v281_v46, %v232_v55  ;;  %2620 = vmatpush1.bf16.msra.mxu0 %v2619_v41  ;;  %v235_v60 = vmul.f32 %v3255_v47, %v104_v59 }
  0xc0   :  { %v94_v32 = vpop.permute.xlu0 %93  ;;  %376 = vperm.xlu1 %2852, %v3174_v25   ;;  %2621 = vmatprep.subr.bf16.mxu0 %v3945_v50 }
  0xc1   :  { %v424_v57 = vmul.f32 0.01, %v392_v44  ;;  %v233_v58 = vmul.f32 %v3255_v47, %v94_v32  ;;  %v2622_v53 = vpack.c.bf16 %v454_v7, %v453_v27 }
  0xc3   :  { %v456_v46 = vmax.f32 %v392_v44, %v424_v57  ;;  %v393_v63 = vadd.f32 %v3221_v34, %v233_v58  ;;  %v293_v31 = vpop.permute.xlu1 %292  ;;  %2623 = vmatpush1.bf16.msra.mxu0 %v2622_v53 }
  0xc4   :  { %v395_v48 = vadd.f32 %v293_v31, %v235_v60  ;;  %v109_v49 = vpop.permute.xlu0 %108  ;;  %2853 = vset.pattern.permute.xlu1 %v3946_v39  ;;  %2624 = vmatprep.subr.bf16.mxu0 %v3945_v50 }
  0xc5   :  { %v425_v7 = vmul.f32 0.01, %v393_v63  ;;  %v236_v27 = vmul.f32 %v3255_v47, %v109_v49  ;;  %218 = vperm.xlu1 %2853, %v3282_v56   ;;  %v2625_v51 = vpack.c.bf16 %v456_v46, %v455_v61  ;;  %v484_v46 = vld [vmem:[#allocation2 + $0x8] sm:$0xff] }
  0xc6   :  { %v427_v52 = vmul.f32 0.01, %v395_v48  ;;  %739 = vmatprep.mubr.f32.mxu0 %v484_v46 }
  0xc7   :  { %v457_v16 = vmax.f32 %v393_v63, %v425_v7  ;;  %v297_v36 = vpop.permute.xlu1 %296  ;;  %2626 = vmatpush1.bf16.msra.mxu0 %v2625_v51 }
  0xc8   :  { %v396_v34 = vadd.f32 %v297_v36, %v236_v27  ;;  %v114_v55 = vpop.permute.xlu0 %113  ;;  %2627 = vmatprep.subr.bf16.mxu0 %v3945_v50  ;;  %v459_v32 = vmax.f32 %v395_v48, %v427_v52 }
  0xc9   :  { %v237_v41 = vmul.f32 %v3255_v47, %v114_v55  ;;  %2855 = vset.pattern.permute.xlu1 %v2960_v0  ;;  %v2628_v59 = vpack.c.bf16 %v458_v33, %v457_v16 }
  0xca   :  { %v428_v44 = vmul.f32 0.01, %v396_v34  ;;  %384 = vperm.xlu1 %2855, %v3282_v56  }
  0xcb   :  { %2629 = vmatpush1.bf16.msra.mxu0 %v2628_v59  ;;  %v397_v43 = vadd.f32 %v3225_v35, %v237_v41 }
  0xcc   :  { %v460_v57 = vmax.f32 %v396_v34, %v428_v44  ;;  %v119_v58 = vpop.permute.xlu1 %118  ;;  %2630 = vmatprep.subr.bf16.mxu0 %v3945_v50  ;;  %v129_v7 = vpop.permute.xlu0 %128 }
  0xcd   :  { %v429_v60 = vmul.f32 0.01, %v397_v43  ;;  %v238_v61 = vmul.f32 %v3255_v47, %v119_v58  ;;  %v240_v51 = vmul.f32 %v3255_v47, %v129_v7 }
  0xce   :  { %v2631_v53 = vpack.c.bf16 %v460_v57, %v459_v32 }
  0xcf   :  { %v461_v63 = vmax.f32 %v397_v43, %v429_v60 }
  0xd0   :  { %2632 = vmatpush1.bf16.msra.mxu0 %v2631_v53  ;;  %v134_v34 = vpop.permute.xlu0 %133 }
  0xd1   :  { %v305_v62 = vpop.permute.xlu1 %304  ;;  %2633 = vmatprep.subr.bf16.mxu0 %v3945_v50  ;;  %v241_v55 = vmul.f32 %v3255_v47, %v134_v34 }
  0xd2   :  { %v398_v0 = vadd.f32 %v305_v62, %v238_v61 }
  0xd3   :  { %v401_v57 = vadd.f32 %v3234_v38, %v241_v55 }
  0xd4   :  { %v430_v31 = vmul.f32 0.01, %v398_v0 }
  0xd5   :  { %v433_v60 = vmul.f32 0.01, %v401_v57 }
  0xd6   :  { %v462_v48 = vmax.f32 %v398_v0, %v430_v31  ;;  %v124_v49 = vpop.permute.xlu1 %123 }
  0xd7   :  { %v239_v35 = vmul.f32 %v3255_v47, %v124_v49  ;;  %v465_v0 = vmax.f32 %v401_v57, %v433_v60  ;;  %v149_v49 = vpop.permute.xlu0 %148 }
  0xd8   :  { %v2634_v39 = vpack.c.bf16 %v462_v48, %v461_v63  ;;  %v244_v38 = vmul.f32 %v3255_v47, %v149_v49 }
  0xda   :  { %2635 = vmatpush1.bf16.msra.mxu0 %v2634_v39 }
  0xdb   :  { %v309_v27 = vpop.permute.xlu1 %308  ;;  %2636 = vmatprep.subr.bf16.mxu0 %v3945_v50 }
  0xdc   :  { %v399_v33 = vadd.f32 %v309_v27, %v239_v35 }
  0xde   :  { %v431_v36 = vmul.f32 0.01, %v399_v33 }
  0xdf   :  { %v313_v16 = vpop.permute.xlu1 %312 }
  0xe0   :  { %v400_v52 = vadd.f32 %v313_v16, %v240_v51  ;;  %v463_v59 = vmax.f32 %v399_v33, %v431_v36  ;;  %v154_v33 = vpop.permute.xlu0 %153 }
  0xe1   :  { %v245_v16 = vmul.f32 %v3255_v47, %v154_v33 }
  0xe2   :  { %v432_v41 = vmul.f32 0.01, %v400_v52 }
  0xe4   :  { %v464_v44 = vmax.f32 %v400_v52, %v432_v41  ;;  %v139_v32 = vpop.permute.xlu1 %138  ;;  %v405_v41 = vadd.f32 %v3237_v40, %v245_v16 }
  0xe5   :  { %v242_v58 = vmul.f32 %v3255_v47, %v139_v32 }
  0xe6   :  { %v2637_v43 = vpack.c.bf16 %v464_v44, %v463_v59  ;;  %v437_v57 = vmul.f32 0.01, %v405_v41 }
  0xe8   :  { %2638 = vmatpush1.bf16.msra.mxu0 %v2637_v43 }
  0xe9   :  { %v321_v53 = vpop.permute.xlu1 %320  ;;  %2639 = vmatprep.subr.bf16.mxu0 %v3945_v50 }
  0xea   :  { %v402_v61 = vadd.f32 %v321_v53, %v242_v58  ;;  %v469_v53 = vmax.f32 %v405_v41, %v437_v57 }
  0xec   :  { %v434_v62 = vmul.f32 0.01, %v402_v61 }
  0xee   :  { %v466_v46 = vmax.f32 %v402_v61, %v434_v62  ;;  %v144_v63 = vpop.permute.xlu1 %143 }
  0xef   :  { %v243_v48 = vmul.f32 %v3255_v47, %v144_v63 }
  0xf0   :  { %v2640_v31 = vpack.c.bf16 %v466_v46, %v465_v0  ;;  %v169_v46 = vpop.permute.xlu0 %168 }
  0xf2   :  { %2641 = vmatpush1.bf16.msra.mxu0 %v2640_v31  ;;  %v248_v31 = vmul.f32 %v3255_v47, %v169_v46 }
  0xf3   :  { %v325_v39 = vpop.permute.xlu1 %324  ;;  %2642 = vmatprep.subr.bf16.mxu0 %v3945_v50 }
  0xf4   :  { %v403_v35 = vadd.f32 %v325_v39, %v243_v48 }
  0xf6   :  { %v435_v27 = vmul.f32 0.01, %v403_v35 }
  0xf7   :  { %v329_v7 = vpop.permute.xlu1 %328 }
  0xf8   :  { %v404_v51 = vadd.f32 %v329_v7, %v244_v38  ;;  %v467_v52 = vmax.f32 %v403_v35, %v435_v27  ;;  %v174_v38 = vpop.permute.xlu0 %173 }
  0xf9   :  { %v249_v35 = vmul.f32 %v3255_v47, %v174_v38 }
  0xfa   :  { %v436_v36 = vmul.f32 0.01, %v404_v51 }
  0xfb   :  { %v409_v16 = vadd.f32 %v3240_v42, %v249_v35 }
  0xfc   :  { %v468_v34 = vmax.f32 %v404_v51, %v436_v36  ;;  %v159_v55 = vpop.permute.xlu1 %158 }
  0xfd   :  { %v246_v44 = vmul.f32 %v3255_v47, %v159_v55  ;;  %v441_v55 = vmul.f32 0.01, %v409_v16 }
  0xfe   :  { %v2643_v59 = vpack.c.bf16 %v468_v34, %v467_v52 }
 0x100   :  { %2644 = vmatpush1.bf16.msra.mxu0 %v2643_v59 }
 0x101   :  { %v337_v32 = vpop.permute.xlu1 %336  ;;  %2645 = vmatprep.subr.bf16.mxu0 %v3945_v50 }
 0x102   :  { %v406_v43 = vadd.f32 %v337_v32, %v246_v44  ;;  %v473_v44 = vmax.f32 %v409_v16, %v441_v55 }
 0x104   :  { %v438_v58 = vmul.f32 0.01, %v406_v43 }
 0x106   :  { %v470_v60 = vmax.f32 %v406_v43, %v438_v58  ;;  %v164_v61 = vpop.permute.xlu1 %163  ;;  %v189_v58 = vpop.permute.xlu0 %188 }
 0x107   :  { %v247_v0 = vmul.f32 %v3255_v47, %v164_v61 }
 0x108   :  { %v2646_v62 = vpack.c.bf16 %v470_v60, %v469_v53  ;;  %v2963_v60 = vmov 2  }
 0x109   :  { %2856 = vset.pattern.permute.xlu1 %v2963_v60  ;;  %2857 = vset.pattern.permute.xlu0 %v2963_v60  ;;  %v492_v60 = vld [vmem:[#allocation2 + $0x108] sm:$0xff] }
 0x10a   :  { %2647 = vmatpush1.bf16.msra.mxu0 %v2646_v62  ;;  %548 = vperm.xlu1 %2856, %v3011_v2   ;;  %v252_v62 = vmul.f32 %v3255_v47, %v189_v58  ;;  %v486_v58 = vld [vmem:[#allocation2 + $0x48] sm:$0xff] }
 0x10b   :  { %v341_v63 = vpop.permute.xlu1 %340  ;;  %2648 = vmatprep.subr.bf16.mxu0 %v3945_v50  ;;  %552 = vperm.xlu0 %2857, %v3023_v4  }
 0x10c   :  { %v407_v40 = vadd.f32 %v341_v63, %v247_v0  ;;  %v194_v0 = vpop.permute.xlu0 %193 }
 0x10e   :  { %v439_v49 = vmul.f32 0.01, %v407_v40  ;;  %556 = vperm.xlu1 %2856, %v3006_v1  }
 0x10f   :  { %v345_v48 = vpop.permute.xlu1 %344  ;;  %564 = vperm.xlu0 %2857, %v3057_v10  }
 0x110   :  { %v408_v39 = vadd.f32 %v345_v48, %v248_v31  ;;  %v471_v27 = vmax.f32 %v407_v40, %v439_v49  ;;  %v253_v31 = vmul.f32 %v3255_v47, %v194_v0  ;;  %v497_v0 = vld [vmem:[#allocation2 + $0x1c0] sm:$0xff] }
 0x112   :  { %v440_v7 = vmul.f32 0.01, %v408_v39  ;;  %560 = vperm.xlu1 %2856, %v3035_v6   ;;  %v413_v4 = vadd.f32 %v3248_v45, %v253_v31  ;;  %v503_v31 = vld [vmem:[#allocation2 + $0x280] sm:$0xff] }
 0x113   :  { %572 = vperm.xlu0 %2857, %v3018_v3  }
 0x114   :  { %v472_v51 = vmax.f32 %v408_v39, %v440_v7  ;;  %v179_v33 = vpop.permute.xlu1 %178  ;;  %v445_v10 = vmul.f32 0.01, %v413_v4 }
 0x115   :  { %v250_v52 = vmul.f32 %v3255_v47, %v179_v33 }
 0x116   :  { %v2649_v36 = vpack.c.bf16 %v472_v51, %v471_v27  ;;  %568 = vperm.xlu1 %2856, %v3078_v13   ;;  %v477_v3 = vmax.f32 %v413_v4, %v445_v10  ;;  %v209_v51 = vpop.permute.xlu0 %208  ;;  %v510_v4 = vld [vmem:[#allocation2 + $0x348] sm:$0xff] }
 0x117   :  { %580 = vperm.xlu0 %2857, %v3097_v15   ;;  %v514_v10 = vld [vmem:[#allocation2 + $0x3c8] sm:$0xff] }
 0x118   :  { %2650 = vmatpush1.bf16.msra.mxu0 %v2649_v36 }
 0x119   :  { %v353_v34 = vpop.permute.xlu1 %352  ;;  %2651 = vmatprep.subr.bf16.mxu0 %v3945_v50 }
 0x11a   :  { %v410_v41 = vadd.f32 %v353_v34, %v250_v52  ;;  %576 = vperm.xlu1 %2856, %v3086_v14   ;;  %v214_v16 = vpop.permute.xlu0 %213 }
 0x11b   :  { %588 = vperm.xlu0 %2857, %v3030_v5   ;;  %v256_v5 = vmul.f32 %v3255_v47, %v209_v51  ;;  %v520_v51 = vld [vmem:[#allocation2 + $0x488] sm:$0xff] }
 0x11c   :  { %v442_v59 = vmul.f32 0.01, %v410_v41 }
 0x11e   :  { %v474_v32 = vmax.f32 %v410_v41, %v442_v59  ;;  %v184_v57 = vpop.permute.xlu1 %183  ;;  %584 = vperm.xlu1 %2856, %v3108_v17   ;;  %v381_v55 = vpop.permute.xlu0 %380 }
 0x11f   :  { %v251_v53 = vmul.f32 %v3255_v47, %v184_v57  ;;  %596 = vperm.xlu0 %2857, %v3139_v21   ;;  %v257_v21 = vmul.f32 %v3255_v47, %v214_v16  ;;  %v523_v16 = vld [vmem:[#allocation2 + $0x500] sm:$0xff] }
 0x120   :  { %v2652_v43 = vpack.c.bf16 %v474_v32, %v473_v44 }
 0x122   :  { %2653 = vmatpush1.bf16.msra.mxu0 %v2652_v43  ;;  %592 = vperm.xlu1 %2856, %v3123_v19  }
 0x123   :  { %v357_v42 = vpop.permute.xlu1 %356  ;;  %2654 = vmatprep.subr.bf16.mxu0 %v3945_v50  ;;  %604 = vperm.xlu0 %2857, %v3043_v8   ;;  %v417_v8 = vadd.f32 %v381_v55, %v257_v21  ;;  %v530_v21 = vld [vmem:[#allocation2 + $0x5c8] sm:$0xff] }
 0x124   :  { %v411_v61 = vadd.f32 %v357_v42, %v251_v53  ;;  %v489_v53 = vld [vmem:[#allocation2 + $0xc0] sm:$0xff]  ;;  %v496_v42 = vld [vmem:[#allocation2 + $0x188] sm:$0xff] }
 0x125   :  { %v532_v55 = vld [vmem:[#allocation2 + $0x608] sm:$0xff] }
 0x126   :  { %v443_v63 = vmul.f32 0.01, %v411_v61  ;;  %600 = vperm.xlu1 %2856, %v3118_v18  }
 0x127   :  { %v361_v46 = vpop.permute.xlu1 %360  ;;  %612 = vperm.xlu0 %2857, %v3179_v26   ;;  %v449_v26 = vmul.f32 0.01, %v417_v8 }
 0x128   :  { %v412_v40 = vadd.f32 %v361_v46, %v252_v62  ;;  %v475_v2 = vmax.f32 %v411_v61, %v443_v63  ;;  %v495_v61 = vld [vmem:[#allocation2 + $0x180] sm:$0xff]  ;;  %v498_v62 = vld [vmem:[#allocation2 + $0x1c8] sm:$0xff] }
 0x129   :  { %v500_v46 = vld [vmem:[#allocation2 + $0x208] sm:$0xff] }
 0x12a   :  { %v444_v48 = vmul.f32 0.01, %v412_v40  ;;  %608 = vperm.xlu1 %2856, %v3163_v24   ;;  %v502_v63 = vld [vmem:[#allocation2 + $0x248] sm:$0xff] }
 0x12b   :  { %620 = vperm.xlu0 %2857, %v3050_v9   ;;  %v481_v9 = vmax.f32 %v417_v8, %v449_v26  ;;  %v536_v8 = vld [vmem:[#allocation2 + $0x688] sm:$0xff] }
 0x12c   :  { %v476_v49 = vmax.f32 %v412_v40, %v444_v48  ;;  %v199_v39 = vpop.permute.xlu1 %198  ;;  %v501_v40 = vld [vmem:[#allocation2 + $0x240] sm:$0xff]  ;;  %v506_v48 = vld [vmem:[#allocation2 + $0x2c8] sm:$0xff] }
 0x12d   :  { %v254_v1 = vmul.f32 %v3255_v47, %v199_v39  ;;  %v507_v39 = vld [vmem:[#allocation2 + $0x300] sm:$0xff]  ;;  %v540_v26 = vld [vmem:[#allocation2 + $0x708] sm:$0xff] }
 0x12e   :  { %v2655_v38 = vpack.c.bf16 %v476_v49, %v475_v2  ;;  %616 = vperm.xlu1 %2856, %v3134_v20   ;;  %v505_v2 = vld [vmem:[#allocation2 + $0x2c0] sm:$0xff]  ;;  %v508_v49 = vld [vmem:[#allocation2 + $0x308] sm:$0xff] }
 0x12f   :  { %628 = vperm.xlu0 %2857, %v3207_v29   ;;  %v490_v29 = vld [vmem:[#allocation2 + $0xc8] sm:$0xff] }
 0x130   :  { %2656 = vmatpush1.bf16.msra.mxu0 %v2655_v38  ;;  %v509_v38 = vld [vmem:[#allocation2 + $0x340] sm:$0xff] }
 0x131   :  { %v369_v35 = vpop.permute.xlu1 %368  ;;  %2657 = vmatprep.subr.bf16.mxu0 %v3945_v50 }
 0x132   :  { %v414_v6 = vadd.f32 %v369_v35, %v254_v1  ;;  %624 = vperm.xlu1 %2856, %v3198_v28   ;;  %v485_v28 = vld [vmem:[#allocation2 + $0x40] sm:$0xff]  ;;  %v512_v1 = vld [vmem:[#allocation2 + $0x388] sm:$0xff] }
 0x133   :  { %636 = vperm.xlu0 %2857, %v3062_v11   ;;  %v488_v11 = vld [vmem:[#allocation2 + $0x88] sm:$0xff]  ;;  %v511_v35 = vld [vmem:[#allocation2 + $0x380] sm:$0xff] }
 0x134   :  { %v446_v7 = vmul.f32 0.01, %v414_v6 }
 0x136   :  { %v478_v45 = vmax.f32 %v414_v6, %v446_v7  ;;  %v204_v27 = vpop.permute.xlu1 %203  ;;  %632 = vperm.xlu1 %2856, %v3148_v22   ;;  %v487_v22 = vld [vmem:[#allocation2 + $0x80] sm:$0xff]  ;;  %v516_v7 = vld [vmem:[#allocation2 + $0x408] sm:$0xff] }
 0x137   :  { %v255_v33 = vmul.f32 %v3255_v47, %v204_v27  ;;  %644 = vperm.xlu0 %2857, %v3230_v37   ;;  %v3947_v37 = vld [vmem:[#allocation6_spill] sm:$0xff]  ;;  %v513_v6 = vld [vmem:[#allocation2 + $0x3c0] sm:$0xff] }
 0x138   :  { %v2658_v13 = vpack.c.bf16 %v478_v45, %v477_v3  ;;  %v515_v3 = vld [vmem:[#allocation2 + $0x400] sm:$0xff]  ;;  %v518_v45 = vld [vmem:[#allocation2 + $0x448] sm:$0xff] }
 0x139   :  { %v517_v27 = vld [vmem:[#allocation2 + $0x440] sm:$0xff] }
 0x13a   :  { %2659 = vmatpush1.bf16.msra.mxu0 %v2658_v13  ;;  %640 = vperm.xlu1 %2856, %v3217_v30   ;;  %v3948_v30 = vld [vmem:[#allocation5_spill] sm:$0xff] }
 0x13b   :  { %v373_v15 = vpop.permute.xlu1 %372  ;;  %2660 = vmatprep.subr.bf16.mxu0 %v3945_v50  ;;  %652 = vperm.xlu0 %2857, %v3070_v12   ;;  %v491_v12 = vld [vmem:[#allocation2 + $0x100] sm:$0xff] }
 0x13c   :  { %v415_v14 = vadd.f32 %v373_v15, %v255_v33  ;;  %v519_v13 = vld [vmem:[#allocation2 + $0x480] sm:$0xff]  ;;  %v522_v33 = vld [vmem:[#allocation2 + $0x4c8] sm:$0xff] }
 0x13d   :  { %v521_v15 = vld [vmem:[#allocation2 + $0x4c0] sm:$0xff] }
 0x13e   :  { %v447_v17 = vmul.f32 0.01, %v415_v14  ;;  %648 = vperm.xlu1 %2856, %v3158_v23   ;;  %v494_v23 = vld [vmem:[#allocation2 + $0x148] sm:$0xff] }
 0x13f   :  { %v377_v36 = vpop.permute.xlu1 %376  ;;  %660 = vperm.xlu0 %2857, %v3264_v54   ;;  %v493_v54 = vld [vmem:[#allocation2 + $0x140] sm:$0xff] }
 0x140   :  { %v416_v52 = vadd.f32 %v377_v36, %v256_v5  ;;  %v479_v19 = vmax.f32 %v415_v14, %v447_v17  ;;  %v524_v14 = vld [vmem:[#allocation2 + $0x508] sm:$0xff]  ;;  %v525_v36 = vld [vmem:[#allocation2 + $0x540] sm:$0xff] }
 0x141   :  { %v526_v5 = vld [vmem:[#allocation2 + $0x548] sm:$0xff] }
 0x142   :  { %v448_v34 = vmul.f32 0.01, %v416_v52  ;;  %656 = vperm.xlu1 %2856, %v3947_v37   ;;  %v528_v17 = vld [vmem:[#allocation2 + $0x588] sm:$0xff] }
 0x143   :  { %668 = vperm.xlu0 %2857, %v3948_v30  }
 0x144   :  { %v480_v41 = vmax.f32 %v416_v52, %v448_v34  ;;  %v219_v59 = vpop.permute.xlu1 %218  ;;  %v527_v52 = vld [vmem:[#allocation2 + $0x580] sm:$0xff] }
 0x145   :  { %v258_v18 = vmul.f32 %v3255_v47, %v219_v59  ;;  %v483_v47 = vld [vmem:[#allocation2] sm:$0xff] }
 0x146   :  { %v2661_v44 = vpack.c.bf16 %v480_v41, %v479_v19  ;;  %664 = vperm.xlu1 %2856, %v3174_v25   ;;  %v499_v25 = vld [vmem:[#allocation2 + $0x200] sm:$0xff]  ;;  %v534_v41 = vld [vmem:[#allocation2 + $0x648] sm:$0xff] }
 0x147   :  { %v529_v34 = vld [vmem:[#allocation2 + $0x5c0] sm:$0xff] }
 0x148   :  { %2662 = vmatpush1.bf16.msra.mxu0 %v2661_v44  ;;  %v531_v19 = vld [vmem:[#allocation2 + $0x600] sm:$0xff] }
 0x149   :  { %v385_v32 = vpop.permute.xlu1 %384  ;;  %2663 = vmatprep.subr.bf16.mxu0 %v3945_v50  ;;  %v533_v59 = vld [vmem:[#allocation2 + $0x640] sm:$0xff] }
 0x14a   :  { %v418_v57 = vadd.f32 %v385_v32, %v258_v18  ;;  %672 = vperm.xlu1 %2856, %v3282_v56   ;;  %v504_v56 = vld [vmem:[#allocation2 + $0x288] sm:$0xff]  ;;  %v535_v44 = vld [vmem:[#allocation2 + $0x680] sm:$0xff] }
 0x14b   :  { %v538_v18 = vld [vmem:[#allocation2 + $0x6c8] sm:$0xff]  ;;  %v537_v32 = vld [vmem:[#allocation2 + $0x6c0] sm:$0xff] }
 0x14c   :  { %v450_v24 = vmul.f32 0.01, %v418_v57 }
 0x14e   :  { %v482_v43 = vmax.f32 %v418_v57, %v450_v24  ;;  %v539_v57 = vld [vmem:[#allocation2 + $0x700] sm:$0xff]  ;;  %v542_v24 = vld [vmem:[#allocation2 + $0x748] sm:$0xff] }
 0x150   :  { %v2664_v20 = vpack.c.bf16 %v482_v43, %v481_v9  ;;  %v541_v9 = vld [vmem:[#allocation2 + $0x740] sm:$0xff]  ;;  %v544_v43 = vld [vmem:[#allocation2 + $0x788] sm:$0xff] }
 0x152   :  { %2665 = vmatpush1.bf16.msra.mxu0 %v2664_v20  ;;  %v543_v20 = vld [vmem:[#allocation2 + $0x780] sm:$0xff] }
 0x153   :  { %2714 = vmatprep.subr.bf16.mxu0 %v3945_v50 }
 0x155   :  { %740 = vmatmul.mubr.f32.vlgmr.msra.gmra.mrb[0].mxu0 %v483_v47  ;;  %v546_v47 = vld [vmem:[#allocation2 + $0x7c8] sm:$0xff] }
 0x156   :  { %744 = vmatprep.mubr.f32.mxu0 %v486_v58  ;;  %v545_v58 = vld [vmem:[#allocation2 + $0x7c0] sm:$0xff] }
 0x159   :  { %745 = vmatmul.mubr.f32.gmra.mrb[2].mxu0 %v485_v28 }
 0x15a   :  { %749 = vmatprep.mubr.f32.mxu0 %v488_v11 }
 0x15d   :  { %750 = vmatmul.mubr.f32.gmra.mrb[4].mxu0 %v487_v22 }
 0x15e   :  { %754 = vmatprep.mubr.f32.mxu0 %v490_v29 }
 0x161   :  { %755 = vmatmul.mubr.f32.gmra.mrb[6].mxu0 %v489_v53 }
 0x162   :  { %759 = vmatprep.mubr.f32.mxu0 %v492_v60 }
 0x165   :  { %760 = vmatmul.mubr.f32.gmra.mrb[8].mxu0 %v491_v12 }
 0x166   :  { %764 = vmatprep.mubr.f32.mxu0 %v494_v23  ;;  %v965_v23 = vld [vmem:[#allocation2 + $0x18] sm:$0xff] }
 0x167   :  { %1220 = vmatprep.mubr.f32.mxu1 %v965_v23 }
 0x169   :  { %765 = vmatmul.mubr.f32.gmra.mrb[10].mxu0 %v493_v54 }
 0x16a   :  { %769 = vmatprep.mubr.f32.mxu0 %v496_v42 }
 0x16d   :  { %770 = vmatmul.mubr.f32.gmra.mrb[12].mxu0 %v495_v61 }
 0x16e   :  { %774 = vmatprep.mubr.f32.mxu0 %v498_v62 }
 0x171   :  { %775 = vmatmul.mubr.f32.gmra.mrb[14].mxu0 %v497_v0 }
 0x172   :  { %779 = vmatprep.mubr.f32.mxu0 %v500_v46 }
 0x175   :  { %780 = vmatmul.mubr.f32.gmra.mrb[16].mxu0 %v499_v25 }
 0x176   :  { %784 = vmatprep.mubr.f32.mxu0 %v502_v63 }
 0x179   :  { %785 = vmatmul.mubr.f32.gmra.mrb[18].mxu0 %v501_v40 }
 0x17a   :  { %789 = vmatprep.mubr.f32.mxu0 %v504_v56 }
 0x17d   :  { %790 = vmatmul.mubr.f32.gmra.mrb[20].mxu0 %v503_v31 }
 0x17e   :  { %794 = vmatprep.mubr.f32.mxu0 %v506_v48 }
 0x181   :  { %795 = vmatmul.mubr.f32.gmra.mrb[22].mxu0 %v505_v2 }
 0x182   :  { %799 = vmatprep.mubr.f32.mxu0 %v508_v49 }
 0x185   :  { %800 = vmatmul.mubr.f32.gmra.mrb[24].mxu0 %v507_v39 }
 0x186   :  { %804 = vmatprep.mubr.f32.mxu0 %v510_v4 }
 0x189   :  { %805 = vmatmul.mubr.f32.gmra.mrb[26].mxu0 %v509_v38  ;;  %v549_v28 = vpop.permute.xlu1 %548 }
 0x18a   :  { %809 = vmatprep.mubr.f32.mxu0 %v512_v1  ;;  %v553_v37 = vpop.permute.xlu0 %552 }
 0x18d   :  { %810 = vmatmul.mubr.f32.gmra.mrb[28].mxu0 %v511_v35  ;;  %v557_v54 = vpop.permute.xlu1 %556 }
 0x18e   :  { %814 = vmatprep.mubr.f32.mxu0 %v514_v10  ;;  %v565_v39 = vpop.permute.xlu0 %564 }
 0x191   :  { %815 = vmatmul.mubr.f32.gmra.mrb[30].mxu0 %v513_v6  ;;  %v561_v40 = vpop.permute.xlu1 %560 }
 0x192   :  { %819 = vmatprep.mubr.f32.mxu0 %v516_v7 }
 0x195   :  { %820 = vmatmul.mubr.f32.gmra.mrb[32].mxu0 %v515_v3  ;;  %v569_v7 = vpop.permute.xlu1 %568 }
 0x196   :  { %824 = vmatprep.mubr.f32.mxu0 %v518_v45 }
 0x199   :  { %825 = vmatmul.mubr.f32.gmra.mrb[34].mxu0 %v517_v27 }
 0x19a   :  { %829 = vmatprep.mubr.f32.mxu0 %v520_v51 }
 0x19d   :  { %830 = vmatmul.mubr.f32.gmra.mrb[36].mxu0 %v519_v13 }
 0x19e   :  { %834 = vmatprep.mubr.f32.mxu0 %v522_v33  ;;  %v573_v33 = vpop.permute.xlu0 %572 }
 0x1a1   :  { %835 = vmatmul.mubr.f32.gmra.mrb[38].mxu0 %v521_v15 }
 0x1a2   :  { %839 = vmatprep.mubr.f32.mxu0 %v524_v14 }
 0x1a5   :  { %840 = vmatmul.mubr.f32.gmra.mrb[40].mxu0 %v523_v16 }
 0x1a6   :  { %844 = vmatprep.mubr.f32.mxu0 %v526_v5 }
 0x1a9   :  { %845 = vmatmul.mubr.f32.gmra.mrb[42].mxu0 %v525_v36 }
 0x1aa   :  { %849 = vmatprep.mubr.f32.mxu0 %v528_v17 }
 0x1ad   :  { %850 = vmatmul.mubr.f32.gmra.mrb[44].mxu0 %v527_v52  ;;  %v577_v52 = vpop.permute.xlu1 %576 }
 0x1ae   :  { %854 = vmatprep.mubr.f32.mxu0 %v530_v21 }
 0x1b1   :  { %855 = vmatmul.mubr.f32.gmra.mrb[46].mxu0 %v529_v34 }
 0x1b2   :  { %859 = vmatprep.mubr.f32.mxu0 %v532_v55 }
 0x1b5   :  { %860 = vmatmul.mubr.f32.gmra.mrb[48].mxu0 %v531_v19 }
 0x1b6   :  { %864 = vmatprep.mubr.f32.mxu0 %v534_v41 }
 0x1b9   :  { %865 = vmatmul.mubr.f32.gmra.mrb[50].mxu0 %v533_v59  ;;  %v581_v59 = vpop.permute.xlu0 %580 }
 0x1ba   :  { %869 = vmatprep.mubr.f32.mxu0 %v536_v8 }
 0x1bd   :  { %870 = vmatmul.mubr.f32.gmra.mrb[52].mxu0 %v535_v44 }
 0x1be   :  { %874 = vmatprep.mubr.f32.mxu0 %v538_v18 }
 0x1c1   :  { %875 = vmatmul.mubr.f32.gmra.mrb[54].mxu0 %v537_v32 }
 0x1c2   :  { %879 = vmatprep.mubr.f32.mxu0 %v540_v26 }
 0x1c5   :  { %880 = vmatmul.mubr.f32.gmra.mrb[56].mxu0 %v539_v57  ;;  %v2964_v57 = vmov 3  }
 0x1c6   :  { %884 = vmatprep.mubr.f32.mxu0 %v542_v24  ;;  %2858 = vset.pattern.permute.xlu0 %v2964_v57  ;;  %v3370_v24 = vld [vmem:[%s3935_s1] sm:$0xff] }
 0x1c7   :  { %2859 = vset.pattern.permute.xlu1 %v2964_v57  ;;  %1029 = vperm.xlu0 %2858, %v3370_v24  }
 0x1c9   :  { %885 = vmatmul.mubr.f32.gmra.mrb[58].mxu0 %v541_v9  ;;  %v3376_v9 = vld [vmem:[%s3935_s1 + $0x8] sm:$0xff] }
 0x1ca   :  { %889 = vmatprep.mubr.f32.mxu0 %v544_v43  ;;  %1033 = vperm.xlu1 %2859, %v3376_v9  }
 0x1cd   :  { %890 = vmatmul.mubr.f32.gmra.mrb[60].mxu0 %v543_v20  ;;  %v585_v20 = vpop.permute.xlu1 %584 }
 0x1ce   :  { %894 = vmatprep.mubr.f32.mxu0 %v546_v47 }
 0x1d1   :  { %895 = vmatmul.mubr.f32.gmra.mrb[62].mxu0 %v545_v58 }
 0x228   :  { %v741_v11 = vpop.f32.mrb[0].mxu0 }
 0x229   :  { %v742_v22 = vadd.f32 %v741_v11, %v549_v28  ;;  %v743_v29 = vpop.f32.mrb[1].mxu0 }
 0x22b   :  { %v900_v53 = vmul.f32 0.01, %v742_v22 }
 0x22c   :  { %v746_v30 = vpop.f32.mrb[2].mxu0 }
 0x22d   :  { %v747_v60 = vadd.f32 %v746_v30, %v553_v37  ;;  %v748_v12 = vpop.f32.mrb[3].mxu0  ;;  %v932_v62 = vmax.f32 %v742_v22, %v900_v53  ;;  %v3383_v22 = vld [vmem:[%s3935_s1 + $0x18] sm:$0xff]  ;;  %v3389_v37 = vld [vmem:[%s3935_s1 + $0x10] sm:$0xff]  ;;  %v589_v30 = vpop.permute.xlu0 %588 }
 0x22e   :  { %1041 = vperm.xlu0 %2858, %v3383_v22   ;;  %1037 = vperm.xlu1 %2859, %v3389_v37  }
 0x22f   :  { %v901_v42 = vmul.f32 0.01, %v747_v60 }
 0x230   :  { %v751_v61 = vpop.f32.mrb[4].mxu0 }
 0x231   :  { %v933_v0 = vmax.f32 %v747_v60, %v901_v42  ;;  %v752_v46 = vadd.f32 %v751_v61, %v557_v54  ;;  %v753_v25 = vpop.f32.mrb[5].mxu0  ;;  %v3395_v42 = vld [vmem:[%s3935_s1 + $0x28] sm:$0xff] }
 0x232   :  { %1049 = vperm.xlu0 %2858, %v3395_v42  }
 0x233   :  { %v2667_v63 = vpack.c.bf16 %v933_v0, %v932_v62  ;;  %v902_v31 = vmul.f32 0.01, %v752_v46  ;;  %v3401_v62 = vld [vmem:[%s3935_s1 + $0x20] sm:$0xff]  ;;  %v593_v0 = vpop.permute.xlu1 %592 }
 0x234   :  { %v756_v56 = vpop.f32.mrb[6].mxu0  ;;  %1045 = vperm.xlu1 %2859, %v3401_v62  }
 0x235   :  { %v757_v48 = vadd.f32 %v756_v56, %v561_v40  ;;  %v758_v2 = vpop.f32.mrb[7].mxu0  ;;  %2668 = vmatpush1.bf16.msra.mxu1 %v2667_v63  ;;  %v934_v38 = vmax.f32 %v752_v46, %v902_v31  ;;  %v3408_v56 = vld [vmem:[%s3935_s1 + $0x38] sm:$0xff] }
 0x236   :  { %2669 = vmatprep.subr.bf16.mxu1 %v3945_v50  ;;  %1057 = vperm.xlu0 %2858, %v3408_v56   ;;  %v597_v2 = vpop.permute.xlu0 %596 }
 0x237   :  { %v903_v49 = vmul.f32 0.01, %v757_v48 }
 0x238   :  { %v761_v4 = vpop.f32.mrb[8].mxu0 }
 0x239   :  { %v935_v1 = vmax.f32 %v757_v48, %v903_v49  ;;  %v762_v35 = vadd.f32 %v761_v4, %v565_v39  ;;  %v763_v10 = vpop.f32.mrb[9].mxu0  ;;  %v3414_v48 = vld [vmem:[%s3935_s1 + $0x30] sm:$0xff] }
 0x23a   :  { %1053 = vperm.xlu1 %2859, %v3414_v48  }
 0x23b   :  { %v2670_v6 = vpack.c.bf16 %v935_v1, %v934_v38  ;;  %v904_v45 = vmul.f32 0.01, %v762_v35 }
 0x23c   :  { %v766_v3 = vpop.f32.mrb[10].mxu0 }
 0x23d   :  { %v767_v27 = vadd.f32 %v766_v3, %v569_v7  ;;  %v768_v51 = vpop.f32.mrb[11].mxu0  ;;  %2671 = vmatpush1.bf16.msra.mxu1 %v2670_v6  ;;  %v936_v14 = vmax.f32 %v762_v35, %v904_v45  ;;  %v3420_v35 = vld [vmem:[%s3935_s1 + $0x48] sm:$0xff]  ;;  %v3426_v6 = vld [vmem:[%s3935_s1 + $0x40] sm:$0xff]  ;;  %v601_v7 = vpop.permute.xlu1 %600 }
 0x23e   :  { %2672 = vmatprep.subr.bf16.mxu1 %v3945_v50  ;;  %1065 = vperm.xlu0 %2858, %v3420_v35  }
 0x23f   :  { %v905_v13 = vmul.f32 0.01, %v767_v27  ;;  %1061 = vperm.xlu1 %2859, %v3426_v6  }
 0x240   :  { %v771_v15 = vpop.f32.mrb[12].mxu0 }
 0x241   :  { %v937_v16 = vmax.f32 %v767_v27, %v905_v13  ;;  %v772_v5 = vadd.f32 %v771_v15, %v573_v33  ;;  %v773_v36 = vpop.f32.mrb[13].mxu0  ;;  %v3433_v13 = vld [vmem:[%s3935_s1 + $0x58] sm:$0xff]  ;;  %v3439_v15 = vld [vmem:[%s3935_s1 + $0x50] sm:$0xff] }
 0x242   :  { %1073 = vperm.xlu0 %2858, %v3433_v13  }
 0x243   :  { %v2673_v17 = vpack.c.bf16 %v937_v16, %v936_v14  ;;  %v906_v34 = vmul.f32 0.01, %v772_v5  ;;  %1069 = vperm.xlu1 %2859, %v3439_v15   ;;  %v605_v14 = vpop.permute.xlu0 %604 }
 0x244   :  { %v776_v21 = vpop.f32.mrb[14].mxu0 }
 0x245   :  { %v777_v55 = vadd.f32 %v776_v21, %v577_v52  ;;  %v778_v19 = vpop.f32.mrb[15].mxu0  ;;  %2674 = vmatpush1.bf16.msra.mxu1 %v2673_v17  ;;  %v938_v44 = vmax.f32 %v772_v5, %v906_v34  ;;  %v3445_v21 = vld [vmem:[%s3935_s1 + $0x68] sm:$0xff] }
 0x246   :  { %2675 = vmatprep.subr.bf16.mxu1 %v3945_v50  ;;  %1081 = vperm.xlu0 %2858, %v3445_v21   ;;  %v609_v19 = vpop.permute.xlu1 %608 }
 0x247   :  { %v907_v41 = vmul.f32 0.01, %v777_v55  ;;  %v613_v57 = vpop.permute.xlu0 %612 }
 0x248   :  { %v781_v8 = vpop.f32.mrb[16].mxu0 }
 0x249   :  { %v939_v18 = vmax.f32 %v777_v55, %v907_v41  ;;  %v782_v32 = vadd.f32 %v781_v8, %v581_v59  ;;  %v783_v26 = vpop.f32.mrb[17].mxu0  ;;  %v3451_v55 = vld [vmem:[%s3935_s1 + $0x60] sm:$0xff] }
 0x24a   :  { %1077 = vperm.xlu1 %2859, %v3451_v55   ;;  %v3464_v26 = vld [vmem:[%s3935_s1 + $0x70] sm:$0xff] }
 0x24b   :  { %v2676_v43 = vpack.c.bf16 %v939_v18, %v938_v44  ;;  %v908_v58 = vmul.f32 0.01, %v782_v32  ;;  %v3458_v18 = vld [vmem:[%s3935_s1 + $0x78] sm:$0xff] }
 0x24c   :  { %v786_v47 = vpop.f32.mrb[18].mxu0  ;;  %1089 = vperm.xlu0 %2858, %v3458_v18  }
 0x24d   :  { %v787_v28 = vadd.f32 %v786_v47, %v585_v20  ;;  %v788_v11 = vpop.f32.mrb[19].mxu0  ;;  %2677 = vmatpush1.bf16.msra.mxu1 %v2676_v43  ;;  %v940_v60 = vmax.f32 %v782_v32, %v908_v58 }
 0x24e   :  { %2678 = vmatprep.subr.bf16.mxu1 %v3945_v50  ;;  %1085 = vperm.xlu1 %2859, %v3464_v26   ;;  %v3470_v11 = vld [vmem:[%s3935_s1 + $0x88] sm:$0xff] }
 0x24f   :  { %v909_v29 = vmul.f32 0.01, %v787_v28 }
 0x250   :  { %v791_v53 = vpop.f32.mrb[20].mxu0  ;;  %1097 = vperm.xlu0 %2858, %v3470_v11  }
 0x251   :  { %v941_v12 = vmax.f32 %v787_v28, %v909_v29  ;;  %v792_v23 = vadd.f32 %v791_v53, %v589_v30  ;;  %v793_v54 = vpop.f32.mrb[21].mxu0  ;;  %v3476_v30 = vld [vmem:[%s3935_s1 + $0x80] sm:$0xff]  ;;  %v617_v53 = vpop.permute.xlu1 %616 }
 0x252   :  { %1093 = vperm.xlu1 %2859, %v3476_v30  }
 0x253   :  { %v2679_v61 = vpack.c.bf16 %v941_v12, %v940_v60  ;;  %v910_v25 = vmul.f32 0.01, %v792_v23 }
 0x254   :  { %v796_v46 = vpop.f32.mrb[22].mxu0 }
 0x255   :  { %v797_v63 = vadd.f32 %v796_v46, %v593_v0  ;;  %v798_v40 = vpop.f32.mrb[23].mxu0  ;;  %2680 = vmatpush1.bf16.msra.mxu1 %v2679_v61  ;;  %v942_v39 = vmax.f32 %v792_v23, %v910_v25  ;;  %v3483_v61 = vld [vmem:[%s3935_s1 + $0x98] sm:$0xff]  ;;  %v3489_v46 = vld [vmem:[%s3935_s1 + $0x90] sm:$0xff]  ;;  %v621_v25 = vpop.permute.xlu0 %620 }
 0x256   :  { %2681 = vmatprep.subr.bf16.mxu1 %v3945_v50  ;;  %1105 = vperm.xlu0 %2858, %v3483_v61  }
 0x257   :  { %v911_v31 = vmul.f32 0.01, %v797_v63  ;;  %1101 = vperm.xlu1 %2859, %v3489_v46  }
 0x258   :  { %v801_v49 = vpop.f32.mrb[24].mxu0 }
 0x259   :  { %v943_v4 = vmax.f32 %v797_v63, %v911_v31  ;;  %v802_v38 = vadd.f32 %v801_v49, %v597_v2  ;;  %v803_v1 = vpop.f32.mrb[25].mxu0 }
 0x25a   :  { %v625_v1 = vpop.permute.xlu1 %624 }
 0x25b   :  { %v2682_v10 = vpack.c.bf16 %v943_v4, %v942_v39  ;;  %v912_v45 = vmul.f32 0.01, %v802_v38  ;;  %v3495_v39 = vld [vmem:[%s3935_s1 + $0xa8] sm:$0xff] }
 0x25c   :  { %v806_v3 = vpop.f32.mrb[26].mxu0  ;;  %1113 = vperm.xlu0 %2858, %v3495_v39  }
 0x25d   :  { %v807_v27 = vadd.f32 %v806_v3, %v601_v7  ;;  %v808_v51 = vpop.f32.mrb[27].mxu0  ;;  %2683 = vmatpush1.bf16.msra.mxu1 %v2682_v10  ;;  %v944_v5 = vmax.f32 %v802_v38, %v912_v45  ;;  %v3501_v38 = vld [vmem:[%s3935_s1 + $0xa0] sm:$0xff] }
 0x25e   :  { %2684 = vmatprep.subr.bf16.mxu1 %v3945_v50  ;;  %1109 = vperm.xlu1 %2859, %v3501_v38  }
 0x25f   :  { %v913_v33 = vmul.f32 0.01, %v807_v27 }
 0x260   :  { %v811_v16 = vpop.f32.mrb[28].mxu0 }
 0x261   :  { %v945_v36 = vmax.f32 %v807_v27, %v913_v33  ;;  %v812_v17 = vadd.f32 %v811_v16, %v605_v14  ;;  %v813_v52 = vpop.f32.mrb[29].mxu0  ;;  %v3508_v27 = vld [vmem:[%s3935_s1 + $0xb8] sm:$0xff]  ;;  %v3514_v33 = vld [vmem:[%s3935_s1 + $0xb0] sm:$0xff]  ;;  %v629_v14 = vpop.permute.xlu0 %628 }
 0x262   :  { %1121 = vperm.xlu0 %2858, %v3508_v27   ;;  %1117 = vperm.xlu1 %2859, %v3514_v33  }
 0x263   :  { %v2685_v34 = vpack.c.bf16 %v945_v36, %v944_v5  ;;  %v914_v59 = vmul.f32 0.01, %v812_v17 }
 0x264   :  { %v816_v41 = vpop.f32.mrb[30].mxu0 }
 0x265   :  { %v817_v8 = vadd.f32 %v816_v41, %v609_v19  ;;  %v818_v44 = vpop.f32.mrb[31].mxu0  ;;  %2686 = vmatpush1.bf16.msra.mxu1 %v2685_v34  ;;  %v946_v20 = vmax.f32 %v812_v17, %v914_v59  ;;  %v3520_v34 = vld [vmem:[%s3935_s1 + $0xc8] sm:$0xff]  ;;  %v3526_v41 = vld [vmem:[%s3935_s1 + $0xc0] sm:$0xff]  ;;  %v633_v59 = vpop.permute.xlu1 %632 }
 0x266   :  { %2687 = vmatprep.subr.bf16.mxu1 %v3945_v50  ;;  %1129 = vperm.xlu0 %2858, %v3520_v34  }
 0x267   :  { %v915_v32 = vmul.f32 0.01, %v817_v8  ;;  %1125 = vperm.xlu1 %2859, %v3526_v41  }
 0x268   :  { %v821_v43 = vpop.f32.mrb[32].mxu0 }
 0x269   :  { %v947_v47 = vmax.f32 %v817_v8, %v915_v32  ;;  %v822_v58 = vadd.f32 %v821_v43, %v613_v57  ;;  %v823_v28 = vpop.f32.mrb[33].mxu0  ;;  %v3533_v43 = vld [vmem:[%s3935_s1 + $0xd8] sm:$0xff] }
 0x26a   :  { %1137 = vperm.xlu0 %2858, %v3533_v43  }
 0x26b   :  { %v2688_v29 = vpack.c.bf16 %v947_v47, %v946_v20  ;;  %v916_v12 = vmul.f32 0.01, %v822_v58  ;;  %v3539_v47 = vld [vmem:[%s3935_s1 + $0xd0] sm:$0xff] }
 0x26c   :  { %v826_v60 = vpop.f32.mrb[34].mxu0  ;;  %1133 = vperm.xlu1 %2859, %v3539_v47  }
 0x26d   :  { %v827_v23 = vadd.f32 %v826_v60, %v617_v53  ;;  %v828_v54 = vpop.f32.mrb[35].mxu0  ;;  %2689 = vmatpush1.bf16.msra.mxu1 %v2688_v29  ;;  %v948_v40 = vmax.f32 %v822_v58, %v916_v12  ;;  %v637_v58 = vpop.permute.xlu0 %636 }
 0x26e   :  { %2690 = vmatprep.subr.bf16.mxu1 %v3945_v50 }
 0x26f   :  { %v917_v0 = vmul.f32 0.01, %v827_v23 }
 0x270   :  { %v831_v63 = vpop.f32.mrb[36].mxu0 }
 0x271   :  { %v949_v31 = vmax.f32 %v827_v23, %v917_v0  ;;  %v832_v2 = vadd.f32 %v831_v63, %v621_v25  ;;  %v833_v49 = vpop.f32.mrb[37].mxu0  ;;  %v3545_v23 = vld [vmem:[%s3935_s1 + $0xe8] sm:$0xff]  ;;  %v3551_v0 = vld [vmem:[%s3935_s1 + $0xe0] sm:$0xff]  ;;  %v641_v25 = vpop.permute.xlu1 %640 }
 0x272   :  { %1145 = vperm.xlu0 %2858, %v3545_v23   ;;  %1141 = vperm.xlu1 %2859, %v3551_v0   ;;  %v3558_v49 = vld [vmem:[%s3935_s1 + $0xf8] sm:$0xff] }
 0x273   :  { %v2691_v4 = vpack.c.bf16 %v949_v31, %v948_v40  ;;  %v918_v7 = vmul.f32 0.01, %v832_v2 }
 0x274   :  { %v836_v10 = vpop.f32.mrb[38].mxu0 }
 0x275   :  { %v837_v3 = vadd.f32 %v836_v10, %v625_v1  ;;  %v838_v45 = vpop.f32.mrb[39].mxu0  ;;  %2692 = vmatpush1.bf16.msra.mxu1 %v2691_v4  ;;  %v950_v5 = vmax.f32 %v832_v2, %v918_v7  ;;  %v3564_v1 = vld [vmem:[%s3935_s1 + $0xf0] sm:$0xff]  ;;  %v645_v10 = vpop.permute.xlu0 %644 }
 0x276   :  { %2693 = vmatprep.subr.bf16.mxu1 %v3945_v50  ;;  %1153 = vperm.xlu0 %2858, %v3558_v49  }
 0x277   :  { %v919_v51 = vmul.f32 0.01, %v837_v3  ;;  %1149 = vperm.xlu1 %2859, %v3564_v1  }
 0x278   :  { %v841_v16 = vpop.f32.mrb[40].mxu0 }
 0x279   :  { %v951_v36 = vmax.f32 %v837_v3, %v919_v51  ;;  %v842_v17 = vadd.f32 %v841_v16, %v629_v14  ;;  %v843_v52 = vpop.f32.mrb[41].mxu0 }
 0x27b   :  { %v2694_v19 = vpack.c.bf16 %v951_v36, %v950_v5  ;;  %v920_v44 = vmul.f32 0.01, %v842_v17  ;;  %v649_v5 = vpop.permute.xlu1 %648 }
 0x27c   :  { %v846_v8 = vpop.f32.mrb[42].mxu0 }
 0x27d   :  { %v847_v32 = vadd.f32 %v846_v8, %v633_v59  ;;  %v848_v57 = vpop.f32.mrb[43].mxu0  ;;  %2695 = vmatpush1.bf16.msra.mxu1 %v2694_v19  ;;  %v952_v29 = vmax.f32 %v842_v17, %v920_v44  ;;  %v653_v8 = vpop.permute.xlu0 %652 }
 0x27e   :  { %2696 = vmatprep.subr.bf16.mxu1 %v3945_v50 }
 0x27f   :  { %v921_v20 = vmul.f32 0.01, %v847_v32 }
 0x280   :  { %v851_v28 = vpop.f32.mrb[44].mxu0 }
 0x281   :  { %v953_v53 = vmax.f32 %v847_v32, %v921_v20  ;;  %v852_v60 = vadd.f32 %v851_v28, %v637_v58  ;;  %v853_v12 = vpop.f32.mrb[45].mxu0 }
 0x283   :  { %v2697_v54 = vpack.c.bf16 %v953_v53, %v952_v29  ;;  %v922_v40 = vmul.f32 0.01, %v852_v60  ;;  %v657_v29 = vpop.permute.xlu1 %656 }
 0x284   :  { %v856_v63 = vpop.f32.mrb[46].mxu0 }
 0x285   :  { %v857_v31 = vadd.f32 %v856_v63, %v641_v25  ;;  %v858_v2 = vpop.f32.mrb[47].mxu0  ;;  %2698 = vmatpush1.bf16.msra.mxu1 %v2697_v54  ;;  %v954_v3 = vmax.f32 %v852_v60, %v922_v40  ;;  %v661_v63 = vpop.permute.xlu0 %660 }
 0x286   :  { %2699 = vmatprep.subr.bf16.mxu1 %v3945_v50 }
 0x287   :  { %v923_v4 = vmul.f32 0.01, %v857_v31 }
 0x288   :  { %v861_v7 = vpop.f32.mrb[48].mxu0 }
 0x289   :  { %v955_v45 = vmax.f32 %v857_v31, %v923_v4  ;;  %v862_v51 = vadd.f32 %v861_v7, %v645_v10  ;;  %v863_v14 = vpop.f32.mrb[49].mxu0 }
 0x28b   :  { %v2700_v16 = vpack.c.bf16 %v955_v45, %v954_v3  ;;  %v924_v17 = vmul.f32 0.01, %v862_v51  ;;  %v665_v3 = vpop.permute.xlu1 %664 }
 0x28c   :  { %v866_v36 = vpop.f32.mrb[50].mxu0 }
 0x28d   :  { %v867_v52 = vadd.f32 %v866_v36, %v649_v5  ;;  %v868_v19 = vpop.f32.mrb[51].mxu0  ;;  %2701 = vmatpush1.bf16.msra.mxu1 %v2700_v16  ;;  %v956_v32 = vmax.f32 %v862_v51, %v924_v17  ;;  %v669_v36 = vpop.permute.xlu0 %668 }
 0x28e   :  { %2702 = vmatprep.subr.bf16.mxu1 %v3945_v50 }
 0x28f   :  { %v925_v59 = vmul.f32 0.01, %v867_v52 }
 0x290   :  { %v871_v44 = vpop.f32.mrb[52].mxu0 }
 0x291   :  { %v957_v57 = vmax.f32 %v867_v52, %v925_v59  ;;  %v872_v20 = vadd.f32 %v871_v44, %v653_v8  ;;  %v873_v58 = vpop.f32.mrb[53].mxu0 }
 0x293   :  { %v2703_v28 = vpack.c.bf16 %v957_v57, %v956_v32  ;;  %v926_v60 = vmul.f32 0.01, %v872_v20  ;;  %v673_v32 = vpop.permute.xlu1 %672 }
 0x294   :  { %v876_v53 = vpop.f32.mrb[54].mxu0 }
 0x295   :  { %v877_v12 = vadd.f32 %v876_v53, %v657_v29  ;;  %v878_v54 = vpop.f32.mrb[55].mxu0  ;;  %2704 = vmatpush1.bf16.msra.mxu1 %v2703_v28  ;;  %v958_v31 = vmax.f32 %v872_v20, %v926_v60 }
 0x296   :  { %2705 = vmatprep.subr.bf16.mxu1 %v3945_v50  ;;  %v964_v54 = vld [vmem:[#allocation2 + $0x10] sm:$0xff] }
 0x297   :  { %v927_v25 = vmul.f32 0.01, %v877_v12 }
 0x298   :  { %v881_v40 = vpop.f32.mrb[56].mxu0 }
 0x299   :  { %v959_v2 = vmax.f32 %v877_v12, %v927_v25  ;;  %v882_v4 = vadd.f32 %v881_v40, %v661_v63  ;;  %v883_v10 = vpop.f32.mrb[57].mxu0  ;;  %v967_v25 = vld [vmem:[#allocation2 + $0x58] sm:$0xff]  ;;  %v966_v63 = vld [vmem:[#allocation2 + $0x50] sm:$0xff] }
 0x29a   :  { %v969_v40 = vld [vmem:[#allocation2 + $0x98] sm:$0xff] }
 0x29b   :  { %v2706_v7 = vpack.c.bf16 %v959_v2, %v958_v31  ;;  %v928_v51 = vmul.f32 0.01, %v882_v4  ;;  %v968_v31 = vld [vmem:[#allocation2 + $0x90] sm:$0xff]  ;;  %v971_v2 = vld [vmem:[#allocation2 + $0xd8] sm:$0xff] }
 0x29c   :  { %v886_v45 = vpop.f32.mrb[58].mxu0  ;;  %v973_v10 = vld [vmem:[#allocation2 + $0x118] sm:$0xff] }
 0x29d   :  { %v887_v14 = vadd.f32 %v886_v45, %v665_v3  ;;  %v888_v16 = vpop.f32.mrb[59].mxu0  ;;  %2707 = vmatpush1.bf16.msra.mxu1 %v2706_v7  ;;  %v960_v52 = vmax.f32 %v882_v4, %v928_v51  ;;  %v970_v4 = vld [vmem:[#allocation2 + $0xd0] sm:$0xff]  ;;  %v975_v3 = vld [vmem:[#allocation2 + $0x158] sm:$0xff] }
 0x29e   :  { %2708 = vmatprep.subr.bf16.mxu1 %v3945_v50  ;;  %v972_v7 = vld [vmem:[#allocation2 + $0x110] sm:$0xff]  ;;  %v977_v51 = vld [vmem:[#allocation2 + $0x198] sm:$0xff] }
 0x29f   :  { %v929_v5 = vmul.f32 0.01, %v887_v14  ;;  %v974_v45 = vld [vmem:[#allocation2 + $0x150] sm:$0xff]  ;;  %v979_v16 = vld [vmem:[#allocation2 + $0x1d8] sm:$0xff] }
 0x2a0   :  { %v891_v17 = vpop.f32.mrb[60].mxu0 }
 0x2a1   :  { %v961_v19 = vmax.f32 %v887_v14, %v929_v5  ;;  %v892_v59 = vadd.f32 %v891_v17, %v669_v36  ;;  %v893_v8 = vpop.f32.mrb[61].mxu0  ;;  %v976_v14 = vld [vmem:[#allocation2 + $0x190] sm:$0xff]  ;;  %v981_v36 = vld [vmem:[#allocation2 + $0x218] sm:$0xff] }
 0x2a2   :  { %v978_v5 = vld [vmem:[#allocation2 + $0x1d0] sm:$0xff] }
 0x2a3   :  { %v2709_v44 = vpack.c.bf16 %v961_v19, %v960_v52  ;;  %v930_v20 = vmul.f32 0.01, %v892_v59  ;;  %v980_v17 = vld [vmem:[#allocation2 + $0x210] sm:$0xff]  ;;  %v983_v52 = vld [vmem:[#allocation2 + $0x258] sm:$0xff] }
 0x2a4   :  { %v896_v57 = vpop.f32.mrb[62].mxu0  ;;  %v982_v19 = vld [vmem:[#allocation2 + $0x250] sm:$0xff] }
 0x2a5   :  { %v897_v58 = vadd.f32 %v896_v57, %v673_v32  ;;  %v898_v28 = vpop.f32.mrb[63].mxu0  ;;  %2710 = vmatpush1.bf16.msra.mxu1 %v2709_v44  ;;  %v962_v53 = vmax.f32 %v892_v59, %v930_v20  ;;  %v985_v59 = vld [vmem:[#allocation2 + $0x298] sm:$0xff]  ;;  %v984_v8 = vld [vmem:[#allocation2 + $0x290] sm:$0xff] }
 0x2a6   :  { %2711 = vmatprep.subr.bf16.mxu1 %v3945_v50  ;;  %v987_v44 = vld [vmem:[#allocation2 + $0x2d8] sm:$0xff]  ;;  %v986_v32 = vld [vmem:[#allocation2 + $0x2d0] sm:$0xff] }
 0x2a7   :  { %v931_v29 = vmul.f32 0.01, %v897_v58  ;;  %v989_v57 = vld [vmem:[#allocation2 + $0x318] sm:$0xff]  ;;  %v988_v20 = vld [vmem:[#allocation2 + $0x310] sm:$0xff] }
 0x2a8   :  { %v990_v28 = vld [vmem:[#allocation2 + $0x350] sm:$0xff] }
 0x2a9   :  { %v963_v60 = vmax.f32 %v897_v58, %v931_v29  ;;  %v991_v58 = vld [vmem:[#allocation2 + $0x358] sm:$0xff] }
 0x2aa   :  { %v993_v29 = vld [vmem:[#allocation2 + $0x398] sm:$0xff] }
 0x2ab   :  { %v2712_v12 = vpack.c.bf16 %v963_v60, %v962_v53  ;;  %v992_v53 = vld [vmem:[#allocation2 + $0x390] sm:$0xff]  ;;  %v995_v60 = vld [vmem:[#allocation2 + $0x3d8] sm:$0xff] }
 0x2ad   :  { %2713 = vmatpush1.bf16.msra.mxu1 %v2712_v12  ;;  %v994_v12 = vld [vmem:[#allocation2 + $0x3d0] sm:$0xff] }
 0x2ae   :  { %2762 = vmatprep.subr.bf16.mxu1 %v3945_v50 }
 0x2b0   :  { %1221 = vmatmul.mubr.f32.vlgmr.msra.gmra.mrb[0].mxu1 %v964_v54  ;;  %v997_v54 = vld [vmem:[#allocation2 + $0x418] sm:$0xff] }
 0x2b1   :  { %1225 = vmatprep.mubr.f32.mxu1 %v967_v25  ;;  %v996_v25 = vld [vmem:[#allocation2 + $0x410] sm:$0xff] }
 0x2b4   :  { %1226 = vmatmul.mubr.f32.gmra.mrb[2].mxu1 %v966_v63  ;;  %v999_v63 = vld [vmem:[#allocation2 + $0x458] sm:$0xff] }
 0x2b5   :  { %1230 = vmatprep.mubr.f32.mxu1 %v969_v40  ;;  %v998_v40 = vld [vmem:[#allocation2 + $0x450] sm:$0xff] }
 0x2b8   :  { %1231 = vmatmul.mubr.f32.gmra.mrb[4].mxu1 %v968_v31  ;;  %v1001_v31 = vld [vmem:[#allocation2 + $0x498] sm:$0xff] }
 0x2b9   :  { %1235 = vmatprep.mubr.f32.mxu1 %v971_v2  ;;  %v1000_v2 = vld [vmem:[#allocation2 + $0x490] sm:$0xff] }
 0x2bc   :  { %1236 = vmatmul.mubr.f32.gmra.mrb[6].mxu1 %v970_v4  ;;  %v1003_v4 = vld [vmem:[#allocation2 + $0x4d8] sm:$0xff] }
 0x2bd   :  { %1240 = vmatprep.mubr.f32.mxu1 %v973_v10  ;;  %v1002_v10 = vld [vmem:[#allocation2 + $0x4d0] sm:$0xff] }
 0x2c0   :  { %1241 = vmatmul.mubr.f32.gmra.mrb[8].mxu1 %v972_v7  ;;  %v1005_v7 = vld [vmem:[#allocation2 + $0x518] sm:$0xff] }
 0x2c1   :  { %1245 = vmatprep.mubr.f32.mxu1 %v975_v3  ;;  %v1004_v3 = vld [vmem:[#allocation2 + $0x510] sm:$0xff] }
 0x2c4   :  { %1246 = vmatmul.mubr.f32.gmra.mrb[10].mxu1 %v974_v45  ;;  %v1007_v45 = vld [vmem:[#allocation2 + $0x558] sm:$0xff] }
 0x2c5   :  { %1250 = vmatprep.mubr.f32.mxu1 %v977_v51  ;;  %v1006_v51 = vld [vmem:[#allocation2 + $0x550] sm:$0xff] }
 0x2c8   :  { %1251 = vmatmul.mubr.f32.gmra.mrb[12].mxu1 %v976_v14  ;;  %v1009_v14 = vld [vmem:[#allocation2 + $0x598] sm:$0xff] }
 0x2c9   :  { %1255 = vmatprep.mubr.f32.mxu1 %v979_v16  ;;  %v1008_v16 = vld [vmem:[#allocation2 + $0x590] sm:$0xff] }
 0x2cc   :  { %1256 = vmatmul.mubr.f32.gmra.mrb[14].mxu1 %v978_v5  ;;  %v1011_v5 = vld [vmem:[#allocation2 + $0x5d8] sm:$0xff] }
 0x2cd   :  { %1260 = vmatprep.mubr.f32.mxu1 %v981_v36  ;;  %v1010_v36 = vld [vmem:[#allocation2 + $0x5d0] sm:$0xff] }
 0x2d0   :  { %1261 = vmatmul.mubr.f32.gmra.mrb[16].mxu1 %v980_v17  ;;  %v1013_v17 = vld [vmem:[#allocation2 + $0x618] sm:$0xff] }
 0x2d1   :  { %1265 = vmatprep.mubr.f32.mxu1 %v983_v52  ;;  %v1012_v52 = vld [vmem:[#allocation2 + $0x610] sm:$0xff] }
 0x2d4   :  { %1266 = vmatmul.mubr.f32.gmra.mrb[18].mxu1 %v982_v19  ;;  %v1015_v19 = vld [vmem:[#allocation2 + $0x658] sm:$0xff] }
 0x2d5   :  { %1270 = vmatprep.mubr.f32.mxu1 %v985_v59  ;;  %v1014_v59 = vld [vmem:[#allocation2 + $0x650] sm:$0xff] }
 0x2d8   :  { %1271 = vmatmul.mubr.f32.gmra.mrb[20].mxu1 %v984_v8  ;;  %v1017_v8 = vld [vmem:[#allocation2 + $0x698] sm:$0xff] }
 0x2d9   :  { %1275 = vmatprep.mubr.f32.mxu1 %v987_v44  ;;  %v1016_v44 = vld [vmem:[#allocation2 + $0x690] sm:$0xff] }
 0x2dc   :  { %1276 = vmatmul.mubr.f32.gmra.mrb[22].mxu1 %v986_v32  ;;  %v1019_v32 = vld [vmem:[#allocation2 + $0x6d8] sm:$0xff] }
 0x2dd   :  { %1280 = vmatprep.mubr.f32.mxu1 %v989_v57  ;;  %v1018_v57 = vld [vmem:[#allocation2 + $0x6d0] sm:$0xff] }
 0x2e0   :  { %1281 = vmatmul.mubr.f32.gmra.mrb[24].mxu1 %v988_v20  ;;  %v1021_v20 = vld [vmem:[#allocation2 + $0x718] sm:$0xff] }
 0x2e1   :  { %1285 = vmatprep.mubr.f32.mxu1 %v991_v58  ;;  %v1020_v58 = vld [vmem:[#allocation2 + $0x710] sm:$0xff] }
 0x2e4   :  { %1286 = vmatmul.mubr.f32.gmra.mrb[26].mxu1 %v990_v28  ;;  %v1023_v28 = vld [vmem:[#allocation2 + $0x758] sm:$0xff] }
 0x2e5   :  { %1290 = vmatprep.mubr.f32.mxu1 %v993_v29  ;;  %v1022_v29 = vld [vmem:[#allocation2 + $0x750] sm:$0xff] }
 0x2e8   :  { %1291 = vmatmul.mubr.f32.gmra.mrb[28].mxu1 %v992_v53  ;;  %v1025_v53 = vld [vmem:[#allocation2 + $0x798] sm:$0xff] }
 0x2e9   :  { %1295 = vmatprep.mubr.f32.mxu1 %v995_v60  ;;  %v1024_v60 = vld [vmem:[#allocation2 + $0x790] sm:$0xff] }
 0x2ec   :  { %1296 = vmatmul.mubr.f32.gmra.mrb[30].mxu1 %v994_v12  ;;  %v1027_v12 = vld [vmem:[#allocation2 + $0x7d8] sm:$0xff] }
 0x2ed   :  { %1300 = vmatprep.mubr.f32.mxu1 %v997_v54  ;;  %v1026_v54 = vld [vmem:[#allocation2 + $0x7d0] sm:$0xff] }
 0x2f0   :  { %1301 = vmatmul.mubr.f32.gmra.mrb[32].mxu1 %v996_v25  ;;  %v1030_v25 = vpop.permute.xlu0 %1029 }
 0x2f1   :  { %1305 = vmatprep.mubr.f32.mxu1 %v999_v63  ;;  %v1034_v63 = vpop.permute.xlu1 %1033 }
 0x2f4   :  { %1306 = vmatmul.mubr.f32.gmra.mrb[34].mxu1 %v998_v40 }
 0x2f5   :  { %1310 = vmatprep.mubr.f32.mxu1 %v1001_v31 }
 0x2f8   :  { %1311 = vmatmul.mubr.f32.gmra.mrb[36].mxu1 %v1000_v2 }
 0x2f9   :  { %1315 = vmatprep.mubr.f32.mxu1 %v1003_v4 }
 0x2fc   :  { %1316 = vmatmul.mubr.f32.gmra.mrb[38].mxu1 %v1002_v10 }
 0x2fd   :  { %1320 = vmatprep.mubr.f32.mxu1 %v1005_v7 }
 0x300   :  { %1321 = vmatmul.mubr.f32.gmra.mrb[40].mxu1 %v1004_v3 }
 0x301   :  { %1325 = vmatprep.mubr.f32.mxu1 %v1007_v45  ;;  %v1446_v45 = vld [vmem:[#allocation2 + $0x28] sm:$0xff] }
 0x302   :  { %1701 = vmatprep.mubr.f32.mxu0 %v1446_v45 }
 0x304   :  { %1326 = vmatmul.mubr.f32.gmra.mrb[42].mxu1 %v1006_v51  ;;  %v1038_v51 = vpop.permute.xlu1 %1037 }
 0x305   :  { %1330 = vmatprep.mubr.f32.mxu1 %v1009_v14 }
 0x308   :  { %1331 = vmatmul.mubr.f32.gmra.mrb[44].mxu1 %v1008_v16 }
 0x309   :  { %1335 = vmatprep.mubr.f32.mxu1 %v1011_v5 }
 0x30c   :  { %1336 = vmatmul.mubr.f32.gmra.mrb[46].mxu1 %v1010_v36 }
 0x30d   :  { %1340 = vmatprep.mubr.f32.mxu1 %v1013_v17 }
 0x310   :  { %1341 = vmatmul.mubr.f32.gmra.mrb[48].mxu1 %v1012_v52 }
 0x311   :  { %1345 = vmatprep.mubr.f32.mxu1 %v1015_v19 }
 0x314   :  { %1346 = vmatmul.mubr.f32.gmra.mrb[50].mxu1 %v1014_v59  ;;  %v1042_v59 = vpop.permute.xlu0 %1041 }
 0x315   :  { %1350 = vmatprep.mubr.f32.mxu1 %v1017_v8 }
 0x318   :  { %1351 = vmatmul.mubr.f32.gmra.mrb[52].mxu1 %v1016_v44 }
 0x319   :  { %1355 = vmatprep.mubr.f32.mxu1 %v1019_v32 }
 0x31c   :  { %1356 = vmatmul.mubr.f32.gmra.mrb[54].mxu1 %v1018_v57 }
 0x31d   :  { %1360 = vmatprep.mubr.f32.mxu1 %v1021_v20 }
 0x320   :  { %1361 = vmatmul.mubr.f32.gmra.mrb[56].mxu1 %v1020_v58  ;;  %v1046_v58 = vpop.permute.xlu1 %1045 }
 0x321   :  { %1365 = vmatprep.mubr.f32.mxu1 %v1023_v28 }
 0x324   :  { %1366 = vmatmul.mubr.f32.gmra.mrb[58].mxu1 %v1022_v29 }
 0x325   :  { %1370 = vmatprep.mubr.f32.mxu1 %v1025_v53 }
 0x328   :  { %1371 = vmatmul.mubr.f32.gmra.mrb[60].mxu1 %v1024_v60 }
 0x329   :  { %1375 = vmatprep.mubr.f32.mxu1 %v1027_v12 }
 0x32c   :  { %1376 = vmatmul.mubr.f32.gmra.mrb[62].mxu1 %v1026_v54 }
 0x383   :  { %v1222_v40 = vpop.f32.mrb[0].mxu1 }
 0x384   :  { %v1223_v31 = vadd.f32 %v1222_v40, %v1030_v25  ;;  %v1224_v2 = vpop.f32.mrb[1].mxu1  ;;  %v1050_v25 = vpop.permute.xlu0 %1049 }
 0x386   :  { %v1381_v10 = vmul.f32 0.01, %v1223_v31 }
 0x387   :  { %v1227_v4 = vpop.f32.mrb[2].mxu1 }
 0x388   :  { %v1228_v7 = vadd.f32 %v1227_v4, %v1034_v63  ;;  %v1229_v3 = vpop.f32.mrb[3].mxu1  ;;  %v1413_v5 = vmax.f32 %v1223_v31, %v1381_v10  ;;  %v1054_v10 = vpop.permute.xlu1 %1053 }
 0x38a   :  { %v1382_v14 = vmul.f32 0.01, %v1228_v7 }
 0x38b   :  { %v1232_v16 = vpop.f32.mrb[4].mxu1 }
 0x38c   :  { %v1414_v36 = vmax.f32 %v1228_v7, %v1382_v14  ;;  %v1233_v17 = vadd.f32 %v1232_v16, %v1038_v51  ;;  %v1234_v52 = vpop.f32.mrb[5].mxu1 }
 0x38e   :  { %v2715_v19 = vpack.c.bf16 %v1414_v36, %v1413_v5  ;;  %v1383_v44 = vmul.f32 0.01, %v1233_v17  ;;  %v1058_v5 = vpop.permute.xlu0 %1057 }
 0x38f   :  { %v1237_v8 = vpop.f32.mrb[6].mxu1 }
 0x390   :  { %v1238_v32 = vadd.f32 %v1237_v8, %v1042_v59  ;;  %v1239_v57 = vpop.f32.mrb[7].mxu1  ;;  %2716 = vmatpush1.bf16.msra.mxu0 %v2715_v19  ;;  %v1415_v29 = vmax.f32 %v1233_v17, %v1383_v44  ;;  %v2965_v59 = vmov 4   ;;  %v1062_v44 = vpop.permute.xlu1 %1061 }
 0x391   :  { %2717 = vmatprep.subr.bf16.mxu0 %v3945_v50  ;;  %2860 = vset.pattern.permute.xlu1 %v2965_v59 }
 0x392   :  { %v1384_v20 = vmul.f32 0.01, %v1238_v32  ;;  %1510 = vperm.xlu1 %2860, %v3370_v24   ;;  %2861 = vset.pattern.permute.xlu0 %v2965_v59 }
 0x393   :  { %v1242_v28 = vpop.f32.mrb[8].mxu1  ;;  %1514 = vperm.xlu0 %2861, %v3376_v9  }
 0x394   :  { %v1416_v53 = vmax.f32 %v1238_v32, %v1384_v20  ;;  %v1243_v60 = vadd.f32 %v1242_v28, %v1046_v58  ;;  %v1244_v12 = vpop.f32.mrb[9].mxu1 }
 0x396   :  { %v2718_v54 = vpack.c.bf16 %v1416_v53, %v1415_v29  ;;  %v1385_v40 = vmul.f32 0.01, %v1243_v60  ;;  %1518 = vperm.xlu1 %2860, %v3389_v37   ;;  %v1066_v53 = vpop.permute.xlu0 %1065 }
 0x397   :  { %v1247_v63 = vpop.f32.mrb[10].mxu1  ;;  %1526 = vperm.xlu0 %2861, %v3401_v62  }
 0x398   :  { %v1248_v31 = vadd.f32 %v1247_v63, %v1050_v25  ;;  %v1249_v2 = vpop.f32.mrb[11].mxu1  ;;  %2719 = vmatpush1.bf16.msra.mxu0 %v2718_v54  ;;  %v1417_v3 = vmax.f32 %v1243_v60, %v1385_v40  ;;  %v1070_v25 = vpop.permute.xlu1 %1069 }
 0x399   :  { %2720 = vmatprep.subr.bf16.mxu0 %v3945_v50 }
 0x39a   :  { %v1386_v4 = vmul.f32 0.01, %v1248_v31  ;;  %1522 = vperm.xlu1 %2860, %v3383_v22  }
 0x39b   :  { %v1252_v7 = vpop.f32.mrb[12].mxu1  ;;  %1534 = vperm.xlu0 %2861, %v3414_v48  }
 0x39c   :  { %v1418_v45 = vmax.f32 %v1248_v31, %v1386_v4  ;;  %v1253_v51 = vadd.f32 %v1252_v7, %v1054_v10  ;;  %v1254_v14 = vpop.f32.mrb[13].mxu1  ;;  %v1074_v4 = vpop.permute.xlu0 %1073 }
 0x39d   :  { %v1078_v48 = vpop.permute.xlu1 %1077 }
 0x39e   :  { %v2721_v16 = vpack.c.bf16 %v1418_v45, %v1417_v3  ;;  %v1387_v17 = vmul.f32 0.01, %v1253_v51  ;;  %1530 = vperm.xlu1 %2860, %v3395_v42  }
 0x39f   :  { %v1257_v36 = vpop.f32.mrb[14].mxu1  ;;  %1542 = vperm.xlu0 %2861, %v3426_v6  }
 0x3a0   :  { %v1258_v52 = vadd.f32 %v1257_v36, %v1058_v5  ;;  %v1259_v19 = vpop.f32.mrb[15].mxu1  ;;  %2722 = vmatpush1.bf16.msra.mxu0 %v2721_v16  ;;  %v1419_v57 = vmax.f32 %v1253_v51, %v1387_v17  ;;  %v1082_v36 = vpop.permute.xlu0 %1081 }
 0x3a1   :  { %2723 = vmatprep.subr.bf16.mxu0 %v3945_v50 }
 0x3a2   :  { %v1388_v8 = vmul.f32 0.01, %v1258_v52  ;;  %1538 = vperm.xlu1 %2860, %v3408_v56  }
 0x3a3   :  { %v1262_v32 = vpop.f32.mrb[16].mxu1  ;;  %1550 = vperm.xlu0 %2861, %v3439_v15   ;;  %v1086_v15 = vpop.permute.xlu1 %1085 }
 0x3a4   :  { %v1420_v20 = vmax.f32 %v1258_v52, %v1388_v8  ;;  %v1263_v58 = vadd.f32 %v1262_v32, %v1062_v44  ;;  %v1264_v28 = vpop.f32.mrb[17].mxu1 }
 0x3a6   :  { %v2724_v29 = vpack.c.bf16 %v1420_v20, %v1419_v57  ;;  %v1389_v12 = vmul.f32 0.01, %v1263_v58  ;;  %1546 = vperm.xlu1 %2860, %v3420_v35   ;;  %v1090_v20 = vpop.permute.xlu0 %1089 }
 0x3a7   :  { %v1267_v60 = vpop.f32.mrb[18].mxu1  ;;  %1558 = vperm.xlu0 %2861, %v3451_v55  }
 0x3a8   :  { %v1268_v54 = vadd.f32 %v1267_v60, %v1066_v53  ;;  %v1269_v24 = vpop.f32.mrb[19].mxu1  ;;  %2725 = vmatpush1.bf16.msra.mxu0 %v2724_v29  ;;  %v1421_v40 = vmax.f32 %v1263_v58, %v1389_v12 }
 0x3a9   :  { %2726 = vmatprep.subr.bf16.mxu0 %v3945_v50 }
 0x3aa   :  { %v1390_v9 = vmul.f32 0.01, %v1268_v54  ;;  %1554 = vperm.xlu1 %2860, %v3433_v13  }
 0x3ab   :  { %v1272_v63 = vpop.f32.mrb[20].mxu1  ;;  %1566 = vperm.xlu0 %2861, %v3464_v26   ;;  %v1094_v26 = vpop.permute.xlu1 %1093 }
 0x3ac   :  { %v1422_v37 = vmax.f32 %v1268_v54, %v1390_v9  ;;  %v1273_v31 = vadd.f32 %v1272_v63, %v1070_v25  ;;  %v1274_v2 = vpop.f32.mrb[21].mxu1  ;;  %v1098_v9 = vpop.permute.xlu0 %1097 }
 0x3ae   :  { %v2727_v62 = vpack.c.bf16 %v1422_v37, %v1421_v40  ;;  %v1391_v7 = vmul.f32 0.01, %v1273_v31  ;;  %1562 = vperm.xlu1 %2860, %v3445_v21  }
 0x3af   :  { %v1277_v10 = vpop.f32.mrb[22].mxu1  ;;  %1574 = vperm.xlu0 %2861, %v3476_v30  }
 0x3b0   :  { %v1278_v3 = vadd.f32 %v1277_v10, %v1074_v4  ;;  %v1279_v45 = vpop.f32.mrb[23].mxu1  ;;  %2728 = vmatpush1.bf16.msra.mxu0 %v2727_v62  ;;  %v1423_v14 = vmax.f32 %v1273_v31, %v1391_v7  ;;  %v1106_v10 = vpop.permute.xlu0 %1105 }
 0x3b1   :  { %2729 = vmatprep.subr.bf16.mxu0 %v3945_v50 }
 0x3b2   :  { %v1392_v22 = vmul.f32 0.01, %v1278_v3  ;;  %1570 = vperm.xlu1 %2860, %v3458_v18  }
 0x3b3   :  { %v1282_v51 = vpop.f32.mrb[24].mxu1  ;;  %1582 = vperm.xlu0 %2861, %v3489_v46   ;;  %v1102_v46 = vpop.permute.xlu1 %1101 }
 0x3b4   :  { %v1424_v42 = vmax.f32 %v1278_v3, %v1392_v22  ;;  %v1283_v16 = vadd.f32 %v1282_v51, %v1078_v48  ;;  %v1284_v5 = vpop.f32.mrb[25].mxu1 }
 0x3b6   :  { %v2730_v6 = vpack.c.bf16 %v1424_v42, %v1423_v14  ;;  %v1393_v52 = vmul.f32 0.01, %v1283_v16  ;;  %1578 = vperm.xlu1 %2860, %v3470_v11  }
 0x3b7   :  { %v1287_v17 = vpop.f32.mrb[26].mxu1  ;;  %1590 = vperm.xlu0 %2861, %v3501_v38  }
 0x3b8   :  { %v1288_v19 = vadd.f32 %v1287_v17, %v1082_v36  ;;  %v1289_v59 = vpop.f32.mrb[27].mxu1  ;;  %2731 = vmatpush1.bf16.msra.mxu0 %v2730_v6  ;;  %v1425_v44 = vmax.f32 %v1283_v16, %v1393_v52  ;;  %v1114_v16 = vpop.permute.xlu0 %1113 }
 0x3b9   :  { %2732 = vmatprep.subr.bf16.mxu0 %v3945_v50 }
 0x3ba   :  { %v1394_v56 = vmul.f32 0.01, %v1288_v19  ;;  %1586 = vperm.xlu1 %2860, %v3483_v61  }
 0x3bb   :  { %v1292_v8 = vpop.f32.mrb[28].mxu1  ;;  %1598 = vperm.xlu0 %2861, %v3514_v33   ;;  %v1110_v33 = vpop.permute.xlu1 %1109 }
 0x3bc   :  { %v1426_v35 = vmax.f32 %v1288_v19, %v1394_v56  ;;  %v1293_v32 = vadd.f32 %v1292_v8, %v1086_v15  ;;  %v1294_v57 = vpop.f32.mrb[29].mxu1  ;;  %v1122_v15 = vpop.permute.xlu0 %1121 }
 0x3be   :  { %v2733_v55 = vpack.c.bf16 %v1426_v35, %v1425_v44  ;;  %v1395_v28 = vmul.f32 0.01, %v1293_v32  ;;  %1594 = vperm.xlu1 %2860, %v3495_v39  }
 0x3bf   :  { %v1297_v58 = vpop.f32.mrb[30].mxu1  ;;  %1606 = vperm.xlu0 %2861, %v3526_v41  }
 0x3c0   :  { %v1298_v29 = vadd.f32 %v1297_v58, %v1090_v20  ;;  %v1299_v53 = vpop.f32.mrb[31].mxu1  ;;  %2734 = vmatpush1.bf16.msra.mxu0 %v2733_v55  ;;  %v1427_v12 = vmax.f32 %v1293_v32, %v1395_v28 }
 0x3c1   :  { %2735 = vmatprep.subr.bf16.mxu0 %v3945_v50 }
 0x3c2   :  { %v1396_v13 = vmul.f32 0.01, %v1298_v29  ;;  %1602 = vperm.xlu1 %2860, %v3508_v27  }
 0x3c3   :  { %v1302_v60 = vpop.f32.mrb[32].mxu1  ;;  %1614 = vperm.xlu0 %2861, %v3539_v47   ;;  %v1118_v47 = vpop.permute.xlu1 %1117 }
 0x3c4   :  { %v1428_v21 = vmax.f32 %v1298_v29, %v1396_v13  ;;  %v1303_v54 = vadd.f32 %v1302_v60, %v1094_v26  ;;  %v1304_v24 = vpop.f32.mrb[33].mxu1 }
 0x3c6   :  { %v2736_v30 = vpack.c.bf16 %v1428_v21, %v1427_v12  ;;  %v1397_v63 = vmul.f32 0.01, %v1303_v54  ;;  %1610 = vperm.xlu1 %2860, %v3520_v34  }
 0x3c7   :  { %v1307_v25 = vpop.f32.mrb[34].mxu1  ;;  %1622 = vperm.xlu0 %2861, %v3551_v0   ;;  %v1126_v57 = vpop.permute.xlu1 %1125 }
 0x3c8   :  { %v1308_v40 = vadd.f32 %v1307_v25, %v1098_v9  ;;  %v1309_v37 = vpop.f32.mrb[35].mxu1  ;;  %2737 = vmatpush1.bf16.msra.mxu0 %v2736_v30  ;;  %v1429_v2 = vmax.f32 %v1303_v54, %v1397_v63 }
 0x3c9   :  { %2738 = vmatprep.subr.bf16.mxu0 %v3945_v50 }
 0x3ca   :  { %v1398_v18 = vmul.f32 0.01, %v1308_v40  ;;  %1618 = vperm.xlu1 %2860, %v3533_v43  }
 0x3cb   :  { %v1312_v31 = vpop.f32.mrb[36].mxu1  ;;  %1630 = vperm.xlu0 %2861, %v3564_v1   ;;  %v1134_v21 = vpop.permute.xlu1 %1133 }
 0x3cc   :  { %v1430_v11 = vmax.f32 %v1308_v40, %v1398_v18  ;;  %v1313_v62 = vadd.f32 %v1312_v31, %v1102_v46  ;;  %v1314_v4 = vpop.f32.mrb[37].mxu1 }
 0x3ce   :  { %v2739_v38 = vpack.c.bf16 %v1430_v11, %v1429_v2  ;;  %v1399_v3 = vmul.f32 0.01, %v1313_v62  ;;  %1626 = vperm.xlu1 %2860, %v3545_v23   ;;  %v1130_v23 = vpop.permute.xlu0 %1129 }
 0x3cf   :  { %v1317_v7 = vpop.f32.mrb[38].mxu1  ;;  %v1142_v2 = vpop.permute.xlu1 %1141 }
 0x3d0   :  { %v1318_v45 = vadd.f32 %v1317_v7, %v1106_v10  ;;  %v1319_v22 = vpop.f32.mrb[39].mxu1  ;;  %2740 = vmatpush1.bf16.msra.mxu0 %v2739_v38  ;;  %v1431_v51 = vmax.f32 %v1313_v62, %v1399_v3 }
 0x3d1   :  { %2741 = vmatprep.subr.bf16.mxu0 %v3945_v50 }
 0x3d2   :  { %v1400_v61 = vmul.f32 0.01, %v1318_v45  ;;  %1634 = vperm.xlu1 %2860, %v3558_v49   ;;  %v1138_v63 = vpop.permute.xlu0 %1137 }
 0x3d3   :  { %v1322_v48 = vpop.f32.mrb[40].mxu1 }
 0x3d4   :  { %v1432_v39 = vmax.f32 %v1318_v45, %v1400_v61  ;;  %v1323_v14 = vadd.f32 %v1322_v48, %v1110_v33  ;;  %v1324_v42 = vpop.f32.mrb[41].mxu1 }
 0x3d6   :  { %v2742_v41 = vpack.c.bf16 %v1432_v39, %v1431_v51  ;;  %v1401_v6 = vmul.f32 0.01, %v1323_v14  ;;  %v1146_v3 = vpop.permute.xlu0 %1145  ;;  %v1150_v51 = vpop.permute.xlu1 %1149 }
 0x3d7   :  { %v1327_v5 = vpop.f32.mrb[42].mxu1 }
 0x3d8   :  { %v1328_v36 = vadd.f32 %v1327_v5, %v1114_v16  ;;  %v1329_v17 = vpop.f32.mrb[43].mxu1  ;;  %2743 = vmatpush1.bf16.msra.mxu0 %v2742_v41  ;;  %v1433_v19 = vmax.f32 %v1323_v14, %v1401_v6 }
 0x3d9   :  { %2744 = vmatprep.subr.bf16.mxu0 %v3945_v50 }
 0x3da   :  { %v1402_v27 = vmul.f32 0.01, %v1328_v36  ;;  %v1154_v6 = vpop.permute.xlu0 %1153 }
 0x3db   :  { %v1332_v52 = vpop.f32.mrb[44].mxu1 }
 0x3dc   :  { %v1434_v34 = vmax.f32 %v1328_v36, %v1402_v27  ;;  %v1333_v59 = vadd.f32 %v1332_v52, %v1118_v47  ;;  %v1334_v56 = vpop.f32.mrb[45].mxu1 }
 0x3dd   :  { %v1445_v56 = vld [vmem:[#allocation2 + $0x20] sm:$0xff] }
 0x3de   :  { %v2745_v0 = vpack.c.bf16 %v1434_v34, %v1433_v19  ;;  %v1403_v44 = vmul.f32 0.01, %v1333_v59 }
 0x3df   :  { %v1337_v8 = vpop.f32.mrb[46].mxu1 }
 0x3e0   :  { %v1338_v35 = vadd.f32 %v1337_v8, %v1122_v15  ;;  %v1339_v32 = vpop.f32.mrb[47].mxu1  ;;  %2746 = vmatpush1.bf16.msra.mxu0 %v2745_v0  ;;  %v1435_v55 = vmax.f32 %v1333_v59, %v1403_v44  ;;  %v1448_v0 = vld [vmem:[#allocation2 + $0x68] sm:$0xff]  ;;  %v1447_v15 = vld [vmem:[#allocation2 + $0x60] sm:$0xff] }
 0x3e1   :  { %2747 = vmatprep.subr.bf16.mxu0 %v3945_v50  ;;  %v1450_v8 = vld [vmem:[#allocation2 + $0xa8] sm:$0xff]  ;;  %v1449_v44 = vld [vmem:[#allocation2 + $0xa0] sm:$0xff] }
 0x3e2   :  { %v1404_v43 = vmul.f32 0.01, %v1338_v35  ;;  %v1451_v32 = vld [vmem:[#allocation2 + $0xe0] sm:$0xff] }
 0x3e3   :  { %v1342_v1 = vpop.f32.mrb[48].mxu1 }
 0x3e4   :  { %v1436_v20 = vmax.f32 %v1338_v35, %v1404_v43  ;;  %v1343_v58 = vadd.f32 %v1342_v1, %v1126_v57  ;;  %v1344_v28 = vpop.f32.mrb[49].mxu1  ;;  %v1452_v35 = vld [vmem:[#allocation2 + $0xe8] sm:$0xff]  ;;  %v1453_v57 = vld [vmem:[#allocation2 + $0x120] sm:$0xff] }
 0x3e5   :  { %v1454_v43 = vld [vmem:[#allocation2 + $0x128] sm:$0xff] }
 0x3e6   :  { %v2748_v29 = vpack.c.bf16 %v1436_v20, %v1435_v55  ;;  %v1405_v13 = vmul.f32 0.01, %v1343_v58  ;;  %v1456_v1 = vld [vmem:[#allocation2 + $0x168] sm:$0xff]  ;;  %v1455_v55 = vld [vmem:[#allocation2 + $0x160] sm:$0xff] }
 0x3e7   :  { %v1347_v53 = vpop.f32.mrb[50].mxu1  ;;  %v1458_v20 = vld [vmem:[#allocation2 + $0x1a8] sm:$0xff] }
 0x3e8   :  { %v1348_v26 = vadd.f32 %v1347_v53, %v1130_v23  ;;  %v1349_v60 = vpop.f32.mrb[51].mxu1  ;;  %2749 = vmatpush1.bf16.msra.mxu0 %v2748_v29  ;;  %v1437_v49 = vmax.f32 %v1343_v58, %v1405_v13  ;;  %v1457_v58 = vld [vmem:[#allocation2 + $0x1a0] sm:$0xff]  ;;  %v1460_v28 = vld [vmem:[#allocation2 + $0x1e8] sm:$0xff] }
 0x3e9   :  { %2750 = vmatprep.subr.bf16.mxu0 %v3945_v50  ;;  %v1459_v29 = vld [vmem:[#allocation2 + $0x1e0] sm:$0xff]  ;;  %v1462_v23 = vld [vmem:[#allocation2 + $0x228] sm:$0xff] }
 0x3ea   :  { %v1406_v12 = vmul.f32 0.01, %v1348_v26  ;;  %v1461_v53 = vld [vmem:[#allocation2 + $0x220] sm:$0xff]  ;;  %v1464_v13 = vld [vmem:[#allocation2 + $0x268] sm:$0xff] }
 0x3eb   :  { %v1352_v54 = vpop.f32.mrb[52].mxu1  ;;  %v1466_v60 = vld [vmem:[#allocation2 + $0x2a8] sm:$0xff] }
 0x3ec   :  { %v1438_v24 = vmax.f32 %v1348_v26, %v1406_v12  ;;  %v1353_v30 = vadd.f32 %v1352_v54, %v1134_v21  ;;  %v1354_v9 = vpop.f32.mrb[53].mxu1  ;;  %v1463_v26 = vld [vmem:[#allocation2 + $0x260] sm:$0xff]  ;;  %v1468_v21 = vld [vmem:[#allocation2 + $0x2e8] sm:$0xff] }
 0x3ed   :  { %v1465_v12 = vld [vmem:[#allocation2 + $0x2a0] sm:$0xff] }
 0x3ee   :  { %v2751_v25 = vpack.c.bf16 %v1438_v24, %v1437_v49  ;;  %v1407_v37 = vmul.f32 0.01, %v1353_v30  ;;  %v1467_v54 = vld [vmem:[#allocation2 + $0x2e0] sm:$0xff]  ;;  %v1470_v49 = vld [vmem:[#allocation2 + $0x328] sm:$0xff] }
 0x3ef   :  { %v1357_v40 = vpop.f32.mrb[54].mxu1  ;;  %v1469_v24 = vld [vmem:[#allocation2 + $0x320] sm:$0xff] }
 0x3f0   :  { %v1358_v18 = vadd.f32 %v1357_v40, %v1138_v63  ;;  %v1359_v46 = vpop.f32.mrb[55].mxu1  ;;  %2752 = vmatpush1.bf16.msra.mxu0 %v2751_v25  ;;  %v1439_v62 = vmax.f32 %v1353_v30, %v1407_v37  ;;  %v1472_v30 = vld [vmem:[#allocation2 + $0x368] sm:$0xff]  ;;  %v1471_v9 = vld [vmem:[#allocation2 + $0x360] sm:$0xff] }
 0x3f1   :  { %2753 = vmatprep.subr.bf16.mxu0 %v3945_v50  ;;  %v1474_v25 = vld [vmem:[#allocation2 + $0x3a8] sm:$0xff]  ;;  %v1473_v63 = vld [vmem:[#allocation2 + $0x3a0] sm:$0xff] }
 0x3f2   :  { %v1408_v31 = vmul.f32 0.01, %v1358_v18  ;;  %v1476_v40 = vld [vmem:[#allocation2 + $0x3e8] sm:$0xff]  ;;  %v1475_v37 = vld [vmem:[#allocation2 + $0x3e0] sm:$0xff] }
 0x3f3   :  { %v1362_v11 = vpop.f32.mrb[56].mxu1  ;;  %v1477_v46 = vld [vmem:[#allocation2 + $0x420] sm:$0xff] }
 0x3f4   :  { %v1440_v4 = vmax.f32 %v1358_v18, %v1408_v31  ;;  %v1363_v38 = vadd.f32 %v1362_v11, %v1142_v2  ;;  %v1364_v10 = vpop.f32.mrb[57].mxu1  ;;  %v1478_v18 = vld [vmem:[#allocation2 + $0x428] sm:$0xff]  ;;  %v1479_v2 = vld [vmem:[#allocation2 + $0x460] sm:$0xff] }
 0x3f5   :  { %v1480_v31 = vld [vmem:[#allocation2 + $0x468] sm:$0xff] }
 0x3f6   :  { %v2754_v7 = vpack.c.bf16 %v1440_v4, %v1439_v62  ;;  %v1409_v22 = vmul.f32 0.01, %v1363_v38  ;;  %v1482_v11 = vld [vmem:[#allocation2 + $0x4a8] sm:$0xff]  ;;  %v1481_v62 = vld [vmem:[#allocation2 + $0x4a0] sm:$0xff] }
 0x3f7   :  { %v1367_v45 = vpop.f32.mrb[58].mxu1  ;;  %v1484_v4 = vld [vmem:[#allocation2 + $0x4e8] sm:$0xff] }
 0x3f8   :  { %v1368_v61 = vadd.f32 %v1367_v45, %v1146_v3  ;;  %v1369_v33 = vpop.f32.mrb[59].mxu1  ;;  %2755 = vmatpush1.bf16.msra.mxu0 %v2754_v7  ;;  %v1441_v14 = vmax.f32 %v1363_v38, %v1409_v22  ;;  %v1483_v38 = vld [vmem:[#allocation2 + $0x4e0] sm:$0xff]  ;;  %v1486_v10 = vld [vmem:[#allocation2 + $0x528] sm:$0xff] }
 0x3f9   :  { %2756 = vmatprep.subr.bf16.mxu0 %v3945_v50  ;;  %v1485_v7 = vld [vmem:[#allocation2 + $0x520] sm:$0xff]  ;;  %v1488_v3 = vld [vmem:[#allocation2 + $0x568] sm:$0xff] }
 0x3fa   :  { %v1410_v48 = vmul.f32 0.01, %v1368_v61  ;;  %v1487_v45 = vld [vmem:[#allocation2 + $0x560] sm:$0xff]  ;;  %v1490_v22 = vld [vmem:[#allocation2 + $0x5a8] sm:$0xff] }
 0x3fb   :  { %v1372_v39 = vpop.f32.mrb[60].mxu1  ;;  %v1492_v33 = vld [vmem:[#allocation2 + $0x5e8] sm:$0xff] }
 0x3fc   :  { %v1442_v42 = vmax.f32 %v1368_v61, %v1410_v48  ;;  %v1373_v41 = vadd.f32 %v1372_v39, %v1150_v51  ;;  %v1374_v16 = vpop.f32.mrb[61].mxu1  ;;  %v1489_v61 = vld [vmem:[#allocation2 + $0x5a0] sm:$0xff]  ;;  %v1494_v51 = vld [vmem:[#allocation2 + $0x628] sm:$0xff] }
 0x3fd   :  { %v1491_v48 = vld [vmem:[#allocation2 + $0x5e0] sm:$0xff] }
 0x3fe   :  { %v2757_v5 = vpack.c.bf16 %v1442_v42, %v1441_v14  ;;  %v1411_v17 = vmul.f32 0.01, %v1373_v41  ;;  %v1493_v39 = vld [vmem:[#allocation2 + $0x620] sm:$0xff]  ;;  %v1496_v14 = vld [vmem:[#allocation2 + $0x668] sm:$0xff] }
 0x3ff   :  { %v1377_v36 = vpop.f32.mrb[62].mxu1  ;;  %v1495_v42 = vld [vmem:[#allocation2 + $0x660] sm:$0xff] }
 0x400   :  { %v1378_v27 = vadd.f32 %v1377_v36, %v1154_v6  ;;  %v1379_v47 = vpop.f32.mrb[63].mxu1  ;;  %2758 = vmatpush1.bf16.msra.mxu0 %v2757_v5  ;;  %v1443_v19 = vmax.f32 %v1373_v41, %v1411_v17  ;;  %v1498_v41 = vld [vmem:[#allocation2 + $0x6a8] sm:$0xff]  ;;  %v1497_v16 = vld [vmem:[#allocation2 + $0x6a0] sm:$0xff] }
 0x401   :  { %2759 = vmatprep.subr.bf16.mxu0 %v3945_v50  ;;  %v1500_v5 = vld [vmem:[#allocation2 + $0x6e8] sm:$0xff]  ;;  %v1499_v6 = vld [vmem:[#allocation2 + $0x6e0] sm:$0xff] }
 0x402   :  { %v1412_v52 = vmul.f32 0.01, %v1378_v27  ;;  %v1502_v36 = vld [vmem:[#allocation2 + $0x728] sm:$0xff]  ;;  %v1501_v17 = vld [vmem:[#allocation2 + $0x720] sm:$0xff] }
 0x403   :  { %v1503_v47 = vld [vmem:[#allocation2 + $0x760] sm:$0xff] }
 0x404   :  { %v1444_v34 = vmax.f32 %v1378_v27, %v1412_v52  ;;  %v1504_v27 = vld [vmem:[#allocation2 + $0x768] sm:$0xff] }
 0x405   :  { %v1506_v52 = vld [vmem:[#allocation2 + $0x7a8] sm:$0xff] }
 0x406   :  { %v2760_v59 = vpack.c.bf16 %v1444_v34, %v1443_v19  ;;  %v1505_v19 = vld [vmem:[#allocation2 + $0x7a0] sm:$0xff]  ;;  %v1508_v34 = vld [vmem:[#allocation2 + $0x7e8] sm:$0xff] }
 0x408   :  { %2761 = vmatpush1.bf16.msra.mxu0 %v2760_v59  ;;  %v1507_v59 = vld [vmem:[#allocation2 + $0x7e0] sm:$0xff] }
 0x40b   :  { %1702 = vmatmul.mubr.f32.vlgmr.msra.gmra.mrb[64].mxu0 %v1445_v56 }
 0x40c   :  { %1706 = vmatprep.mubr.f32.mxu0 %v1448_v0 }
 0x40f   :  { %1707 = vmatmul.mubr.f32.gmra.mrb[66].mxu0 %v1447_v15 }
 0x410   :  { %1711 = vmatprep.mubr.f32.mxu0 %v1450_v8 }
 0x411   :  { %v1511_v56 = vpop.permute.xlu1 %1510 }
 0x413   :  { %1712 = vmatmul.mubr.f32.gmra.mrb[68].mxu0 %v1449_v44  ;;  %v1515_v44 = vpop.permute.xlu0 %1514 }
 0x414   :  { %1716 = vmatprep.mubr.f32.mxu0 %v1452_v35 }
 0x417   :  { %1717 = vmatmul.mubr.f32.gmra.mrb[70].mxu0 %v1451_v32 }
 0x418   :  { %1721 = vmatprep.mubr.f32.mxu0 %v1454_v43 }
 0x41b   :  { %1722 = vmatmul.mubr.f32.gmra.mrb[72].mxu0 %v1453_v57 }
 0x41c   :  { %1726 = vmatprep.mubr.f32.mxu0 %v1456_v1  ;;  %v1927_v1 = vld [vmem:[#allocation2 + $0x38] sm:$0xff] }
 0x41d   :  { %2182 = vmatprep.mubr.f32.mxu1 %v1927_v1 }
 0x41f   :  { %1727 = vmatmul.mubr.f32.gmra.mrb[74].mxu0 %v1455_v55  ;;  %v1519_v55 = vpop.permute.xlu1 %1518 }
 0x420   :  { %1731 = vmatprep.mubr.f32.mxu0 %v1458_v20 }
 0x423   :  { %1732 = vmatmul.mubr.f32.gmra.mrb[76].mxu0 %v1457_v58 }
 0x424   :  { %1736 = vmatprep.mubr.f32.mxu0 %v1460_v28 }
 0x427   :  { %1737 = vmatmul.mubr.f32.gmra.mrb[78].mxu0 %v1459_v29 }
 0x428   :  { %1741 = vmatprep.mubr.f32.mxu0 %v1462_v23 }
 0x42b   :  { %1742 = vmatmul.mubr.f32.gmra.mrb[80].mxu0 %v1461_v53 }
 0x42c   :  { %1746 = vmatprep.mubr.f32.mxu0 %v1464_v13 }
 0x42f   :  { %1747 = vmatmul.mubr.f32.gmra.mrb[82].mxu0 %v1463_v26  ;;  %v1523_v26 = vpop.permute.xlu1 %1522 }
 0x430   :  { %1751 = vmatprep.mubr.f32.mxu0 %v1466_v60 }
 0x433   :  { %1752 = vmatmul.mubr.f32.gmra.mrb[84].mxu0 %v1465_v12 }
 0x434   :  { %1756 = vmatprep.mubr.f32.mxu0 %v1468_v21 }
 0x437   :  { %1757 = vmatmul.mubr.f32.gmra.mrb[86].mxu0 %v1467_v54 }
 0x438   :  { %1761 = vmatprep.mubr.f32.mxu0 %v1470_v49 }
 0x43b   :  { %1762 = vmatmul.mubr.f32.gmra.mrb[88].mxu0 %v1469_v24  ;;  %v1527_v24 = vpop.permute.xlu0 %1526 }
 0x43c   :  { %1766 = vmatprep.mubr.f32.mxu0 %v1472_v30 }
 0x43f   :  { %1767 = vmatmul.mubr.f32.gmra.mrb[90].mxu0 %v1471_v9 }
 0x440   :  { %1771 = vmatprep.mubr.f32.mxu0 %v1474_v25 }
 0x443   :  { %1772 = vmatmul.mubr.f32.gmra.mrb[92].mxu0 %v1473_v63 }
 0x444   :  { %1776 = vmatprep.mubr.f32.mxu0 %v1476_v40 }
 0x447   :  { %1777 = vmatmul.mubr.f32.gmra.mrb[94].mxu0 %v1475_v37 }
 0x448   :  { %1781 = vmatprep.mubr.f32.mxu0 %v1478_v18  ;;  %v1531_v18 = vpop.permute.xlu1 %1530 }
 0x44b   :  { %1782 = vmatmul.mubr.f32.gmra.mrb[96].mxu0 %v1477_v46 }
 0x44c   :  { %1786 = vmatprep.mubr.f32.mxu0 %v1480_v31 }
 0x44f   :  { %1787 = vmatmul.mubr.f32.gmra.mrb[98].mxu0 %v1479_v2 }
 0x450   :  { %1791 = vmatprep.mubr.f32.mxu0 %v1482_v11 }
 0x453   :  { %1792 = vmatmul.mubr.f32.gmra.mrb[100].mxu0 %v1481_v62 }
 0x454   :  { %1796 = vmatprep.mubr.f32.mxu0 %v1484_v4  ;;  %v1535_v4 = vpop.permute.xlu0 %1534 }
 0x457   :  { %1797 = vmatmul.mubr.f32.gmra.mrb[102].mxu0 %v1483_v38 }
 0x458   :  { %1801 = vmatprep.mubr.f32.mxu0 %v1486_v10 }
 0x45b   :  { %1802 = vmatmul.mubr.f32.gmra.mrb[104].mxu0 %v1485_v7 }
 0x45c   :  { %1806 = vmatprep.mubr.f32.mxu0 %v1488_v3 }
 0x45f   :  { %1807 = vmatmul.mubr.f32.gmra.mrb[106].mxu0 %v1487_v45 }
 0x460   :  { %1811 = vmatprep.mubr.f32.mxu0 %v1490_v22 }
 0x463   :  { %1812 = vmatmul.mubr.f32.gmra.mrb[108].mxu0 %v1489_v61  ;;  %v1539_v61 = vpop.permute.xlu1 %1538 }
 0x464   :  { %1816 = vmatprep.mubr.f32.mxu0 %v1492_v33 }
 0x467   :  { %1817 = vmatmul.mubr.f32.gmra.mrb[110].mxu0 %v1491_v48 }
 0x468   :  { %1821 = vmatprep.mubr.f32.mxu0 %v1494_v51 }
 0x46b   :  { %1822 = vmatmul.mubr.f32.gmra.mrb[112].mxu0 %v1493_v39 }
 0x46c   :  { %1826 = vmatprep.mubr.f32.mxu0 %v1496_v14 }
 0x46f   :  { %1827 = vmatmul.mubr.f32.gmra.mrb[114].mxu0 %v1495_v42  ;;  %v1543_v42 = vpop.permute.xlu0 %1542 }
 0x470   :  { %1831 = vmatprep.mubr.f32.mxu0 %v1498_v41 }
 0x473   :  { %1832 = vmatmul.mubr.f32.gmra.mrb[116].mxu0 %v1497_v16 }
 0x474   :  { %1836 = vmatprep.mubr.f32.mxu0 %v1500_v5 }
 0x477   :  { %1837 = vmatmul.mubr.f32.gmra.mrb[118].mxu0 %v1499_v6 }
 0x478   :  { %1841 = vmatprep.mubr.f32.mxu0 %v1502_v36 }
 0x47b   :  { %1842 = vmatmul.mubr.f32.gmra.mrb[120].mxu0 %v1501_v17  ;;  %v2966_v17 = vmov 5  }
 0x47c   :  { %1846 = vmatprep.mubr.f32.mxu0 %v1504_v27  ;;  %2863 = vset.pattern.permute.xlu1 %v2966_v17 }
 0x47d   :  { %2862 = vset.pattern.permute.xlu0 %v2966_v17 }
 0x47f   :  { %1847 = vmatmul.mubr.f32.gmra.mrb[122].mxu0 %v1503_v47  ;;  %v3627_v47 = vld [vmem:[%s3935_s1 + $0x8] sm:$0xff] }
 0x480   :  { %1851 = vmatprep.mubr.f32.mxu0 %v1506_v52  ;;  %1995 = vperm.xlu1 %2863, %v3627_v47   ;;  %v3633_v52 = vld [vmem:[%s3935_s1] sm:$0xff] }
 0x481   :  { %1991 = vperm.xlu0 %2862, %v3633_v52  }
 0x483   :  { %1852 = vmatmul.mubr.f32.gmra.mrb[124].mxu0 %v1505_v19  ;;  %v1547_v19 = vpop.permute.xlu1 %1546 }
 0x484   :  { %1856 = vmatprep.mubr.f32.mxu0 %v1508_v34 }
 0x487   :  { %1857 = vmatmul.mubr.f32.gmra.mrb[126].mxu0 %v1507_v59 }
 0x4de   :  { %v1703_v0 = vpop.f32.mrb[64].mxu0 }
 0x4df   :  { %v1704_v15 = vadd.f32 %v1703_v0, %v1511_v56  ;;  %v1705_v8 = vpop.f32.mrb[65].mxu0 }
 0x4e0   :  { %v3640_v8 = vld [vmem:[%s3935_s1 + $0x10] sm:$0xff] }
 0x4e1   :  { %v1862_v32 = vmul.f32 0.01, %v1704_v15  ;;  %1999 = vperm.xlu1 %2863, %v3640_v8  }
 0x4e2   :  { %v1708_v35 = vpop.f32.mrb[66].mxu0 }
 0x4e3   :  { %v1709_v43 = vadd.f32 %v1708_v35, %v1515_v44  ;;  %v1710_v57 = vpop.f32.mrb[67].mxu0  ;;  %v1894_v28 = vmax.f32 %v1704_v15, %v1862_v32  ;;  %v3646_v44 = vld [vmem:[%s3935_s1 + $0x18] sm:$0xff]  ;;  %v1551_v35 = vpop.permute.xlu0 %1550 }
 0x4e4   :  { %2003 = vperm.xlu0 %2862, %v3646_v44  }
 0x4e5   :  { %v1863_v20 = vmul.f32 0.01, %v1709_v43 }
 0x4e6   :  { %v1713_v58 = vpop.f32.mrb[68].mxu0 }
 0x4e7   :  { %v1895_v29 = vmax.f32 %v1709_v43, %v1863_v20  ;;  %v1714_v23 = vadd.f32 %v1713_v58, %v1519_v55  ;;  %v1715_v53 = vpop.f32.mrb[69].mxu0  ;;  %v3652_v58 = vld [vmem:[%s3935_s1 + $0x20] sm:$0xff] }
 0x4e8   :  { %2007 = vperm.xlu1 %2863, %v3652_v58  }
 0x4e9   :  { %v2763_v13 = vpack.c.bf16 %v1895_v29, %v1894_v28  ;;  %v1864_v12 = vmul.f32 0.01, %v1714_v23  ;;  %v3658_v28 = vld [vmem:[%s3935_s1 + $0x28] sm:$0xff]  ;;  %v1555_v29 = vpop.permute.xlu1 %1554 }
 0x4ea   :  { %v1718_v60 = vpop.f32.mrb[70].mxu0  ;;  %2011 = vperm.xlu0 %2862, %v3658_v28  }
 0x4eb   :  { %v1719_v21 = vadd.f32 %v1718_v60, %v1523_v26  ;;  %v1720_v54 = vpop.f32.mrb[71].mxu0  ;;  %2764 = vmatpush1.bf16.msra.mxu1 %v2763_v13  ;;  %v1896_v9 = vmax.f32 %v1714_v23, %v1864_v12  ;;  %v3665_v12 = vld [vmem:[%s3935_s1 + $0x30] sm:$0xff] }
 0x4ec   :  { %2765 = vmatprep.subr.bf16.mxu1 %v3945_v50  ;;  %2015 = vperm.xlu1 %2863, %v3665_v12   ;;  %v1559_v54 = vpop.permute.xlu0 %1558 }
 0x4ed   :  { %v1865_v49 = vmul.f32 0.01, %v1719_v21 }
 0x4ee   :  { %v1723_v30 = vpop.f32.mrb[72].mxu0 }
 0x4ef   :  { %v1897_v25 = vmax.f32 %v1719_v21, %v1865_v49  ;;  %v1724_v63 = vadd.f32 %v1723_v30, %v1527_v24  ;;  %v1725_v40 = vpop.f32.mrb[73].mxu0  ;;  %v3671_v21 = vld [vmem:[%s3935_s1 + $0x38] sm:$0xff] }
 0x4f0   :  { %2019 = vperm.xlu0 %2862, %v3671_v21   ;;  %v3677_v40 = vld [vmem:[%s3935_s1 + $0x40] sm:$0xff] }
 0x4f1   :  { %v2766_v37 = vpack.c.bf16 %v1897_v25, %v1896_v9  ;;  %v1866_v31 = vmul.f32 0.01, %v1724_v63  ;;  %2023 = vperm.xlu1 %2863, %v3677_v40  }
 0x4f2   :  { %v1728_v46 = vpop.f32.mrb[74].mxu0 }
 0x4f3   :  { %v1729_v2 = vadd.f32 %v1728_v46, %v1531_v18  ;;  %v1730_v11 = vpop.f32.mrb[75].mxu0  ;;  %2767 = vmatpush1.bf16.msra.mxu1 %v2766_v37  ;;  %v1898_v10 = vmax.f32 %v1724_v63, %v1866_v31  ;;  %v3683_v37 = vld [vmem:[%s3935_s1 + $0x48] sm:$0xff]  ;;  %v1563_v18 = vpop.permute.xlu1 %1562 }
 0x4f4   :  { %2768 = vmatprep.subr.bf16.mxu1 %v3945_v50  ;;  %2027 = vperm.xlu0 %2862, %v3683_v37  }
 0x4f5   :  { %v1867_v62 = vmul.f32 0.01, %v1729_v2 }
 0x4f6   :  { %v1733_v38 = vpop.f32.mrb[76].mxu0 }
 0x4f7   :  { %v1899_v7 = vmax.f32 %v1729_v2, %v1867_v62  ;;  %v1734_v3 = vadd.f32 %v1733_v38, %v1535_v4  ;;  %v1735_v45 = vpop.f32.mrb[77].mxu0  ;;  %v3690_v4 = vld [vmem:[%s3935_s1 + $0x50] sm:$0xff]  ;;  %v3696_v38 = vld [vmem:[%s3935_s1 + $0x58] sm:$0xff] }
 0x4f8   :  { %2031 = vperm.xlu1 %2863, %v3690_v4   ;;  %2035 = vperm.xlu0 %2862, %v3696_v38  }
 0x4f9   :  { %v2769_v22 = vpack.c.bf16 %v1899_v7, %v1898_v10  ;;  %v1868_v48 = vmul.f32 0.01, %v1734_v3  ;;  %v1567_v10 = vpop.permute.xlu0 %1566 }
 0x4fa   :  { %v1738_v33 = vpop.f32.mrb[78].mxu0 }
 0x4fb   :  { %v1739_v51 = vadd.f32 %v1738_v33, %v1539_v61  ;;  %v1740_v39 = vpop.f32.mrb[79].mxu0  ;;  %2770 = vmatpush1.bf16.msra.mxu1 %v2769_v22  ;;  %v1900_v16 = vmax.f32 %v1734_v3, %v1868_v48  ;;  %v3702_v48 = vld [vmem:[%s3935_s1 + $0x60] sm:$0xff] }
 0x4fc   :  { %2771 = vmatprep.subr.bf16.mxu1 %v3945_v50  ;;  %2039 = vperm.xlu1 %2863, %v3702_v48   ;;  %v1571_v39 = vpop.permute.xlu1 %1570 }
 0x4fd   :  { %v1869_v14 = vmul.f32 0.01, %v1739_v51 }
 0x4fe   :  { %v1743_v41 = vpop.f32.mrb[80].mxu0 }
 0x4ff   :  { %v1901_v5 = vmax.f32 %v1739_v51, %v1869_v14  ;;  %v1744_v6 = vadd.f32 %v1743_v41, %v1543_v42  ;;  %v1745_v36 = vpop.f32.mrb[81].mxu0  ;;  %v3708_v51 = vld [vmem:[%s3935_s1 + $0x68] sm:$0xff] }
 0x500   :  { %2043 = vperm.xlu0 %2862, %v3708_v51   ;;  %v3721_v36 = vld [vmem:[%s3935_s1 + $0x78] sm:$0xff] }
 0x501   :  { %v2772_v27 = vpack.c.bf16 %v1901_v5, %v1900_v16  ;;  %v1870_v59 = vmul.f32 0.01, %v1744_v6 }
 0x502   :  { %v1748_v34 = vpop.f32.mrb[82].mxu0 }
 0x503   :  { %v1749_v56 = vadd.f32 %v1748_v34, %v1547_v19  ;;  %v1750_v0 = vpop.f32.mrb[83].mxu0  ;;  %2773 = vmatpush1.bf16.msra.mxu1 %v2772_v27  ;;  %v1902_v43 = vmax.f32 %v1744_v6, %v1870_v59  ;;  %v3715_v6 = vld [vmem:[%s3935_s1 + $0x70] sm:$0xff]  ;;  %v1575_v27 = vpop.permute.xlu0 %1574 }
 0x504   :  { %2774 = vmatprep.subr.bf16.mxu1 %v3945_v50  ;;  %2047 = vperm.xlu1 %2863, %v3715_v6  }
 0x505   :  { %v1871_v15 = vmul.f32 0.01, %v1749_v56  ;;  %2051 = vperm.xlu0 %2862, %v3721_v36  }
 0x506   :  { %v1753_v32 = vpop.f32.mrb[84].mxu0 }
 0x507   :  { %v1903_v57 = vmax.f32 %v1749_v56, %v1871_v15  ;;  %v1754_v1 = vadd.f32 %v1753_v32, %v1551_v35  ;;  %v1755_v55 = vpop.f32.mrb[85].mxu0  ;;  %v3727_v35 = vld [vmem:[%s3935_s1 + $0x80] sm:$0xff]  ;;  %v3733_v32 = vld [vmem:[%s3935_s1 + $0x88] sm:$0xff] }
 0x508   :  { %2055 = vperm.xlu1 %2863, %v3727_v35  }
 0x509   :  { %v2775_v20 = vpack.c.bf16 %v1903_v57, %v1902_v43  ;;  %v1872_v53 = vmul.f32 0.01, %v1754_v1  ;;  %2059 = vperm.xlu0 %2862, %v3733_v32   ;;  %v1579_v43 = vpop.permute.xlu1 %1578 }
 0x50a   :  { %v1758_v23 = vpop.f32.mrb[86].mxu0 }
 0x50b   :  { %v1759_v13 = vadd.f32 %v1758_v23, %v1555_v29  ;;  %v1760_v26 = vpop.f32.mrb[87].mxu0  ;;  %2776 = vmatpush1.bf16.msra.mxu1 %v2775_v20  ;;  %v1904_v24 = vmax.f32 %v1754_v1, %v1872_v53  ;;  %v3740_v23 = vld [vmem:[%s3935_s1 + $0x90] sm:$0xff]  ;;  %v3746_v53 = vld [vmem:[%s3935_s1 + $0x98] sm:$0xff] }
 0x50c   :  { %2777 = vmatprep.subr.bf16.mxu1 %v3945_v50  ;;  %2063 = vperm.xlu1 %2863, %v3740_v23  }
 0x50d   :  { %v1873_v60 = vmul.f32 0.01, %v1759_v13  ;;  %2067 = vperm.xlu0 %2862, %v3746_v53  }
 0x50e   :  { %v1763_v49 = vpop.f32.mrb[88].mxu0 }
 0x50f   :  { %v1905_v30 = vmax.f32 %v1759_v13, %v1873_v60  ;;  %v1764_v9 = vadd.f32 %v1763_v49, %v1559_v54  ;;  %v1765_v25 = vpop.f32.mrb[89].mxu0  ;;  %v1583_v13 = vpop.permute.xlu0 %1582 }
 0x510   :  { %v3758_v25 = vld [vmem:[%s3935_s1 + $0xa8] sm:$0xff] }
 0x511   :  { %v2778_v63 = vpack.c.bf16 %v1905_v30, %v1904_v24  ;;  %v1874_v31 = vmul.f32 0.01, %v1764_v9  ;;  %2075 = vperm.xlu0 %2862, %v3758_v25  }
 0x512   :  { %v1768_v46 = vpop.f32.mrb[90].mxu0 }
 0x513   :  { %v1769_v2 = vadd.f32 %v1768_v46, %v1563_v18  ;;  %v1770_v11 = vpop.f32.mrb[91].mxu0  ;;  %2779 = vmatpush1.bf16.msra.mxu1 %v2778_v63  ;;  %v1906_v3 = vmax.f32 %v1764_v9, %v1874_v31  ;;  %v3752_v9 = vld [vmem:[%s3935_s1 + $0xa0] sm:$0xff]  ;;  %v1587_v63 = vpop.permute.xlu1 %1586 }
 0x514   :  { %2780 = vmatprep.subr.bf16.mxu1 %v3945_v50  ;;  %2071 = vperm.xlu1 %2863, %v3752_v9  }
 0x515   :  { %v1875_v62 = vmul.f32 0.01, %v1769_v2 }
 0x516   :  { %v1773_v7 = vpop.f32.mrb[92].mxu0 }
 0x517   :  { %v1907_v45 = vmax.f32 %v1769_v2, %v1875_v62  ;;  %v1774_v22 = vadd.f32 %v1773_v7, %v1567_v10  ;;  %v1775_v61 = vpop.f32.mrb[93].mxu0  ;;  %v3765_v62 = vld [vmem:[%s3935_s1 + $0xb0] sm:$0xff]  ;;  %v3771_v10 = vld [vmem:[%s3935_s1 + $0xb8] sm:$0xff]  ;;  %v1591_v7 = vpop.permute.xlu0 %1590 }
 0x518   :  { %2079 = vperm.xlu1 %2863, %v3765_v62   ;;  %2083 = vperm.xlu0 %2862, %v3771_v10  }
 0x519   :  { %v2781_v33 = vpack.c.bf16 %v1907_v45, %v1906_v3  ;;  %v1876_v42 = vmul.f32 0.01, %v1774_v22 }
 0x51a   :  { %v1778_v14 = vpop.f32.mrb[94].mxu0 }
 0x51b   :  { %v1779_v41 = vadd.f32 %v1778_v14, %v1571_v39  ;;  %v1780_v16 = vpop.f32.mrb[95].mxu0  ;;  %2782 = vmatpush1.bf16.msra.mxu1 %v2781_v33  ;;  %v1908_v34 = vmax.f32 %v1774_v22, %v1876_v42  ;;  %v3777_v14 = vld [vmem:[%s3935_s1 + $0xc0] sm:$0xff]  ;;  %v3783_v42 = vld [vmem:[%s3935_s1 + $0xc8] sm:$0xff] }
 0x51c   :  { %2783 = vmatprep.subr.bf16.mxu1 %v3945_v50  ;;  %2087 = vperm.xlu1 %2863, %v3777_v14  }
 0x51d   :  { %v1877_v5 = vmul.f32 0.01, %v1779_v41  ;;  %2091 = vperm.xlu0 %2862, %v3783_v42  }
 0x51e   :  { %v1783_v19 = vpop.f32.mrb[96].mxu0 }
 0x51f   :  { %v1909_v59 = vmax.f32 %v1779_v41, %v1877_v5  ;;  %v1784_v56 = vadd.f32 %v1783_v19, %v1575_v27  ;;  %v1785_v0 = vpop.f32.mrb[97].mxu0  ;;  %v1595_v41 = vpop.permute.xlu1 %1594 }
 0x520   :  { %v1599_v0 = vpop.permute.xlu0 %1598 }
 0x521   :  { %v2784_v15 = vpack.c.bf16 %v1909_v59, %v1908_v34  ;;  %v1878_v1 = vmul.f32 0.01, %v1784_v56  ;;  %v3790_v59 = vld [vmem:[%s3935_s1 + $0xd0] sm:$0xff] }
 0x522   :  { %v1788_v57 = vpop.f32.mrb[98].mxu0  ;;  %2095 = vperm.xlu1 %2863, %v3790_v59  }
 0x523   :  { %v1789_v55 = vadd.f32 %v1788_v57, %v1579_v43  ;;  %v1790_v20 = vpop.f32.mrb[99].mxu0  ;;  %2785 = vmatpush1.bf16.msra.mxu1 %v2784_v15  ;;  %v1910_v60 = vmax.f32 %v1784_v56, %v1878_v1  ;;  %v3796_v56 = vld [vmem:[%s3935_s1 + $0xd8] sm:$0xff] }
 0x524   :  { %2786 = vmatprep.subr.bf16.mxu1 %v3945_v50  ;;  %2099 = vperm.xlu0 %2862, %v3796_v56  }
 0x525   :  { %v1879_v29 = vmul.f32 0.01, %v1789_v55 }
 0x526   :  { %v1793_v26 = vpop.f32.mrb[100].mxu0 }
 0x527   :  { %v1911_v54 = vmax.f32 %v1789_v55, %v1879_v29  ;;  %v1794_v49 = vadd.f32 %v1793_v26, %v1583_v13  ;;  %v1795_v24 = vpop.f32.mrb[101].mxu0  ;;  %v3802_v29 = vld [vmem:[%s3935_s1 + $0xe0] sm:$0xff]  ;;  %v3808_v13 = vld [vmem:[%s3935_s1 + $0xe8] sm:$0xff]  ;;  %v1603_v26 = vpop.permute.xlu1 %1602 }
 0x528   :  { %2103 = vperm.xlu1 %2863, %v3802_v29   ;;  %2107 = vperm.xlu0 %2862, %v3808_v13  }
 0x529   :  { %v2787_v30 = vpack.c.bf16 %v1911_v54, %v1910_v60  ;;  %v1880_v46 = vmul.f32 0.01, %v1794_v49 }
 0x52a   :  { %v1798_v18 = vpop.f32.mrb[102].mxu0 }
 0x52b   :  { %v1799_v31 = vadd.f32 %v1798_v18, %v1587_v63  ;;  %v1800_v2 = vpop.f32.mrb[103].mxu0  ;;  %2788 = vmatpush1.bf16.msra.mxu1 %v2787_v30  ;;  %v1912_v45 = vmax.f32 %v1794_v49, %v1880_v46  ;;  %v1607_v63 = vpop.permute.xlu0 %1606 }
 0x52c   :  { %2789 = vmatprep.subr.bf16.mxu1 %v3945_v50 }
 0x52d   :  { %v1881_v11 = vmul.f32 0.01, %v1799_v31 }
 0x52e   :  { %v1803_v3 = vpop.f32.mrb[104].mxu0 }
 0x52f   :  { %v1913_v22 = vmax.f32 %v1799_v31, %v1881_v11  ;;  %v1804_v61 = vadd.f32 %v1803_v3, %v1591_v7  ;;  %v1805_v33 = vpop.f32.mrb[105].mxu0  ;;  %v2967_v7 = vmov 6  }
 0x530   :  { %2864 = vset.pattern.permute.xlu1 %v2967_v7  ;;  %2865 = vset.pattern.permute.xlu0 %v2967_v7 }
 0x531   :  { %v2790_v39 = vpack.c.bf16 %v1913_v22, %v1912_v45  ;;  %v1882_v5 = vmul.f32 0.01, %v1804_v61  ;;  %2409 = vperm.xlu1 %2864, %v3633_v52   ;;  %2413 = vperm.xlu0 %2865, %v3627_v47   ;;  %v1611_v45 = vpop.permute.xlu1 %1610 }
 0x532   :  { %v1808_v16 = vpop.f32.mrb[106].mxu0 }
 0x533   :  { %v1809_v27 = vadd.f32 %v1808_v16, %v1595_v41  ;;  %v1810_v19 = vpop.f32.mrb[107].mxu0  ;;  %2791 = vmatpush1.bf16.msra.mxu1 %v2790_v39  ;;  %v1914_v43 = vmax.f32 %v1804_v61, %v1882_v5  ;;  %v1615_v16 = vpop.permute.xlu0 %1614 }
 0x534   :  { %2792 = vmatprep.subr.bf16.mxu1 %v3945_v50 }
 0x535   :  { %v1883_v34 = vmul.f32 0.01, %v1809_v27  ;;  %2417 = vperm.xlu1 %2864, %v3640_v8   ;;  %2425 = vperm.xlu0 %2865, %v3652_v58  }
 0x536   :  { %v1813_v15 = vpop.f32.mrb[108].mxu0 }
 0x537   :  { %v1915_v57 = vmax.f32 %v1809_v27, %v1883_v34  ;;  %v1814_v1 = vadd.f32 %v1813_v15, %v1599_v0  ;;  %v1815_v55 = vpop.f32.mrb[109].mxu0  ;;  %v1619_v0 = vpop.permute.xlu1 %1618 }
 0x538   :  { %v1623_v58 = vpop.permute.xlu0 %1622 }
 0x539   :  { %v2793_v20 = vpack.c.bf16 %v1915_v57, %v1914_v43  ;;  %v1884_v54 = vmul.f32 0.01, %v1814_v1  ;;  %2421 = vperm.xlu1 %2864, %v3646_v44   ;;  %2433 = vperm.xlu0 %2865, %v3665_v12  }
 0x53a   :  { %v1818_v60 = vpop.f32.mrb[110].mxu0 }
 0x53b   :  { %v1819_v49 = vadd.f32 %v1818_v60, %v1603_v26  ;;  %v1820_v24 = vpop.f32.mrb[111].mxu0  ;;  %2794 = vmatpush1.bf16.msra.mxu1 %v2793_v20  ;;  %v1916_v46 = vmax.f32 %v1814_v1, %v1884_v54  ;;  %v1627_v54 = vpop.permute.xlu1 %1626 }
 0x53c   :  { %2795 = vmatprep.subr.bf16.mxu1 %v3945_v50 }
 0x53d   :  { %v1885_v30 = vmul.f32 0.01, %v1819_v49  ;;  %2429 = vperm.xlu1 %2864, %v3658_v28   ;;  %2441 = vperm.xlu0 %2865, %v3677_v40   ;;  %v1631_v40 = vpop.permute.xlu0 %1630 }
 0x53e   :  { %v1823_v18 = vpop.f32.mrb[112].mxu0 }
 0x53f   :  { %v1917_v31 = vmax.f32 %v1819_v49, %v1885_v30  ;;  %v1824_v2 = vadd.f32 %v1823_v18, %v1607_v63  ;;  %v1825_v11 = vpop.f32.mrb[113].mxu0 }
 0x540   :  { %v1635_v11 = vpop.permute.xlu1 %1634 }
 0x541   :  { %v2796_v3 = vpack.c.bf16 %v1917_v31, %v1916_v46  ;;  %v1886_v61 = vmul.f32 0.01, %v1824_v2  ;;  %2437 = vperm.xlu1 %2864, %v3671_v21   ;;  %2449 = vperm.xlu0 %2865, %v3690_v4  }
 0x542   :  { %v1828_v22 = vpop.f32.mrb[114].mxu0 }
 0x543   :  { %v1829_v33 = vadd.f32 %v1828_v22, %v1611_v45  ;;  %v1830_v39 = vpop.f32.mrb[115].mxu0  ;;  %2797 = vmatpush1.bf16.msra.mxu1 %v2796_v3  ;;  %v1918_v27 = vmax.f32 %v1824_v2, %v1886_v61 }
 0x544   :  { %2798 = vmatprep.subr.bf16.mxu1 %v3945_v50  ;;  %v1929_v39 = vld [vmem:[#allocation2 + $0x78] sm:$0xff] }
 0x545   :  { %v1887_v41 = vmul.f32 0.01, %v1829_v33  ;;  %2445 = vperm.xlu1 %2864, %v3683_v37   ;;  %2457 = vperm.xlu0 %2865, %v3702_v48  }
 0x546   :  { %v1833_v5 = vpop.f32.mrb[116].mxu0 }
 0x547   :  { %v1919_v52 = vmax.f32 %v1829_v33, %v1887_v41  ;;  %v1834_v19 = vadd.f32 %v1833_v5, %v1615_v16  ;;  %v1835_v47 = vpop.f32.mrb[117].mxu0  ;;  %v1945_v41 = vld [vmem:[#allocation2 + $0x278] sm:$0xff]  ;;  %v1944_v16 = vld [vmem:[#allocation2 + $0x270] sm:$0xff] }
 0x548   :  { %v1947_v5 = vld [vmem:[#allocation2 + $0x2b8] sm:$0xff] }
 0x549   :  { %v2799_v34 = vpack.c.bf16 %v1919_v52, %v1918_v27  ;;  %v1888_v43 = vmul.f32 0.01, %v1834_v19  ;;  %2453 = vperm.xlu1 %2864, %v3696_v38   ;;  %2465 = vperm.xlu0 %2865, %v3715_v6   ;;  %v1926_v6 = vld [vmem:[#allocation2 + $0x30] sm:$0xff]  ;;  %v1949_v52 = vld [vmem:[#allocation2 + $0x2f8] sm:$0xff] }
 0x54a   :  { %v1838_v15 = vpop.f32.mrb[118].mxu0  ;;  %v1946_v27 = vld [vmem:[#allocation2 + $0x2b0] sm:$0xff]  ;;  %v1951_v47 = vld [vmem:[#allocation2 + $0x338] sm:$0xff] }
 0x54b   :  { %v1839_v57 = vadd.f32 %v1838_v15, %v1619_v0  ;;  %v1840_v1 = vpop.f32.mrb[119].mxu0  ;;  %2800 = vmatpush1.bf16.msra.mxu1 %v2799_v34  ;;  %v1920_v20 = vmax.f32 %v1834_v19, %v1888_v43  ;;  %v1948_v19 = vld [vmem:[#allocation2 + $0x2f0] sm:$0xff]  ;;  %v1955_v0 = vld [vmem:[#allocation2 + $0x3b8] sm:$0xff] }
 0x54c   :  { %2801 = vmatprep.subr.bf16.mxu1 %v3945_v50  ;;  %v1952_v34 = vld [vmem:[#allocation2 + $0x370] sm:$0xff]  ;;  %v1957_v43 = vld [vmem:[#allocation2 + $0x3f8] sm:$0xff] }
 0x54d   :  { %v1889_v8 = vmul.f32 0.01, %v1839_v57  ;;  %2461 = vperm.xlu1 %2864, %v3708_v51   ;;  %2473 = vperm.xlu0 %2865, %v3727_v35   ;;  %v1931_v51 = vld [vmem:[#allocation2 + $0xb8] sm:$0xff]  ;;  %v1954_v15 = vld [vmem:[#allocation2 + $0x3b0] sm:$0xff] }
 0x54e   :  { %v1843_v55 = vpop.f32.mrb[120].mxu0  ;;  %v1933_v35 = vld [vmem:[#allocation2 + $0xf8] sm:$0xff] }
 0x54f   :  { %v1921_v44 = vmax.f32 %v1839_v57, %v1889_v8  ;;  %v1844_v26 = vadd.f32 %v1843_v55, %v1623_v58  ;;  %v1845_v60 = vpop.f32.mrb[121].mxu0  ;;  %v1956_v57 = vld [vmem:[#allocation2 + $0x3f0] sm:$0xff]  ;;  %v1959_v1 = vld [vmem:[#allocation2 + $0x438] sm:$0xff] }
 0x550   :  { %v1958_v8 = vld [vmem:[#allocation2 + $0x430] sm:$0xff]  ;;  %v1961_v58 = vld [vmem:[#allocation2 + $0x478] sm:$0xff] }
 0x551   :  { %v2802_v12 = vpack.c.bf16 %v1921_v44, %v1920_v20  ;;  %v1890_v24 = vmul.f32 0.01, %v1844_v26  ;;  %2469 = vperm.xlu1 %2864, %v3721_v36   ;;  %2481 = vperm.xlu0 %2865, %v3740_v23   ;;  %v1930_v36 = vld [vmem:[#allocation2 + $0xb0] sm:$0xff]  ;;  %v1935_v23 = vld [vmem:[#allocation2 + $0x138] sm:$0xff] }
 0x552   :  { %v1848_v49 = vpop.f32.mrb[122].mxu0  ;;  %v1960_v55 = vld [vmem:[#allocation2 + $0x470] sm:$0xff]  ;;  %v1963_v20 = vld [vmem:[#allocation2 + $0x4b8] sm:$0xff] }
 0x553   :  { %v1849_v30 = vadd.f32 %v1848_v49, %v1627_v54  ;;  %v1850_v63 = vpop.f32.mrb[123].mxu0  ;;  %2803 = vmatpush1.bf16.msra.mxu1 %v2802_v12  ;;  %v1922_v46 = vmax.f32 %v1844_v26, %v1890_v24  ;;  %v1962_v44 = vld [vmem:[#allocation2 + $0x4b0] sm:$0xff]  ;;  %v1965_v26 = vld [vmem:[#allocation2 + $0x4f8] sm:$0xff] }
 0x554   :  { %2804 = vmatprep.subr.bf16.mxu1 %v3945_v50  ;;  %v1964_v60 = vld [vmem:[#allocation2 + $0x4f0] sm:$0xff]  ;;  %v1967_v12 = vld [vmem:[#allocation2 + $0x538] sm:$0xff] }
 0x555   :  { %v1891_v28 = vmul.f32 0.01, %v1849_v30  ;;  %2477 = vperm.xlu1 %2864, %v3733_v32   ;;  %2489 = vperm.xlu0 %2865, %v3752_v9   ;;  %v1932_v32 = vld [vmem:[#allocation2 + $0xf0] sm:$0xff]  ;;  %v1937_v9 = vld [vmem:[#allocation2 + $0x178] sm:$0xff] }
 0x556   :  { %v1853_v18 = vpop.f32.mrb[124].mxu0  ;;  %v1966_v54 = vld [vmem:[#allocation2 + $0x530] sm:$0xff]  ;;  %v1969_v49 = vld [vmem:[#allocation2 + $0x578] sm:$0xff] }
 0x557   :  { %v1923_v21 = vmax.f32 %v1849_v30, %v1891_v28  ;;  %v1854_v31 = vadd.f32 %v1853_v18, %v1631_v40  ;;  %v1855_v2 = vpop.f32.mrb[125].mxu0  ;;  %v1968_v24 = vld [vmem:[#allocation2 + $0x570] sm:$0xff]  ;;  %v1971_v30 = vld [vmem:[#allocation2 + $0x5b8] sm:$0xff] }
 0x558   :  { %v1970_v63 = vld [vmem:[#allocation2 + $0x5b0] sm:$0xff]  ;;  %v1973_v28 = vld [vmem:[#allocation2 + $0x5f8] sm:$0xff] }
 0x559   :  { %v2805_v4 = vpack.c.bf16 %v1923_v21, %v1922_v46  ;;  %v1892_v45 = vmul.f32 0.01, %v1854_v31  ;;  %2485 = vperm.xlu1 %2864, %v3746_v53   ;;  %2497 = vperm.xlu0 %2865, %v3765_v62   ;;  %v1934_v53 = vld [vmem:[#allocation2 + $0x130] sm:$0xff]  ;;  %v1939_v62 = vld [vmem:[#allocation2 + $0x1b8] sm:$0xff] }
 0x55a   :  { %v1858_v3 = vpop.f32.mrb[126].mxu0  ;;  %v1972_v40 = vld [vmem:[#allocation2 + $0x5f0] sm:$0xff]  ;;  %v1975_v18 = vld [vmem:[#allocation2 + $0x638] sm:$0xff] }
 0x55b   :  { %v1859_v22 = vadd.f32 %v1858_v3, %v1635_v11  ;;  %v1860_v61 = vpop.f32.mrb[127].mxu0  ;;  %2806 = vmatpush1.bf16.msra.mxu1 %v2805_v4  ;;  %v1924_v48 = vmax.f32 %v1854_v31, %v1892_v45  ;;  %v1974_v46 = vld [vmem:[#allocation2 + $0x630] sm:$0xff]  ;;  %v1977_v21 = vld [vmem:[#allocation2 + $0x678] sm:$0xff]  ;;  %v2968_v11 = vmov 7   ;;  %v2407_v3 = vld [vmem:[%s3935_s1] sm:$0x1] }
 0x55c   :  { %2807 = vmatprep.subr.bf16.mxu1 %v3945_v50  ;;  %v1928_v50 = vld [vmem:[#allocation2 + $0x70] sm:$0xff]  ;;  %v1979_v2 = vld [vmem:[#allocation2 + $0x6b8] sm:$0xff] }
 0x55d   :  { %v1893_v37 = vmul.f32 0.01, %v1859_v22  ;;  %2493 = vperm.xlu1 %2864, %v3758_v25   ;;  %2505 = vperm.xlu0 %2865, %v3777_v14   ;;  %v1936_v25 = vld [vmem:[#allocation2 + $0x170] sm:$0xff]  ;;  %v1981_v45 = vld [vmem:[#allocation2 + $0x6f8] sm:$0xff] }
 0x55e   :  { %v1938_v14 = vld [vmem:[#allocation2 + $0x1b0] sm:$0xff]  ;;  %v1983_v61 = vld [vmem:[#allocation2 + $0x738] sm:$0xff] }
 0x55f   :  { %v1925_v33 = vmax.f32 %v1859_v22, %v1893_v37  ;;  %v1976_v31 = vld [vmem:[#allocation2 + $0x670] sm:$0xff] }
 0x560   :  { %v1978_v4 = vld [vmem:[#allocation2 + $0x6b0] sm:$0xff] }
 0x561   :  { %v2808_v38 = vpack.c.bf16 %v1925_v33, %v1924_v48  ;;  %2501 = vperm.xlu1 %2864, %v3771_v10   ;;  %2513 = vperm.xlu0 %2865, %v3790_v59   ;;  %v2931_v10 = vld [vmem:[%s3935_s1 + $0xf0] sm:$0xff]  ;;  %v1941_v59 = vld [vmem:[#allocation2 + $0x1f8] sm:$0xff] }
 0x562   :  { %v1980_v22 = vld [vmem:[#allocation2 + $0x6f0] sm:$0xff]  ;;  %v1985_v48 = vld [vmem:[#allocation2 + $0x778] sm:$0xff] }
 0x563   :  { %2809 = vmatpush1.bf16.msra.mxu1 %v2808_v38  ;;  %v1982_v37 = vld [vmem:[#allocation2 + $0x730] sm:$0xff]  ;;  %v1987_v38 = vld [vmem:[#allocation2 + $0x7b8] sm:$0xff] }
 0x564   :  { %v1984_v33 = vld [vmem:[#allocation2 + $0x770] sm:$0xff] }
 0x565   :  { %2509 = vperm.xlu1 %2864, %v3783_v42   ;;  %2517 = vperm.xlu0 %2865, %v3796_v56   ;;  %v2932_v42 = vld [vmem:[%s3935_s1 + $0xf8] sm:$0xff] }
 0x566   :  { %2183 = vmatmul.mubr.f32.vlgmr.msra.gmra.mrb[64].mxu1 %v1926_v6  ;;  %v1943_v56 = vld [vmem:[#allocation2 + $0x238] sm:$0xff]  ;;  %v1986_v6 = vld [vmem:[#allocation2 + $0x7b0] sm:$0xff] }
 0x567   :  { %2187 = vmatprep.mubr.f32.mxu1 %v1929_v39  ;;  %v1989_v39 = vld [vmem:[#allocation2 + $0x7f8] sm:$0xff] }
 0x569   :  { %2866 = vset.pattern.permute.xlu1 %v2966_v17  ;;  %2521 = vperm.xlu0 %2865, %v3802_v29   ;;  %v1940_v17 = vld [vmem:[#allocation2 + $0x1f0] sm:$0xff] }
 0x56a   :  { %2188 = vmatmul.mubr.f32.gmra.mrb[66].mxu1 %v1928_v50  ;;  %2111 = vperm.xlu1 %2866, %v2931_v10   ;;  %v1942_v29 = vld [vmem:[#allocation2 + $0x230] sm:$0xff] }
 0x56b   :  { %2192 = vmatprep.mubr.f32.mxu1 %v1931_v51  ;;  %v1988_v50 = vld [vmem:[#allocation2 + $0x7f0] sm:$0xff]  ;;  %v1996_v51 = vpop.permute.xlu1 %1995 }
 0x56d   :  { %2529 = vperm.xlu0 %2865, %v2931_v10  }
 0x56e   :  { %2193 = vmatmul.mubr.f32.gmra.mrb[68].mxu1 %v1930_v36  ;;  %2115 = vperm.xlu1 %2866, %v2932_v42   ;;  %v1992_v36 = vpop.permute.xlu0 %1991 }
 0x56f   :  { %2197 = vmatprep.mubr.f32.mxu1 %v1933_v35  ;;  %v2000_v35 = vpop.permute.xlu1 %1999 }
 0x571   :  { %2868 = vset.pattern.permute.xlu0 %v2968_v11 }
 0x572   :  { %2198 = vmatmul.mubr.f32.gmra.mrb[70].mxu1 %v1932_v32  ;;  %2867 = vset.pattern.permute.xlu1 %v2967_v7  ;;  %v1950_v7 = vld [vmem:[#allocation2 + $0x330] sm:$0xff]  ;;  %v2004_v32 = vpop.permute.xlu0 %2003 }
 0x573   :  { %2202 = vmatprep.mubr.f32.mxu1 %v1935_v23  ;;  %2525 = vperm.xlu1 %2867, %v3808_v13   ;;  %v1953_v13 = vld [vmem:[#allocation2 + $0x378] sm:$0xff]  ;;  %v2008_v23 = vpop.permute.xlu1 %2007 }
 0x574   :  { %2607 = vperm.xlu0 %2868, %v2407_v3  }
 0x576   :  { %2203 = vmatmul.mubr.f32.gmra.mrb[72].mxu1 %v1934_v53  ;;  %v2012_v53 = vpop.permute.xlu0 %2011 }
 0x577   :  { %2207 = vmatprep.mubr.f32.mxu1 %v1937_v9  ;;  %2533 = vperm.xlu1 %2867, %v2932_v42   ;;  %v3859_v9 = vpop.permute.xlu1 %2015 }
 0x57a   :  { %2208 = vmatmul.mubr.f32.gmra.mrb[74].mxu1 %v1936_v25  ;;  %v3861_v25 = vpop.permute.xlu0 %2019 }
 0x57b   :  { %2212 = vmatprep.mubr.f32.mxu1 %v1939_v62  ;;  %v3863_v62 = vpop.permute.xlu1 %2023 }
 0x57e   :  { %2213 = vmatmul.mubr.f32.gmra.mrb[76].mxu1 %v1938_v14  ;;  %v3865_v10 = vpop.permute.xlu0 %2027 }
 0x57f   :  { %2217 = vmatprep.mubr.f32.mxu1 %v1941_v59  ;;  %v3867_v14 = vpop.permute.xlu1 %2031 }
 0x582   :  { %2218 = vmatmul.mubr.f32.gmra.mrb[78].mxu1 %v1940_v17  ;;  %v3869_v59 = vpop.permute.xlu0 %2035 }
 0x583   :  { %2222 = vmatprep.mubr.f32.mxu1 %v1943_v56  ;;  %v3871_v42 = vpop.permute.xlu1 %2039 }
 0x586   :  { %2223 = vmatmul.mubr.f32.gmra.mrb[80].mxu1 %v1942_v29  ;;  %v3873_v17 = vpop.permute.xlu0 %2043 }
 0x587   :  { %2227 = vmatprep.mubr.f32.mxu1 %v1945_v41  ;;  %v3875_v56 = vpop.permute.xlu1 %2047 }
 0x58a   :  { %2228 = vmatmul.mubr.f32.gmra.mrb[82].mxu1 %v1944_v16  ;;  %v3877_v29 = vpop.permute.xlu0 %2051 }
 0x58b   :  { %2232 = vmatprep.mubr.f32.mxu1 %v1947_v5  ;;  %v3879_v41 = vpop.permute.xlu1 %2055 }
 0x58e   :  { %2233 = vmatmul.mubr.f32.gmra.mrb[84].mxu1 %v1946_v27  ;;  %v3881_v16 = vpop.permute.xlu0 %2059 }
 0x58f   :  { %2237 = vmatprep.mubr.f32.mxu1 %v1949_v52  ;;  %v3883_v5 = vpop.permute.xlu1 %2063 }
 0x592   :  { %2238 = vmatmul.mubr.f32.gmra.mrb[86].mxu1 %v1948_v19  ;;  %v3885_v27 = vpop.permute.xlu0 %2067 }
 0x593   :  { %2242 = vmatprep.mubr.f32.mxu1 %v1951_v47  ;;  %v3887_v52 = vpop.permute.xlu1 %2071 }
 0x596   :  { %2243 = vmatmul.mubr.f32.gmra.mrb[88].mxu1 %v1950_v7  ;;  %v3889_v19 = vpop.permute.xlu0 %2075 }
 0x597   :  { %2247 = vmatprep.mubr.f32.mxu1 %v1953_v13  ;;  %v3891_v47 = vpop.permute.xlu1 %2079 }
 0x59a   :  { %2248 = vmatmul.mubr.f32.gmra.mrb[90].mxu1 %v1952_v34  ;;  %v3893_v7 = vpop.permute.xlu0 %2083 }
 0x59b   :  { %2252 = vmatprep.mubr.f32.mxu1 %v1955_v0  ;;  %v3895_v13 = vpop.permute.xlu1 %2087 }
 0x59e   :  { %2253 = vmatmul.mubr.f32.gmra.mrb[92].mxu1 %v1954_v15  ;;  %v3897_v34 = vpop.permute.xlu0 %2091 }
 0x59f   :  { %2257 = vmatprep.mubr.f32.mxu1 %v1957_v43 }
 0x5a1   :  { %v3899_v0 = vpop.permute.xlu1 %2095 }
 0x5a2   :  { %2258 = vmatmul.mubr.f32.gmra.mrb[94].mxu1 %v1956_v57 }
 0x5a3   :  { %2262 = vmatprep.mubr.f32.mxu1 %v1959_v1  ;;  %v3901_v15 = vpop.permute.xlu0 %2099 }
 0x5a6   :  { %2263 = vmatmul.mubr.f32.gmra.mrb[96].mxu1 %v1958_v8 }
 0x5a7   :  { %2267 = vmatprep.mubr.f32.mxu1 %v1961_v58  ;;  %v3903_v58 = vpop.permute.xlu1 %2103 }
 0x5aa   :  { %2268 = vmatmul.mubr.f32.gmra.mrb[98].mxu1 %v1960_v55 }
 0x5ab   :  { %2272 = vmatprep.mubr.f32.mxu1 %v1963_v20  ;;  %v3905_v20 = vpop.permute.xlu0 %2107 }
 0x5ae   :  { %2273 = vmatmul.mubr.f32.gmra.mrb[100].mxu1 %v1962_v44 }
 0x5af   :  { %2277 = vmatprep.mubr.f32.mxu1 %v1965_v26 }
 0x5b2   :  { %2278 = vmatmul.mubr.f32.gmra.mrb[102].mxu1 %v1964_v60 }
 0x5b3   :  { %2282 = vmatprep.mubr.f32.mxu1 %v1967_v12 }
 0x5b6   :  { %2283 = vmatmul.mubr.f32.gmra.mrb[104].mxu1 %v1966_v54 }
 0x5b7   :  { %2287 = vmatprep.mubr.f32.mxu1 %v1969_v49  ;;  %v2410_v49 = vpop.permute.xlu1 %2409 }
 0x5ba   :  { %2288 = vmatmul.mubr.f32.gmra.mrb[106].mxu1 %v1968_v24 }
 0x5bb   :  { %2292 = vmatprep.mubr.f32.mxu1 %v1971_v30 }
 0x5be   :  { %2293 = vmatmul.mubr.f32.gmra.mrb[108].mxu1 %v1970_v63 }
 0x5bf   :  { %2297 = vmatprep.mubr.f32.mxu1 %v1973_v28  ;;  %v2414_v28 = vpop.permute.xlu0 %2413 }
 0x5c2   :  { %2298 = vmatmul.mubr.f32.gmra.mrb[110].mxu1 %v1972_v40 }
 0x5c3   :  { %2302 = vmatprep.mubr.f32.mxu1 %v1975_v18 }
 0x5c6   :  { %2303 = vmatmul.mubr.f32.gmra.mrb[112].mxu1 %v1974_v46 }
 0x5c7   :  { %2307 = vmatprep.mubr.f32.mxu1 %v1977_v21 }
 0x5ca   :  { %2308 = vmatmul.mubr.f32.gmra.mrb[114].mxu1 %v1976_v31  ;;  %v2418_v31 = vpop.permute.xlu1 %2417 }
 0x5cb   :  { %2312 = vmatprep.mubr.f32.mxu1 %v1979_v2 }
 0x5ce   :  { %2313 = vmatmul.mubr.f32.gmra.mrb[116].mxu1 %v1978_v4 }
 0x5cf   :  { %2317 = vmatprep.mubr.f32.mxu1 %v1981_v45 }
 0x5d2   :  { %2318 = vmatmul.mubr.f32.gmra.mrb[118].mxu1 %v1980_v22 }
 0x5d3   :  { %2322 = vmatprep.mubr.f32.mxu1 %v1983_v61 }
 0x5d6   :  { %2323 = vmatmul.mubr.f32.gmra.mrb[120].mxu1 %v1982_v37 }
 0x5d7   :  { %2327 = vmatprep.mubr.f32.mxu1 %v1985_v48 }
 0x5da   :  { %2328 = vmatmul.mubr.f32.gmra.mrb[122].mxu1 %v1984_v33 }
 0x5db   :  { %2332 = vmatprep.mubr.f32.mxu1 %v1987_v38 }
 0x5de   :  { %2333 = vmatmul.mubr.f32.gmra.mrb[124].mxu1 %v1986_v6  ;;  %v2422_v6 = vpop.permute.xlu1 %2421 }
 0x5df   :  { %2337 = vmatprep.mubr.f32.mxu1 %v1989_v39 }
 0x5e2   :  { %2338 = vmatmul.mubr.f32.gmra.mrb[126].mxu1 %v1988_v50 }
 0x639   :  { %v2184_v43 = vpop.f32.mrb[64].mxu1 }
 0x63a   :  { %v2185_v57 = vadd.f32 %v2184_v43, %v1992_v36  ;;  %v2186_v1 = vpop.f32.mrb[65].mxu1 }
 0x63b   :  { %v2426_v1 = vpop.permute.xlu0 %2425 }
 0x63c   :  { %v2343_v8 = vmul.f32 0.01, %v2185_v57 }
 0x63d   :  { %v2189_v55 = vpop.f32.mrb[66].mxu1 }
 0x63e   :  { %v2190_v44 = vadd.f32 %v2189_v55, %v1996_v51  ;;  %v2191_v26 = vpop.f32.mrb[67].mxu1  ;;  %v2375_v12 = vmax.f32 %v2185_v57, %v2343_v8 }
 0x640   :  { %v2344_v60 = vmul.f32 0.01, %v2190_v44  ;;  %v2536_v18 = vmul.f32 %v2410_v49, %v2375_v12 }
 0x641   :  { %v2194_v54 = vpop.f32.mrb[68].mxu1 }
 0x642   :  { %v2195_v24 = vadd.f32 %v2194_v54, %v2000_v35  ;;  %v2376_v30 = vmax.f32 %v2190_v44, %v2344_v60  ;;  %v2196_v63 = vpop.f32.mrb[69].mxu1 }
 0x644   :  { %v2345_v40 = vmul.f32 0.01, %v2195_v24  ;;  %v2537_v46 = vmul.f32 %v2414_v28, %v2376_v30 }
 0x645   :  { %v2199_v21 = vpop.f32.mrb[70].mxu1 }
 0x646   :  { %v2568_v2 = vadd.f32 %v2537_v46, %v2536_v18  ;;  %v2200_v4 = vadd.f32 %v2199_v21, %v2004_v32  ;;  %v2377_v11 = vmax.f32 %v2195_v24, %v2345_v40  ;;  %v2201_v3 = vpop.f32.mrb[71].mxu1 }
 0x648   :  { %v2346_v45 = vmul.f32 0.01, %v2200_v4  ;;  %v2538_v22 = vmul.f32 %v2418_v31, %v2377_v11 }
 0x649   :  { %v2204_v61 = vpop.f32.mrb[72].mxu1 }
 0x64a   :  { %v2569_v37 = vadd.f32 %v2568_v2, %v2538_v22  ;;  %v2205_v48 = vadd.f32 %v2204_v61, %v2008_v23  ;;  %v2378_v33 = vmax.f32 %v2200_v4, %v2346_v45  ;;  %v2206_v38 = vpop.f32.mrb[73].mxu1  ;;  %v2430_v23 = vpop.permute.xlu1 %2429 }
 0x64c   :  { %v2347_v39 = vmul.f32 0.01, %v2205_v48  ;;  %v2539_v50 = vmul.f32 %v2422_v6, %v2378_v33 }
 0x64d   :  { %v2209_v51 = vpop.f32.mrb[74].mxu1 }
 0x64e   :  { %v2379_v36 = vmax.f32 %v2205_v48, %v2347_v39  ;;  %v2570_v35 = vadd.f32 %v2569_v37, %v2539_v50  ;;  %v2210_v43 = vadd.f32 %v2209_v51, %v2012_v53  ;;  %v2211_v57 = vpop.f32.mrb[75].mxu1  ;;  %v2434_v53 = vpop.permute.xlu0 %2433 }
 0x64f   :  { %v2438_v11 = vpop.permute.xlu1 %2437 }
 0x650   :  { %v2540_v8 = vmul.f32 %v2426_v1, %v2379_v36  ;;  %v2348_v32 = vmul.f32 0.01, %v2210_v43 }
 0x651   :  { %v2214_v55 = vpop.f32.mrb[76].mxu1 }
 0x652   :  { %v2215_v44 = vadd.f32 %v2214_v55, %v3859_v9  ;;  %v2380_v26 = vmax.f32 %v2210_v43, %v2348_v32  ;;  %v2571_v60 = vadd.f32 %v2570_v35, %v2540_v8  ;;  %v2216_v12 = vpop.f32.mrb[77].mxu1 }
 0x654   :  { %v2349_v54 = vmul.f32 0.01, %v2215_v44  ;;  %v2541_v49 = vmul.f32 %v2430_v23, %v2380_v26 }
 0x655   :  { %v2219_v24 = vpop.f32.mrb[78].mxu1 }
 0x656   :  { %v2381_v30 = vmax.f32 %v2215_v44, %v2349_v54  ;;  %v2572_v63 = vadd.f32 %v2571_v60, %v2541_v49  ;;  %v2220_v28 = vadd.f32 %v2219_v24, %v3861_v25  ;;  %v2221_v40 = vpop.f32.mrb[79].mxu1  ;;  %v2442_v25 = vpop.permute.xlu0 %2441 }
 0x658   :  { %v2542_v18 = vmul.f32 %v2434_v53, %v2381_v30  ;;  %v2350_v46 = vmul.f32 0.01, %v2220_v28 }
 0x659   :  { %v2224_v21 = vpop.f32.mrb[80].mxu1 }
 0x65a   :  { %v2382_v31 = vmax.f32 %v2220_v28, %v2350_v46  ;;  %v2573_v2 = vadd.f32 %v2572_v63, %v2542_v18  ;;  %v2225_v9 = vadd.f32 %v2224_v21, %v3863_v62  ;;  %v2226_v4 = vpop.f32.mrb[81].mxu1  ;;  %v2446_v62 = vpop.permute.xlu1 %2445 }
 0x65c   :  { %v2543_v3 = vmul.f32 %v2438_v11, %v2382_v31  ;;  %v2351_v45 = vmul.f32 0.01, %v2225_v9 }
 0x65d   :  { %v2229_v22 = vpop.f32.mrb[82].mxu1 }
 0x65e   :  { %v2574_v61 = vadd.f32 %v2573_v2, %v2543_v3  ;;  %v2383_v37 = vmax.f32 %v2225_v9, %v2351_v45  ;;  %v2230_v48 = vadd.f32 %v2229_v22, %v3865_v10  ;;  %v2231_v33 = vpop.f32.mrb[83].mxu1  ;;  %v2450_v10 = vpop.permute.xlu0 %2449 }
 0x660   :  { %v2544_v38 = vmul.f32 %v2442_v25, %v2383_v37  ;;  %v2352_v6 = vmul.f32 0.01, %v2230_v48 }
 0x661   :  { %v2234_v39 = vpop.f32.mrb[84].mxu1 }
 0x662   :  { %v2575_v50 = vadd.f32 %v2574_v61, %v2544_v38  ;;  %v2384_v51 = vmax.f32 %v2230_v48, %v2352_v6  ;;  %v2235_v36 = vadd.f32 %v2234_v39, %v3867_v14  ;;  %v2236_v35 = vpop.f32.mrb[85].mxu1  ;;  %v2454_v14 = vpop.permute.xlu1 %2453 }
 0x664   :  { %v2545_v43 = vmul.f32 %v2446_v62, %v2384_v51  ;;  %v2353_v57 = vmul.f32 0.01, %v2235_v36 }
 0x665   :  { %v2239_v1 = vpop.f32.mrb[86].mxu1 }
 0x666   :  { %v2576_v8 = vadd.f32 %v2575_v50, %v2545_v43  ;;  %v2385_v32 = vmax.f32 %v2235_v36, %v2353_v57  ;;  %v2240_v55 = vadd.f32 %v2239_v1, %v3869_v59  ;;  %v2241_v44 = vpop.f32.mrb[87].mxu1  ;;  %v2458_v59 = vpop.permute.xlu0 %2457 }
 0x668   :  { %v2546_v26 = vmul.f32 %v2450_v10, %v2385_v32  ;;  %v2354_v60 = vmul.f32 0.01, %v2240_v55 }
 0x669   :  { %v2244_v12 = vpop.f32.mrb[88].mxu1 }
 0x66a   :  { %v2577_v23 = vadd.f32 %v2576_v8, %v2546_v26  ;;  %v2386_v54 = vmax.f32 %v2240_v55, %v2354_v60  ;;  %v2245_v49 = vadd.f32 %v2244_v12, %v3871_v42  ;;  %v2246_v24 = vpop.f32.mrb[89].mxu1  ;;  %v2462_v42 = vpop.permute.xlu1 %2461 }
 0x66c   :  { %v2547_v30 = vmul.f32 %v2454_v14, %v2386_v54  ;;  %v2355_v63 = vmul.f32 0.01, %v2245_v49 }
 0x66d   :  { %v2249_v28 = vpop.f32.mrb[90].mxu1 }
 0x66e   :  { %v2578_v40 = vadd.f32 %v2577_v23, %v2547_v30  ;;  %v2387_v53 = vmax.f32 %v2245_v49, %v2355_v63  ;;  %v2250_v18 = vadd.f32 %v2249_v28, %v3873_v17  ;;  %v2251_v46 = vpop.f32.mrb[91].mxu1  ;;  %v2466_v17 = vpop.permute.xlu0 %2465 }
 0x670   :  { %v2548_v21 = vmul.f32 %v2458_v59, %v2387_v53  ;;  %v2356_v31 = vmul.f32 0.01, %v2250_v18 }
 0x671   :  { %v2254_v2 = vpop.f32.mrb[92].mxu1 }
 0x672   :  { %v2579_v9 = vadd.f32 %v2578_v40, %v2548_v21  ;;  %v2388_v4 = vmax.f32 %v2250_v18, %v2356_v31  ;;  %v2255_v11 = vadd.f32 %v2254_v2, %v3875_v56  ;;  %v2256_v3 = vpop.f32.mrb[93].mxu1  ;;  %v2470_v56 = vpop.permute.xlu1 %2469 }
 0x674   :  { %v2549_v45 = vmul.f32 %v2462_v42, %v2388_v4  ;;  %v2357_v22 = vmul.f32 0.01, %v2255_v11 }
 0x675   :  { %v2259_v61 = vpop.f32.mrb[94].mxu1 }
 0x676   :  { %v2580_v37 = vadd.f32 %v2579_v9, %v2549_v45  ;;  %v2389_v48 = vmax.f32 %v2255_v11, %v2357_v22  ;;  %v2260_v33 = vadd.f32 %v2259_v61, %v3877_v29  ;;  %v2261_v25 = vpop.f32.mrb[95].mxu1  ;;  %v2474_v29 = vpop.permute.xlu0 %2473 }
 0x678   :  { %v2550_v38 = vmul.f32 %v2466_v17, %v2389_v48  ;;  %v2358_v6 = vmul.f32 0.01, %v2260_v33 }
 0x679   :  { %v2264_v39 = vpop.f32.mrb[96].mxu1 }
 0x67a   :  { %v2581_v50 = vadd.f32 %v2580_v37, %v2550_v38  ;;  %v2390_v51 = vmax.f32 %v2260_v33, %v2358_v6  ;;  %v2265_v36 = vadd.f32 %v2264_v39, %v3879_v41  ;;  %v2266_v35 = vpop.f32.mrb[97].mxu1  ;;  %v2478_v41 = vpop.permute.xlu1 %2477 }
 0x67c   :  { %v2551_v62 = vmul.f32 %v2470_v56, %v2390_v51  ;;  %v2359_v43 = vmul.f32 0.01, %v2265_v36 }
 0x67d   :  { %v2269_v57 = vpop.f32.mrb[98].mxu1 }
 0x67e   :  { %v2582_v1 = vadd.f32 %v2581_v50, %v2551_v62  ;;  %v2391_v8 = vmax.f32 %v2265_v36, %v2359_v43  ;;  %v2270_v32 = vadd.f32 %v2269_v57, %v3881_v16  ;;  %v2271_v55 = vpop.f32.mrb[99].mxu1  ;;  %v2482_v16 = vpop.permute.xlu0 %2481 }
 0x680   :  { %v2552_v44 = vmul.f32 %v2474_v29, %v2391_v8  ;;  %v2360_v10 = vmul.f32 0.01, %v2270_v32 }
 0x681   :  { %v2274_v26 = vpop.f32.mrb[100].mxu1 }
 0x682   :  { %v2583_v60 = vadd.f32 %v2582_v1, %v2552_v44  ;;  %v2392_v12 = vmax.f32 %v2270_v32, %v2360_v10  ;;  %v2275_v23 = vadd.f32 %v2274_v26, %v3883_v5  ;;  %v2276_v54 = vpop.f32.mrb[101].mxu1  ;;  %v2486_v5 = vpop.permute.xlu1 %2485 }
 0x684   :  { %v2553_v49 = vmul.f32 %v2478_v41, %v2392_v12  ;;  %v2361_v24 = vmul.f32 0.01, %v2275_v23 }
 0x685   :  { %v2279_v14 = vpop.f32.mrb[102].mxu1 }
 0x686   :  { %v2584_v30 = vadd.f32 %v2583_v60, %v2553_v49  ;;  %v2393_v63 = vmax.f32 %v2275_v23, %v2361_v24  ;;  %v2280_v28 = vadd.f32 %v2279_v14, %v3885_v27  ;;  %v2281_v40 = vpop.f32.mrb[103].mxu1  ;;  %v2490_v27 = vpop.permute.xlu0 %2489 }
 0x688   :  { %v2554_v53 = vmul.f32 %v2482_v16, %v2393_v63  ;;  %v2362_v18 = vmul.f32 0.01, %v2280_v28 }
 0x689   :  { %v2284_v46 = vpop.f32.mrb[104].mxu1 }
 0x68a   :  { %v2585_v59 = vadd.f32 %v2584_v30, %v2554_v53  ;;  %v2394_v21 = vmax.f32 %v2280_v28, %v2362_v18  ;;  %v2285_v31 = vadd.f32 %v2284_v46, %v3887_v52  ;;  %v2286_v2 = vpop.f32.mrb[105].mxu1  ;;  %v2494_v52 = vpop.permute.xlu1 %2493 }
 0x68c   :  { %v2555_v9 = vmul.f32 %v2486_v5, %v2394_v21  ;;  %v2363_v4 = vmul.f32 0.01, %v2285_v31 }
 0x68d   :  { %v2289_v11 = vpop.f32.mrb[106].mxu1 }
 0x68e   :  { %v2586_v3 = vadd.f32 %v2585_v59, %v2555_v9  ;;  %v2395_v42 = vmax.f32 %v2285_v31, %v2363_v4  ;;  %v2290_v45 = vadd.f32 %v2289_v11, %v3889_v19  ;;  %v2291_v22 = vpop.f32.mrb[107].mxu1  ;;  %v2498_v19 = vpop.permute.xlu0 %2497 }
 0x690   :  { %v2556_v61 = vmul.f32 %v2490_v27, %v2395_v42  ;;  %v2364_v37 = vmul.f32 0.01, %v2290_v45 }
 0x691   :  { %v2294_v48 = vpop.f32.mrb[108].mxu1 }
 0x692   :  { %v2587_v33 = vadd.f32 %v2586_v3, %v2556_v61  ;;  %v2396_v25 = vmax.f32 %v2290_v45, %v2364_v37  ;;  %v2295_v17 = vadd.f32 %v2294_v48, %v3891_v47  ;;  %v2296_v38 = vpop.f32.mrb[109].mxu1  ;;  %v2502_v47 = vpop.permute.xlu1 %2501 }
 0x693   :  { %v2506_v10 = vpop.permute.xlu0 %2505 }
 0x694   :  { %v2557_v6 = vmul.f32 %v2494_v52, %v2396_v25  ;;  %v2365_v39 = vmul.f32 0.01, %v2295_v17 }
 0x695   :  { %v2299_v50 = vpop.f32.mrb[110].mxu1 }
 0x696   :  { %v2588_v51 = vadd.f32 %v2587_v33, %v2557_v6  ;;  %v2397_v36 = vmax.f32 %v2295_v17, %v2365_v39  ;;  %v2300_v35 = vadd.f32 %v2299_v50, %v3893_v7  ;;  %v2301_v56 = vpop.f32.mrb[111].mxu1  ;;  %v2510_v49 = vpop.permute.xlu1 %2509 }
 0x697   :  { %v2514_v28 = vpop.permute.xlu0 %2513 }
 0x698   :  { %v2558_v62 = vmul.f32 %v2498_v19, %v2397_v36  ;;  %v2366_v43 = vmul.f32 0.01, %v2300_v35 }
 0x699   :  { %v2304_v57 = vpop.f32.mrb[112].mxu1 }
 0x69a   :  { %v2589_v1 = vadd.f32 %v2588_v51, %v2558_v62  ;;  %v2398_v8 = vmax.f32 %v2300_v35, %v2366_v43  ;;  %v2305_v32 = vadd.f32 %v2304_v57, %v3895_v13  ;;  %v2306_v55 = vpop.f32.mrb[113].mxu1  ;;  %v2112_v18 = vpop.permute.xlu1 %2111 }
 0x69b   :  { %v2518_v5 = vpop.permute.xlu0 %2517 }
 0x69c   :  { %v2559_v29 = vmul.f32 %v2502_v47, %v2398_v8  ;;  %v2367_v44 = vmul.f32 0.01, %v2305_v32 }
 0x69d   :  { %v2309_v26 = vpop.f32.mrb[114].mxu1 }
 0x69e   :  { %v2590_v60 = vadd.f32 %v2589_v1, %v2559_v29  ;;  %v2399_v12 = vmax.f32 %v2305_v32, %v2367_v44  ;;  %v2310_v23 = vadd.f32 %v2309_v26, %v3897_v34  ;;  %v2311_v7 = vpop.f32.mrb[115].mxu1  ;;  %v2116_v42 = vpop.permute.xlu1 %2115 }
 0x6a0   :  { %v2560_v54 = vmul.f32 %v2506_v10, %v2399_v12  ;;  %v2368_v41 = vmul.f32 0.01, %v2310_v23 }
 0x6a1   :  { %v2314_v24 = vpop.f32.mrb[116].mxu1 }
 0x6a2   :  { %v2591_v14 = vadd.f32 %v2590_v60, %v2560_v54  ;;  %v2400_v30 = vmax.f32 %v2310_v23, %v2368_v41  ;;  %v2315_v63 = vadd.f32 %v2314_v24, %v3899_v0  ;;  %v2316_v13 = vpop.f32.mrb[117].mxu1  ;;  %v2526_v52 = vpop.permute.xlu1 %2525 }
 0x6a4   :  { %v2561_v40 = vmul.f32 %v2510_v49, %v2400_v30  ;;  %v2369_v16 = vmul.f32 0.01, %v2315_v63 }
 0x6a5   :  { %v2319_v53 = vpop.f32.mrb[118].mxu1 }
 0x6a6   :  { %v2592_v46 = vadd.f32 %v2591_v14, %v2561_v40  ;;  %v2401_v59 = vmax.f32 %v2315_v63, %v2369_v16  ;;  %v2320_v21 = vadd.f32 %v2319_v53, %v3901_v15  ;;  %v2321_v34 = vpop.f32.mrb[119].mxu1  ;;  %v2522_v15 = vpop.permute.xlu0 %2521 }
 0x6a7   :  { %v2534_v55 = vpop.permute.xlu1 %2533 }
 0x6a8   :  { %v2562_v31 = vmul.f32 %v2514_v28, %v2401_v59  ;;  %v2370_v2 = vmul.f32 0.01, %v2320_v21 }
 0x6a9   :  { %v2324_v9 = vpop.f32.mrb[120].mxu1 }
 0x6aa   :  { %v2593_v4 = vadd.f32 %v2592_v46, %v2562_v31  ;;  %v2402_v11 = vmax.f32 %v2320_v21, %v2370_v2  ;;  %v2325_v3 = vadd.f32 %v2324_v9, %v3903_v58  ;;  %v2326_v0 = vpop.f32.mrb[121].mxu1  ;;  %v2530_v57 = vpop.permute.xlu0 %2529 }
 0x6ac   :  { %v2563_v45 = vmul.f32 %v2518_v5, %v2402_v11  ;;  %v2371_v22 = vmul.f32 0.01, %v2325_v3 }
 0x6ad   :  { %v2329_v27 = vpop.f32.mrb[122].mxu1 }
 0x6ae   :  { %v2403_v61 = vmax.f32 %v2325_v3, %v2371_v22  ;;  %v2330_v37 = vadd.f32 %v2329_v27, %v3905_v20  ;;  %v2331_v48 = vpop.f32.mrb[123].mxu1  ;;  %v2594_v33 = vadd.f32 %v2593_v4, %v2563_v45  ;;  %v2608_v23 = vpop.permute.xlu0 %2607 }
 0x6b0   :  { %v2564_v25 = vmul.f32 %v2522_v15, %v2403_v61  ;;  %v2372_v17 = vmul.f32 0.01, %v2330_v37 }
 0x6b1   :  { %v2334_v38 = vpop.f32.mrb[124].mxu1 }
 0x6b2   :  { %v2335_v6 = vadd.f32 %v2334_v38, %v2112_v18  ;;  %v2404_v39 = vmax.f32 %v2330_v37, %v2372_v17  ;;  %v2595_v50 = vadd.f32 %v2594_v33, %v2564_v25  ;;  %v2336_v51 = vpop.f32.mrb[125].mxu1 }
 0x6b4   :  { %v2373_v58 = vmul.f32 0.01, %v2335_v6  ;;  %v2565_v36 = vmul.f32 %v2526_v52, %v2404_v39 }
 0x6b5   :  { %v2339_v35 = vpop.f32.mrb[126].mxu1 }
 0x6b6   :  { %v2405_v56 = vmax.f32 %v2335_v6, %v2373_v58  ;;  %v2596_v19 = vadd.f32 %v2595_v50, %v2565_v36  ;;  %v2340_v62 = vadd.f32 %v2339_v35, %v2116_v42  ;;  %v2341_v43 = vpop.f32.mrb[127].mxu1 }
 0x6b8   :  { %v2566_v20 = vmul.f32 %v2530_v57, %v2405_v56  ;;  %v2374_v1 = vmul.f32 0.01, %v2340_v62 }
 0x6ba   :  { %v2406_v8 = vmax.f32 %v2340_v62, %v2374_v1  ;;  %v2597_v32 = vadd.f32 %v2596_v19, %v2566_v20 }
 0x6bc   :  { %v2567_v47 = vmul.f32 %v2534_v55, %v2406_v8 }
 0x6be   :  { %v2598_v29 = vadd.f32 %v2597_v32, %v2567_v47 }
 0x6c0   :  { %v2599_v44 = vrot.slane %v2598_v29, 4 }
 0x6c2   :  { %v2600_v10 = vadd.f32 %v2599_v44, %v2598_v29 }
 0x6c4   :  { %v2601_v26 = vrot.slane %v2600_v10, 2 }
 0x6c6   :  { %v2602_v60 = vadd.f32 %v2601_v26, %v2600_v10 }
 0x6c8   :  { %v2603_v12 = vrot.slane %v2602_v60, 1 }
 0x6ca   :  { %v2604_v7 = vadd.f32 %v2603_v12, %v2602_v60 }
 0x6cc   :  { %v2610_v54 = vadd.f32 %v2608_v23, %v2604_v7 }
 0x6ce   :  { %2611 = vst [vmem:[%s3937_s3] sm:$0x1] %v2610_v54 }
 0x6cf   :  { %2616 = vsyncpa [#allocation3], 1 }

</bundles_post_ra>
